<compile_context>
chip_gen: v7x
topology: tpu7x:2x2x1
jax: 0.10.0
libtpu: 0.0.40
codegen_flags: <defaults>
</compile_context>

<pallas_src>
import math
import functools

import jax
import jax.numpy as jnp
from jax import lax
from jax.experimental import pallas as pl
from jax.experimental.pallas import tpu as pltpu


_VMEM_LIMIT = 64 * 1024 * 1024   # scoped VMEM limit; <= physical on all gens
_NEG = -1.0e30                   # additive mask bias (exp underflows to exactly 0)


# ----------------------------------------------------------------------------
# In-kernel helpers
# ----------------------------------------------------------------------------
def _layer_norm(x, g, b):
    # PyTorch LayerNorm, eps=1e-12, biased variance, f32 statistics.
    mean = jnp.mean(x, axis=-1, keepdims=True)
    c = x - mean
    var = jnp.mean(c * c, axis=-1, keepdims=True)
    return c * lax.rsqrt(var + 1e-12) * g + b


def _attn_heads(q_full, k_full, v_full, bias, row_keep, wo_ref, n_head, dk):
    """Multi-head attention core from fused lane-dense projections.

    q_full: (T, D) f32, k_full/v_full: (S, D) f32 (bias already added),
    bias:   additive f32 mask broadcastable to (T, S)  (0 keep / -1e30 masked),
    row_keep: f32 broadcastable to (T, 1), zero for fully-masked query rows,
    wo_ref: (h, dk, D) bf16 per-head output projection.
    Returns (T, D) f32 (output projection WITHOUT its bias; caller adds it).
    """
    inv_sqrt_dk = 1.0 / math.sqrt(dk)
    out = None
    # TODO(synk): for long T/S switch to an online-softmax (flash) formulation
    # with a KV grid axis (matters first on v7x's 64 MiB VMEM).
    for i in range(n_head):
        lo, hi = i * dk, (i + 1) * dk
        q = q_full[:, lo:hi].astype(jnp.bfloat16)
        k = k_full[:, lo:hi].astype(jnp.bfloat16)
        v = v_full[:, lo:hi].astype(jnp.bfloat16)
        # scores = q @ k^T / sqrt(dk) + mask_bias    (bf16 operands, f32 accum)
        s = lax.dot_general(q, k, (((1,), (1,)), ((), ())),
                            preferred_element_type=jnp.float32)
        s = s * inv_sqrt_dk + bias
        s = s - jnp.max(s, axis=-1, keepdims=True)
        e = jnp.exp(s)
        p = e * pl.reciprocal(jnp.sum(e, axis=-1, keepdims=True), approx=True)
        p = p * row_keep                           # zero fully-masked rows
        ctx = jnp.dot(p.astype(jnp.bfloat16), v,
                      preferred_element_type=jnp.float32)
        contrib = jnp.dot(ctx.astype(jnp.bfloat16), wo_ref[i],
                          preferred_element_type=jnp.float32)
        out = contrib if out is None else out + contrib
    return out


# ----------------------------------------------------------------------------
# Fused per-layer kernel:  LN1 -> self-attn -> LN2 -> src-attn -> LN3 -> FFN
# ----------------------------------------------------------------------------
def _decoder_layer_kernel(x_ref, tbias_ref, mem_ref, mbias_ref,
                          n1g_ref, n1b_ref, wqkv_ref, bqkv_ref, wos_ref, bos_ref,
                          n2g_ref, n2b_ref, wq_ref, bq_ref, wkv_ref, bkv_ref,
                          woc_ref, boc_ref,
                          n3g_ref, n3b_ref, w1_ref, b1_ref, w2_ref, b2_ref,
                          o_ref, *, n_head):
    x = x_ref[0]                                   # (T, D) f32
    D = x.shape[-1]
    dk = D // n_head

    # ---------------- self attention ----------------
    xn = _layer_norm(x, n1g_ref[...], n1b_ref[...]).astype(jnp.bfloat16)
    qkv = jnp.dot(xn, wqkv_ref[...],
                  preferred_element_type=jnp.float32) + bqkv_ref[...]   # (T, 3D)
    tbias = tbias_ref[0]                            # (T, T)
    t_keep = (jnp.max(tbias, axis=-1, keepdims=True) > -1.0).astype(jnp.float32)
    attn = _attn_heads(qkv[:, :D], qkv[:, D:2 * D], qkv[:, 2 * D:],
                       tbias, t_keep, wos_ref, n_head, dk)
    x = x + attn + bos_ref[...]

    # ---------------- source attention ----------------
    xn = _layer_norm(x, n2g_ref[...], n2b_ref[...]).astype(jnp.bfloat16)
    q = jnp.dot(xn, wq_ref[...],
                preferred_element_type=jnp.float32) + bq_ref[...]       # (T, D)
    mem = mem_ref[0]                                # (S, D) bf16
    kv = jnp.dot(mem, wkv_ref[...],
                 preferred_element_type=jnp.float32) + bkv_ref[...]     # (S, 2D)
    mbias = mbias_ref[0]                            # (1, S)
    m_keep = (jnp.max(mbias, axis=-1, keepdims=True) > -1.0).astype(jnp.float32)
    attn = _attn_heads(q, kv[:, :D], kv[:, D:], mbias, m_keep,
                       woc_ref, n_head, dk)
    x = x + attn + boc_ref[...]

    # ---------------- position-wise feed forward ----------------
    xn = _layer_norm(x, n3g_ref[...], n3b_ref[...]).astype(jnp.bfloat16)
    h = jnp.dot(xn, w1_ref[...],
                preferred_element_type=jnp.float32) + b1_ref[...]
    h = jnp.maximum(h, 0.0)
    y = jnp.dot(h.astype(jnp.bfloat16), w2_ref[...],
                preferred_element_type=jnp.float32) + b2_ref[...]
    o_ref[0] = x + y


def decoder_layer(x, tbias, mem_bf16, mbias, lp, n_head):
    B, T, D = x.shape
    S = mem_bf16.shape[1]
    dk = D // n_head
    d_ff = lp["w1"].shape[1]
    kernel = functools.partial(_decoder_layer_kernel, n_head=n_head)
    const2 = lambda b: (0, 0)
    const3 = lambda b: (0, 0, 0)
    # TODO(synk): on v7x add a T-tile grid axis (queries are independent) so
    # both TensorCores are busy at batch=1, and single-buffer the constant
    # weight BlockSpecs (pipeline_mode=pl.Buffered(1)) to halve weight VMEM.
    return pl.pallas_call(
        kernel,
        out_shape=jax.ShapeDtypeStruct((B, T, D), jnp.float32),
        grid=(B,),
        in_specs=[
            pl.BlockSpec((1, T, D), lambda b: (b, 0, 0)),        # x
            pl.BlockSpec((1, T, T), lambda b: (b, 0, 0)),        # tgt additive bias
            pl.BlockSpec((1, S, D), lambda b: (b, 0, 0)),        # memory (bf16)
            pl.BlockSpec((1, 1, S), lambda b: (b, 0, 0)),        # memory additive bias
            pl.BlockSpec((1, D), const2),                        # LN1 gamma
            pl.BlockSpec((1, D), const2),                        # LN1 beta
            pl.BlockSpec((D, 3 * D), const2),                    # self wqkv
            pl.BlockSpec((1, 3 * D), const2),                    # self bqkv
            pl.BlockSpec((n_head, dk, D), const3),               # self wo
            pl.BlockSpec((1, D), const2),                        # self bo
            pl.BlockSpec((1, D), const2),                        # LN2 gamma
            pl.BlockSpec((1, D), const2),                        # LN2 beta
            pl.BlockSpec((D, D), const2),                        # src wq
            pl.BlockSpec((1, D), const2),                        # src bq
            pl.BlockSpec((D, 2 * D), const2),                    # src wkv
            pl.BlockSpec((1, 2 * D), const2),                    # src bkv
            pl.BlockSpec((n_head, dk, D), const3),               # src wo
            pl.BlockSpec((1, D), const2),                        # src bo
            pl.BlockSpec((1, D), const2),                        # LN3 gamma
            pl.BlockSpec((1, D), const2),                        # LN3 beta
            pl.BlockSpec((D, d_ff), const2),                     # ffn w1
            pl.BlockSpec((1, d_ff), const2),                     # ffn b1
            pl.BlockSpec((d_ff, D), const2),                     # ffn w2
            pl.BlockSpec((1, D), const2),                        # ffn b2
        ],
        out_specs=pl.BlockSpec((1, T, D), lambda b: (b, 0, 0)),
        compiler_params=pltpu.CompilerParams(
            dimension_semantics=("parallel",),
            vmem_limit_bytes=_VMEM_LIMIT,
        ),
    )(x, tbias, mem_bf16, mbias,
      lp["norm1_g"], lp["norm1_b"], lp["wqkv"], lp["bqkv"], lp["wo_s"], lp["bo_s"],
      lp["norm2_g"], lp["norm2_b"], lp["wq_c"], lp["bq_c"], lp["wkv_c"], lp["bkv_c"],
      lp["wo_c"], lp["bo_c"],
      lp["norm3_g"], lp["norm3_b"], lp["w1"], lp["b1"], lp["w2"], lp["b2"])


# ----------------------------------------------------------------------------
# Fused after_norm + output_layer (vocab padded to 128 lanes, N-tiled)
# ----------------------------------------------------------------------------
def _output_kernel(x_ref, g_ref, beta_ref, w_ref, b_ref, o_ref):
    xn = _layer_norm(x_ref[...], g_ref[...], beta_ref[...])
    o_ref[...] = jnp.dot(xn.astype(jnp.bfloat16), w_ref[...],
                         preferred_element_type=jnp.float32) + b_ref[...]


def _choose_row_tiling(m):
    for tm in (512, 256, 128):
        if m % tm == 0:
            return m, tm
    if m > 256:
        tm = 256
        return pl.cdiv(m, tm) * tm, tm          # pad rows -> pipelined grid
    mp = ((m + 7) // 8) * 8                      # small M: single aligned tile
    return mp, mp


def _choose_col_tile(n):
    for tn in (2048, 1024, 512, 256, 128):
        if n % tn == 0:
            return tn
    return n


def output_block(x, g, beta, w_pad, b_pad, odim):
    B, T, D = x.shape
    M = B * T
    Mp, tm = _choose_row_tiling(M)
    Np = w_pad.shape[1]
    tn = _choose_col_tile(Np)
    x2 = x.reshape(M, D)
    if Mp != M:
        x2 = jnp.pad(x2, ((0, Mp - M), (0, 0)))
    y = pl.pallas_call(
        _output_kernel,
        out_shape=jax.ShapeDtypeStruct((Mp, Np), jnp.float32),
        grid=(Mp // tm, Np // tn),
        in_specs=[
            pl.BlockSpec((tm, D), lambda i, j: (i, 0)),     # x row tile
            pl.BlockSpec((1, D), lambda i, j: (0, 0)),      # after_norm gamma
            pl.BlockSpec((1, D), lambda i, j: (0, 0)),      # after_norm beta
            pl.BlockSpec((D, tn), lambda i, j: (0, j)),     # out_w vocab tile
            pl.BlockSpec((1, tn), lambda i, j: (0, j)),     # out_b vocab tile
        ],
        out_specs=pl.BlockSpec((tm, tn), lambda i, j: (i, j)),
        compiler_params=pltpu.CompilerParams(
            dimension_semantics=("parallel", "parallel"),
            vmem_limit_bytes=_VMEM_LIMIT,
        ),
    )(x2, g, beta, w_pad, b_pad)
    return y[:M, :odim].reshape(B, T, odim)


# ----------------------------------------------------------------------------
# Decoder forward (normalize_before=True, concat_after=False, eval mode)
# ----------------------------------------------------------------------------
def decoder_forward(params, tgt, tgt_mask, memory, memory_mask, *, n_head, odim):
    d_model = params["embed"].shape[1]
    # TODO(synk): embedding gather + sqrt(d_model) scale stay in XLA (reference
    # PositionalEncoding only scales in eval mode; no Pallas gather needed).
    x = params["embed"][tgt] * jnp.float32(math.sqrt(d_model))

    # Hoist mask conversion / memory cast out of the per-layer loop.
    # Additive biases: 0 where attended, -1e30 where masked (exp -> exactly 0).
    # TODO(synk): pass masks as int8 and build the bias in-kernel to cut the
    # per-layer mask DMA 4x for long sequences.
    mem_bf16 = memory.astype(jnp.bfloat16)
    tbias = jnp.where(tgt_mask == 0, _NEG, 0.0).astype(jnp.float32)       # (B,T,T)
    mbias = jnp.where(memory_mask == 0, _NEG, 0.0).astype(jnp.float32)    # (B,1,S)

    for lp in params["layers"]:
        x = decoder_layer(x, tbias, mem_bf16, mbias, lp, n_head)

    x = output_block(x, params["after_norm_g"], params["after_norm_b"],
                     params["out_w"], params["out_b"], odim)
    return x, tgt_mask


# ----------------------------------------------------------------------------
# Deterministic parameter initialization (torch.nn.Linear-style, f32, (in,out))
# ----------------------------------------------------------------------------
def init_params(key, odim, d_model, n_head, d_ff, num_blocks):
    keys = iter(jax.random.split(key, 256))

    def lin(din, dout):
        bound = 1.0 / math.sqrt(din)
        w = jax.random.uniform(next(keys), (din, dout), jnp.float32, -bound, bound)
        b = jax.random.uniform(next(keys), (dout,), jnp.float32, -bound, bound)
        return w, b

    def attn_params():
        wq, bq = lin(d_model, d_model)
        wk, bk = lin(d_model, d_model)
        wv, bv = lin(d_model, d_model)
        wo, bo = lin(d_model, d_model)
        return dict(wq=wq, bq=bq, wk=wk, bk=bk, wv=wv, bv=bv, wo=wo, bo=bo)

    params = {"embed": jax.random.normal(next(keys), (odim, d_model), jnp.float32)}
    layers = []
    for _ in range(num_blocks):
        w1, b1 = lin(d_model, d_ff)
        w2, b2 = lin(d_ff, d_model)
        layers.append(dict(
            self=attn_params(), src=attn_params(),
            ffn=dict(w1=w1, b1=b1, w2=w2, b2=b2),
            norm1_g=jnp.ones((d_model,), jnp.float32),
            norm1_b=jnp.zeros((d_model,), jnp.float32),
            norm2_g=jnp.ones((d_model,), jnp.float32),
            norm2_b=jnp.zeros((d_model,), jnp.float32),
            norm3_g=jnp.ones((d_model,), jnp.float32),
            norm3_b=jnp.zeros((d_model,), jnp.float32),
        ))
    params["layers"] = layers
    params["after_norm_g"] = jnp.ones((d_model,), jnp.float32)
    params["after_norm_b"] = jnp.zeros((d_model,), jnp.float32)
    ow, ob = lin(d_model, odim)
    params["out_w"] = ow
    params["out_b"] = ob
    return params


def prepare_params(raw, n_head, odim):
    """Convert torch-style f32 (in,out) params to the fused kernel layout:
    lane-dense fused QKV / KV bf16 weights, per-head stacked output projection,
    f32 biases / LN params, lane-padded output layer."""
    D = raw["embed"].shape[1]
    dk = D // n_head

    def attn_self(p):
        wqkv = jnp.concatenate([p["wq"], p["wk"], p["wv"]], axis=1).astype(jnp.bfloat16)
        bqkv = jnp.concatenate([p["bq"], p["bk"], p["bv"]]).reshape(1, 3 * D).astype(jnp.float32)
        wo = p["wo"].reshape(n_head, dk, D).astype(jnp.bfloat16)   # rows grouped by head
        bo = p["bo"].reshape(1, D).astype(jnp.float32)
        return wqkv, bqkv, wo, bo

    def attn_src(p):
        wq = p["wq"].astype(jnp.bfloat16)
        bq = p["bq"].reshape(1, D).astype(jnp.float32)
        wkv = jnp.concatenate([p["wk"], p["wv"]], axis=1).astype(jnp.bfloat16)
        bkv = jnp.concatenate([p["bk"], p["bv"]]).reshape(1, 2 * D).astype(jnp.float32)
        wo = p["wo"].reshape(n_head, dk, D).astype(jnp.bfloat16)
        bo = p["bo"].reshape(1, D).astype(jnp.float32)
        return wq, bq, wkv, bkv, wo, bo

    layers = []
    for lp in raw["layers"]:
        wqkv, bqkv, wo_s, bo_s = attn_self(lp["self"])
        wq_c, bq_c, wkv_c, bkv_c, wo_c, bo_c = attn_src(lp["src"])
        layers.append(dict(
            wqkv=wqkv, bqkv=bqkv, wo_s=wo_s, bo_s=bo_s,
            wq_c=wq_c, bq_c=bq_c, wkv_c=wkv_c, bkv_c=bkv_c, wo_c=wo_c, bo_c=bo_c,
            w1=lp["ffn"]["w1"].astype(jnp.bfloat16),
            b1=lp["ffn"]["b1"].reshape(1, -1).astype(jnp.float32),
            w2=lp["ffn"]["w2"].astype(jnp.bfloat16),
            b2=lp["ffn"]["b2"].reshape(1, -1).astype(jnp.float32),
            norm1_g=lp["norm1_g"].reshape(1, -1), norm1_b=lp["norm1_b"].reshape(1, -1),
            norm2_g=lp["norm2_g"].reshape(1, -1), norm2_b=lp["norm2_b"].reshape(1, -1),
            norm3_g=lp["norm3_g"].reshape(1, -1), norm3_b=lp["norm3_b"].reshape(1, -1),
        ))

    odim_pad = ((odim + 127) // 128) * 128   # lane-dense output stores
    out_w = jnp.zeros((D, odim_pad), jnp.float32).at[:, :odim].set(raw["out_w"])
    out_b = jnp.zeros((1, odim_pad), jnp.float32).at[:, :odim].set(raw["out_b"])
    return dict(
        embed=raw["embed"],
        layers=layers,
        after_norm_g=raw["after_norm_g"].reshape(1, -1),
        after_norm_b=raw["after_norm_b"].reshape(1, -1),
        out_w=out_w.astype(jnp.bfloat16),
        out_b=out_b,
    )


# ----------------------------------------------------------------------------
if __name__ == "__main__":
    # small shapes consistent with the module's forward signature
    B, T, S = 2, 8, 16          # batch, maxlen_out, maxlen_in
    odim = 10                   # output vocab
    d_model = 32                # attention_dim
    n_head = 4                  # attention_heads
    d_ff = 64                   # linear_units
    num_blocks = 2

    key = jax.random.PRNGKey(0)
    k_par, k_tgt, k_mem = jax.random.split(key, 3)

    raw_params = init_params(k_par, odim, d_model, n_head, d_ff, num_blocks)
    params = prepare_params(raw_params, n_head, odim)

    tgt = jax.random.randint(k_tgt, (B, T), 0, odim, dtype=jnp.int32)
    # subsequent (causal) mask, (B, T, T), 1 = attend, 0 = masked
    tgt_mask = jnp.broadcast_to(
        jnp.tril(jnp.ones((T, T), jnp.int32))[None], (B, T, T)
    )
    memory = jax.random.normal(k_mem, (B, S, d_model), jnp.float32)
    # padding mask for memory, (B, 1, S): second batch element has length 12
    lens = jnp.array([S, 12])
    memory_mask = (jnp.arange(S)[None, None, :] < lens[:, None, None]).astype(jnp.int32)

    fwd = jax.jit(functools.partial(decoder_forward, n_head=n_head, odim=odim))
    x, out_mask = fwd(params, tgt, tgt_mask, memory, memory_mask)
    jax.block_until_ready(x)
    assert x.shape == (B, T, odim) and out_mask.shape == (B, T, T)
    print("KERNEL_OK")
</pallas_src>

<mosaic_0001>
module attributes {stable_mosaic.version = 11 : i64} {
  func.func @_output_kernel(%arg0: i32, %arg1: i32, %arg2: memref<16x32xf32, #tpu.memory_space<vmem>>, %arg3: memref<1x32xf32, #tpu.memory_space<vmem>>, %arg4: memref<1x32xf32, #tpu.memory_space<vmem>>, %arg5: memref<32x128xbf16, #tpu.memory_space<vmem>>, %arg6: memref<1x128xf32, #tpu.memory_space<vmem>>, %arg7: memref<16x128xf32, #tpu.memory_space<vmem>>) attributes {dimension_semantics = [#tpu.dimension_semantics<parallel>, #tpu.dimension_semantics<parallel>], iteration_bounds = array<i64: 1, 1>, scalar_prefetch = 0 : i64, scratch_operands = 0 : i64, tpu.core_type = #tpu.core_type<tc>, window_params = [{transform_indices = @transform_0, window_bounds = array<i64: 16, 32>}, {pipeline_mode = #tpu.pipeline_mode<synchronous>, transform_indices = @transform_1, window_bounds = array<i64: 1, 32>}, {pipeline_mode = #tpu.pipeline_mode<synchronous>, transform_indices = @transform_2, window_bounds = array<i64: 1, 32>}, {transform_indices = @transform_3, window_bounds = array<i64: 32, 128>}, {transform_indices = @transform_4, window_bounds = array<i64: 1, 128>}, {transform_indices = @transform_5, window_bounds = array<i64: 16, 128>}]} {
    %c0 = arith.constant 0 : index
    %c0_0 = arith.constant 0 : index
    %0 = vector.load %arg2[%c0, %c0_0] : memref<16x32xf32, #tpu.memory_space<vmem>>, vector<16x32xf32>
    %c0_1 = arith.constant 0 : index
    %c0_2 = arith.constant 0 : index
    %1 = vector.load %arg3[%c0_1, %c0_2] : memref<1x32xf32, #tpu.memory_space<vmem>>, vector<1x32xf32>
    %c0_3 = arith.constant 0 : index
    %c0_4 = arith.constant 0 : index
    %2 = vector.load %arg4[%c0_3, %c0_4] : memref<1x32xf32, #tpu.memory_space<vmem>>, vector<1x32xf32>
    %cst = arith.constant dense<0.000000e+00> : vector<16xf32>
    %3 = vector.multi_reduction <add>, %0, %cst [1] : vector<16x32xf32> to vector<16xf32>
    %4 = vector.shape_cast %3 : vector<16xf32> to vector<16x1xf32>
    %cst_5 = arith.constant 3.200000e+01 : f32
    %5 = vector.broadcast %cst_5 : f32 to vector<16x1xf32>
    %6 = arith.divf %4, %5 : vector<16x1xf32>
    %7 = vector.broadcast %6 : vector<16x1xf32> to vector<16x32xf32>
    %8 = arith.subf %0, %7 : vector<16x32xf32>
    %9 = arith.mulf %8, %8 : vector<16x32xf32>
    %cst_6 = arith.constant dense<0.000000e+00> : vector<16xf32>
    %10 = vector.multi_reduction <add>, %9, %cst_6 [1] : vector<16x32xf32> to vector<16xf32>
    %11 = vector.shape_cast %10 : vector<16xf32> to vector<16x1xf32>
    %cst_7 = arith.constant 3.200000e+01 : f32
    %12 = vector.broadcast %cst_7 : f32 to vector<16x1xf32>
    %13 = arith.divf %11, %12 : vector<16x1xf32>
    %cst_8 = arith.constant 9.99999996E-13 : f32
    %14 = vector.broadcast %cst_8 : f32 to vector<16x1xf32>
    %15 = arith.addf %13, %14 : vector<16x1xf32>
    %16 = math.rsqrt %15 : vector<16x1xf32>
    %17 = vector.broadcast %16 : vector<16x1xf32> to vector<16x32xf32>
    %18 = arith.mulf %8, %17 : vector<16x32xf32>
    %19 = vector.broadcast %1 : vector<1x32xf32> to vector<16x32xf32>
    %20 = arith.mulf %18, %19 : vector<16x32xf32>
    %21 = vector.broadcast %2 : vector<1x32xf32> to vector<16x32xf32>
    %22 = arith.addf %20, %21 : vector<16x32xf32>
    %23 = arith.truncf %22 : vector<16x32xf32> to vector<16x32xbf16>
    %c0_9 = arith.constant 0 : index
    %c0_10 = arith.constant 0 : index
    %24 = vector.load %arg5[%c0_9, %c0_10] : memref<32x128xbf16, #tpu.memory_space<vmem>>, vector<32x128xbf16>
    %cst_11 = arith.constant dense<0.000000e+00> : vector<16x128xf32>
    %25 = tpu.matmul %23, %24, %cst_11 {dimension_numbers = #tpu.dot_dimension_numbers<[1], [0], [0], [1], [0, 0, 1, 1], [], []>} : vector<16x32xbf16>, vector<32x128xbf16>, vector<16x128xf32> -> vector<16x128xf32>
    %c0_12 = arith.constant 0 : index
    %c0_13 = arith.constant 0 : index
    %26 = vector.load %arg6[%c0_12, %c0_13] : memref<1x128xf32, #tpu.memory_space<vmem>>, vector<1x128xf32>
    %27 = vector.broadcast %26 : vector<1x128xf32> to vector<16x128xf32>
    %28 = arith.addf %25, %27 : vector<16x128xf32>
    %c0_14 = arith.constant 0 : index
    %c0_15 = arith.constant 0 : index
    %29 = vector.load %arg7[%c0_14, %c0_15] : memref<16x128xf32, #tpu.memory_space<vmem>>, vector<16x128xf32>
    tpu.vector_store %arg7[%c0_14, %c0_15], %28 {strides = array<i32>} : memref<16x128xf32, #tpu.memory_space<vmem>>, vector<16x128xf32>,
    return
  }
  func.func @transform_0(%arg0: i32, %arg1: i32) -> (i32, i32) {
    %c0_i32 = arith.constant 0 : i32
    %c0_i32_0 = arith.constant 0 : i32
    return %arg0, %c0_i32 : i32, i32
  }
  func.func @transform_1(%arg0: i32, %arg1: i32) -> (i32, i32) {
    %c0_i32 = arith.constant 0 : i32
    %c0_i32_0 = arith.constant 0 : i32
    %c0_i32_1 = arith.constant 0 : i32
    return %c0_i32, %c0_i32_0 : i32, i32
  }
  func.func @transform_2(%arg0: i32, %arg1: i32) -> (i32, i32) {
    %c0_i32 = arith.constant 0 : i32
    %c0_i32_0 = arith.constant 0 : i32
    %c0_i32_1 = arith.constant 0 : i32
    return %c0_i32, %c0_i32_0 : i32, i32
  }
  func.func @transform_3(%arg0: i32, %arg1: i32) -> (i32, i32) {
    %c0_i32 = arith.constant 0 : i32
    %c0_i32_0 = arith.constant 0 : i32
    return %c0_i32, %arg1 : i32, i32
  }
  func.func @transform_4(%arg0: i32, %arg1: i32) -> (i32, i32) {
    %c0_i32 = arith.constant 0 : i32
    %c0_i32_0 = arith.constant 0 : i32
    return %c0_i32, %arg1 : i32, i32
  }
  func.func @transform_5(%arg0: i32, %arg1: i32) -> (i32, i32) {
    %c0_i32 = arith.constant 0 : i32
    return %arg0, %arg1 : i32, i32
  }
}

module attributes {stable_mosaic.version = 11 : i64} {
  func.func @_decoder_layer_kernel(%arg0: i32, %arg1: memref<1x8x32xf32, #tpu.memory_space<vmem>>, %arg2: memref<1x8x8xf32, #tpu.memory_space<vmem>>, %arg3: memref<1x16x32xbf16, #tpu.memory_space<vmem>>, %arg4: memref<1x1x16xf32, #tpu.memory_space<vmem>>, %arg5: memref<1x32xf32, #tpu.memory_space<vmem>>, %arg6: memref<1x32xf32, #tpu.memory_space<vmem>>, %arg7: memref<32x96xbf16, #tpu.memory_space<vmem>>, %arg8: memref<1x96xf32, #tpu.memory_space<vmem>>, %arg9: memref<4x8x32xbf16, #tpu.memory_space<vmem>>, %arg10: memref<1x32xf32, #tpu.memory_space<vmem>>, %arg11: memref<1x32xf32, #tpu.memory_space<vmem>>, %arg12: memref<1x32xf32, #tpu.memory_space<vmem>>, %arg13: memref<32x32xbf16, #tpu.memory_space<vmem>>, %arg14: memref<1x32xf32, #tpu.memory_space<vmem>>, %arg15: memref<32x64xbf16, #tpu.memory_space<vmem>>, %arg16: memref<1x64xf32, #tpu.memory_space<vmem>>, %arg17: memref<4x8x32xbf16, #tpu.memory_space<vmem>>, %arg18: memref<1x32xf32, #tpu.memory_space<vmem>>, %arg19: memref<1x32xf32, #tpu.memory_space<vmem>>, %arg20: memref<1x32xf32, #tpu.memory_space<vmem>>, %arg21: memref<32x64xbf16, #tpu.memory_space<vmem>>, %arg22: memref<1x64xf32, #tpu.memory_space<vmem>>, %arg23: memref<64x32xbf16, #tpu.memory_space<vmem>>, %arg24: memref<1x32xf32, #tpu.memory_space<vmem>>, %arg25: memref<1x8x32xf32, #tpu.memory_space<vmem>>) attributes {dimension_semantics = [#tpu.dimension_semantics<parallel>], iteration_bounds = array<i64: 2>, scalar_prefetch = 0 : i64, scratch_operands = 0 : i64, tpu.core_type = #tpu.core_type<tc>, window_params = [{transform_indices = @transform_0, window_bounds = array<i64: 1, 8, 32>}, {transform_indices = @transform_1, window_bounds = array<i64: 1, 8, 8>}, {transform_indices = @transform_2, window_bounds = array<i64: 1, 16, 32>}, {transform_indices = @transform_3, window_bounds = array<i64: 1, 1, 16>}, {pipeline_mode = #tpu.pipeline_mode<synchronous>, transform_indices = @transform_4, window_bounds = array<i64: 1, 32>}, {pipeline_mode = #tpu.pipeline_mode<synchronous>, transform_indices = @transform_5, window_bounds = array<i64: 1, 32>}, {pipeline_mode = #tpu.pipeline_mode<synchronous>, transform_indices = @transform_6, window_bounds = array<i64: 32, 96>}, {pipeline_mode = #tpu.pipeline_mode<synchronous>, transform_indices = @transform_7, window_bounds = array<i64: 1, 96>}, {pipeline_mode = #tpu.pipeline_mode<synchronous>, transform_indices = @transform_8, window_bounds = array<i64: 4, 8, 32>}, {pipeline_mode = #tpu.pipeline_mode<synchronous>, transform_indices = @transform_9, window_bounds = array<i64: 1, 32>}, {pipeline_mode = #tpu.pipeline_mode<synchronous>, transform_indices = @transform_10, window_bounds = array<i64: 1, 32>}, {pipeline_mode = #tpu.pipeline_mode<synchronous>, transform_indices = @transform_11, window_bounds = array<i64: 1, 32>}, {pipeline_mode = #tpu.pipeline_mode<synchronous>, transform_indices = @transform_12, window_bounds = array<i64: 32, 32>}, {pipeline_mode = #tpu.pipeline_mode<synchronous>, transform_indices = @transform_13, window_bounds = array<i64: 1, 32>}, {pipeline_mode = #tpu.pipeline_mode<synchronous>, transform_indices = @transform_14, window_bounds = array<i64: 32, 64>}, {pipeline_mode = #tpu.pipeline_mode<synchronous>, transform_indices = @transform_15, window_bounds = array<i64: 1, 64>}, {pipeline_mode = #tpu.pipeline_mode<synchronous>, transform_indices = @transform_16, window_bounds = array<i64: 4, 8, 32>}, {pipeline_mode = #tpu.pipeline_mode<synchronous>, transform_indices = @transform_17, window_bounds = array<i64: 1, 32>}, {pipeline_mode = #tpu.pipeline_mode<synchronous>, transform_indices = @transform_18, window_bounds = array<i64: 1, 32>}, {pipeline_mode = #tpu.pipeline_mode<synchronous>, transform_indices = @transform_19, window_bounds = array<i64: 1, 32>}, {pipeline_mode = #tpu.pipeline_mode<synchronous>, transform_indices = @transform_20, window_bounds = array<i64: 32, 64>}, {pipeline_mode = #tpu.pipeline_mode<synchronous>, transform_indices = @transform_21, window_bounds = array<i64: 1, 64>}, {pipeline_mode = #tpu.pipeline_mode<synchronous>, transform_indices = @transform_22, window_bounds = array<i64: 64, 32>}, {pipeline_mode = #tpu.pipeline_mode<synchronous>, transform_indices = @transform_23, window_bounds = array<i64: 1, 32>}, {transform_indices = @transform_24, window_bounds = array<i64: 1, 8, 32>}]} {
    %c0 = arith.constant 0 : index
    %c0_0 = arith.constant 0 : index
    %c0_1 = arith.constant 0 : index
    %0 = vector.load %arg1[%c0, %c0_0, %c0_1] : memref<1x8x32xf32, #tpu.memory_space<vmem>>, vector<1x8x32xf32>
    %1 = vector.shape_cast %0 : vector<1x8x32xf32> to vector<8x32xf32>
    %c0_2 = arith.constant 0 : index
    %c0_3 = arith.constant 0 : index
    %2 = vector.load %arg5[%c0_2, %c0_3] : memref<1x32xf32, #tpu.memory_space<vmem>>, vector<1x32xf32>
    %c0_4 = arith.constant 0 : index
    %c0_5 = arith.constant 0 : index
    %3 = vector.load %arg6[%c0_4, %c0_5] : memref<1x32xf32, #tpu.memory_space<vmem>>, vector<1x32xf32>
    %cst = arith.constant dense<0.000000e+00> : vector<8xf32>
    %4 = vector.multi_reduction <add>, %1, %cst [1] : vector<8x32xf32> to vector<8xf32>
    %5 = vector.shape_cast %4 : vector<8xf32> to vector<8x1xf32>
    %cst_6 = arith.constant 3.200000e+01 : f32
    %6 = vector.broadcast %cst_6 : f32 to vector<8x1xf32>
    %7 = arith.divf %5, %6 : vector<8x1xf32>
    %8 = vector.broadcast %7 : vector<8x1xf32> to vector<8x32xf32>
    %9 = arith.subf %1, %8 : vector<8x32xf32>
    %10 = arith.mulf %9, %9 : vector<8x32xf32>
    %cst_7 = arith.constant dense<0.000000e+00> : vector<8xf32>
    %11 = vector.multi_reduction <add>, %10, %cst_7 [1] : vector<8x32xf32> to vector<8xf32>
    %12 = vector.shape_cast %11 : vector<8xf32> to vector<8x1xf32>
    %cst_8 = arith.constant 3.200000e+01 : f32
    %13 = vector.broadcast %cst_8 : f32 to vector<8x1xf32>
    %14 = arith.divf %12, %13 : vector<8x1xf32>
    %cst_9 = arith.constant 9.99999996E-13 : f32
    %15 = vector.broadcast %cst_9 : f32 to vector<8x1xf32>
    %16 = arith.addf %14, %15 : vector<8x1xf32>
    %17 = math.rsqrt %16 : vector<8x1xf32>
    %18 = vector.broadcast %17 : vector<8x1xf32> to vector<8x32xf32>
    %19 = arith.mulf %9, %18 : vector<8x32xf32>
    %20 = vector.broadcast %2 : vector<1x32xf32> to vector<8x32xf32>
    %21 = arith.mulf %19, %20 : vector<8x32xf32>
    %22 = vector.broadcast %3 : vector<1x32xf32> to vector<8x32xf32>
    %23 = arith.addf %21, %22 : vector<8x32xf32>
    %24 = arith.truncf %23 : vector<8x32xf32> to vector<8x32xbf16>
    %c0_10 = arith.constant 0 : index
    %c0_11 = arith.constant 0 : index
    %25 = vector.load %arg7[%c0_10, %c0_11] : memref<32x96xbf16, #tpu.memory_space<vmem>>, vector<32x96xbf16>
    %cst_12 = arith.constant dense<0.000000e+00> : vector<8x96xf32>
    %26 = tpu.matmul %24, %25, %cst_12 {dimension_numbers = #tpu.dot_dimension_numbers<[1], [0], [0], [1], [0, 0, 1, 1], [], []>} : vector<8x32xbf16>, vector<32x96xbf16>, vector<8x96xf32> -> vector<8x96xf32>
    %c0_13 = arith.constant 0 : index
    %c0_14 = arith.constant 0 : index
    %27 = vector.load %arg8[%c0_13, %c0_14] : memref<1x96xf32, #tpu.memory_space<vmem>>, vector<1x96xf32>
    %28 = vector.broadcast %27 : vector<1x96xf32> to vector<8x96xf32>
    %29 = arith.addf %26, %28 : vector<8x96xf32>
    %c0_15 = arith.constant 0 : index
    %c0_16 = arith.constant 0 : index
    %c0_17 = arith.constant 0 : index
    %30 = vector.load %arg2[%c0_15, %c0_16, %c0_17] : memref<1x8x8xf32, #tpu.memory_space<vmem>>, vector<1x8x8xf32>
    %31 = vector.shape_cast %30 : vector<1x8x8xf32> to vector<8x8xf32>
    %cst_18 = arith.constant dense<0xFF800000> : vector<8xf32>
    %32 = vector.multi_reduction <maximumf>, %31, %cst_18 [1] : vector<8x8xf32> to vector<8xf32>
    %33 = vector.shape_cast %32 : vector<8xf32> to vector<8x1xf32>
    %cst_19 = arith.constant -1.000000e+00 : f32
    %34 = vector.broadcast %cst_19 : f32 to vector<8x1xf32>
    %35 = arith.cmpf ogt, %33, %34 : vector<8x1xf32>
    %36 = arith.extui %35 : vector<8x1xi1> to vector<8x1xi32>
    %37 = arith.sitofp %36 : vector<8x1xi32> to vector<8x1xf32>
    %38 = vector.extract_strided_slice %29 {offsets = [0, 0], sizes = [8, 32], strides = [1, 1]} : vector<8x96xf32> to vector<8x32xf32>
    %39 = vector.extract_strided_slice %29 {offsets = [0, 32], sizes = [8, 32], strides = [1, 1]} : vector<8x96xf32> to vector<8x32xf32>
    %40 = vector.extract_strided_slice %29 {offsets = [0, 64], sizes = [8, 32], strides = [1, 1]} : vector<8x96xf32> to vector<8x32xf32>
    %41 = vector.extract_strided_slice %38 {offsets = [0, 0], sizes = [8, 8], strides = [1, 1]} : vector<8x32xf32> to vector<8x8xf32>
    %42 = arith.truncf %41 : vector<8x8xf32> to vector<8x8xbf16>
    %43 = vector.extract_strided_slice %39 {offsets = [0, 0], sizes = [8, 8], strides = [1, 1]} : vector<8x32xf32> to vector<8x8xf32>
    %44 = arith.truncf %43 : vector<8x8xf32> to vector<8x8xbf16>
    %45 = vector.extract_strided_slice %40 {offsets = [0, 0], sizes = [8, 8], strides = [1, 1]} : vector<8x32xf32> to vector<8x8xf32>
    %46 = arith.truncf %45 : vector<8x8xf32> to vector<8x8xbf16>
    %cst_20 = arith.constant dense<0.000000e+00> : vector<8x8xf32>
    %47 = tpu.matmul %42, %44, %cst_20 {dimension_numbers = #tpu.dot_dimension_numbers<[1], [1], [0], [0], [0, 0, 1, 0], [], []>} : vector<8x8xbf16>, vector<8x8xbf16>, vector<8x8xf32> -> vector<8x8xf32>
    %cst_21 = arith.constant 0.353553385 : f32
    %48 = vector.broadcast %cst_21 : f32 to vector<8x8xf32>
    %49 = arith.mulf %47, %48 : vector<8x8xf32>
    %50 = arith.addf %49, %31 : vector<8x8xf32>
    %cst_22 = arith.constant dense<0xFF800000> : vector<8xf32>
    %51 = vector.multi_reduction <maximumf>, %50, %cst_22 [1] : vector<8x8xf32> to vector<8xf32>
    %52 = vector.shape_cast %51 : vector<8xf32> to vector<8x1xf32>
    %53 = vector.broadcast %52 : vector<8x1xf32> to vector<8x8xf32>
    %54 = arith.subf %50, %53 : vector<8x8xf32>
    %55 = math.exp %54 : vector<8x8xf32>
    %cst_23 = arith.constant dense<0.000000e+00> : vector<8xf32>
    %56 = vector.multi_reduction <add>, %55, %cst_23 [1] : vector<8x8xf32> to vector<8xf32>
    %57 = vector.shape_cast %56 : vector<8xf32> to vector<8x1xf32>
    %58 = tpu.reciprocal %57 {approx = true} : vector<8x1xf32> -> vector<8x1xf32>
    %59 = vector.broadcast %58 : vector<8x1xf32> to vector<8x8xf32>
    %60 = arith.mulf %55, %59 : vector<8x8xf32>
    %61 = vector.broadcast %37 : vector<8x1xf32> to vector<8x8xf32>
    %62 = arith.mulf %60, %61 : vector<8x8xf32>
    %63 = arith.truncf %62 : vector<8x8xf32> to vector<8x8xbf16>
    %cst_24 = arith.constant dense<0.000000e+00> : vector<8x8xf32>
    %64 = tpu.matmul %63, %46, %cst_24 {dimension_numbers = #tpu.dot_dimension_numbers<[1], [0], [0], [1], [0, 0, 1, 1], [], []>} : vector<8x8xbf16>, vector<8x8xbf16>, vector<8x8xf32> -> vector<8x8xf32>
    %65 = arith.truncf %64 : vector<8x8xf32> to vector<8x8xbf16>
    %c0_25 = arith.constant 0 : index
    %c0_26 = arith.constant 0 : index
    %c0_27 = arith.constant 0 : index
    %66 = vector.load %arg9[%c0_25, %c0_26, %c0_27] : memref<4x8x32xbf16, #tpu.memory_space<vmem>>, vector<1x8x32xbf16>
    %67 = vector.shape_cast %66 : vector<1x8x32xbf16> to vector<8x32xbf16>
    %cst_28 = arith.constant dense<0.000000e+00> : vector<8x32xf32>
    %68 = tpu.matmul %65, %67, %cst_28 {dimension_numbers = #tpu.dot_dimension_numbers<[1], [0], [0], [1], [0, 0, 1, 1], [], []>} : vector<8x8xbf16>, vector<8x32xbf16>, vector<8x32xf32> -> vector<8x32xf32>
    %69 = vector.extract_strided_slice %38 {offsets = [0, 8], sizes = [8, 8], strides = [1, 1]} : vector<8x32xf32> to vector<8x8xf32>
    %70 = arith.truncf %69 : vector<8x8xf32> to vector<8x8xbf16>
    %71 = vector.extract_strided_slice %39 {offsets = [0, 8], sizes = [8, 8], strides = [1, 1]} : vector<8x32xf32> to vector<8x8xf32>
    %72 = arith.truncf %71 : vector<8x8xf32> to vector<8x8xbf16>
    %73 = vector.extract_strided_slice %40 {offsets = [0, 8], sizes = [8, 8], strides = [1, 1]} : vector<8x32xf32> to vector<8x8xf32>
    %74 = arith.truncf %73 : vector<8x8xf32> to vector<8x8xbf16>
    %cst_29 = arith.constant dense<0.000000e+00> : vector<8x8xf32>
    %75 = tpu.matmul %70, %72, %cst_29 {dimension_numbers = #tpu.dot_dimension_numbers<[1], [1], [0], [0], [0, 0, 1, 0], [], []>} : vector<8x8xbf16>, vector<8x8xbf16>, vector<8x8xf32> -> vector<8x8xf32>
    %cst_30 = arith.constant 0.353553385 : f32
    %76 = vector.broadcast %cst_30 : f32 to vector<8x8xf32>
    %77 = arith.mulf %75, %76 : vector<8x8xf32>
    %78 = arith.addf %77, %31 : vector<8x8xf32>
    %cst_31 = arith.constant dense<0xFF800000> : vector<8xf32>
    %79 = vector.multi_reduction <maximumf>, %78, %cst_31 [1] : vector<8x8xf32> to vector<8xf32>
    %80 = vector.shape_cast %79 : vector<8xf32> to vector<8x1xf32>
    %81 = vector.broadcast %80 : vector<8x1xf32> to vector<8x8xf32>
    %82 = arith.subf %78, %81 : vector<8x8xf32>
    %83 = math.exp %82 : vector<8x8xf32>
    %cst_32 = arith.constant dense<0.000000e+00> : vector<8xf32>
    %84 = vector.multi_reduction <add>, %83, %cst_32 [1] : vector<8x8xf32> to vector<8xf32>
    %85 = vector.shape_cast %84 : vector<8xf32> to vector<8x1xf32>
    %86 = tpu.reciprocal %85 {approx = true} : vector<8x1xf32> -> vector<8x1xf32>
    %87 = vector.broadcast %86 : vector<8x1xf32> to vector<8x8xf32>
    %88 = arith.mulf %83, %87 : vector<8x8xf32>
    %89 = vector.broadcast %37 : vector<8x1xf32> to vector<8x8xf32>
    %90 = arith.mulf %88, %89 : vector<8x8xf32>
    %91 = arith.truncf %90 : vector<8x8xf32> to vector<8x8xbf16>
    %cst_33 = arith.constant dense<0.000000e+00> : vector<8x8xf32>
    %92 = tpu.matmul %91, %74, %cst_33 {dimension_numbers = #tpu.dot_dimension_numbers<[1], [0], [0], [1], [0, 0, 1, 1], [], []>} : vector<8x8xbf16>, vector<8x8xbf16>, vector<8x8xf32> -> vector<8x8xf32>
    %93 = arith.truncf %92 : vector<8x8xf32> to vector<8x8xbf16>
    %c1 = arith.constant 1 : index
    %c0_34 = arith.constant 0 : index
    %c0_35 = arith.constant 0 : index
    %94 = vector.load %arg9[%c1, %c0_34, %c0_35] : memref<4x8x32xbf16, #tpu.memory_space<vmem>>, vector<1x8x32xbf16>
    %95 = vector.shape_cast %94 : vector<1x8x32xbf16> to vector<8x32xbf16>
    %cst_36 = arith.constant dense<0.000000e+00> : vector<8x32xf32>
    %96 = tpu.matmul %93, %95, %cst_36 {dimension_numbers = #tpu.dot_dimension_numbers<[1], [0], [0], [1], [0, 0, 1, 1], [], []>} : vector<8x8xbf16>, vector<8x32xbf16>, vector<8x32xf32> -> vector<8x32xf32>
    %97 = arith.addf %68, %96 : vector<8x32xf32>
    %98 = vector.extract_strided_slice %38 {offsets = [0, 16], sizes = [8, 8], strides = [1, 1]} : vector<8x32xf32> to vector<8x8xf32>
    %99 = arith.truncf %98 : vector<8x8xf32> to vector<8x8xbf16>
    %100 = vector.extract_strided_slice %39 {offsets = [0, 16], sizes = [8, 8], strides = [1, 1]} : vector<8x32xf32> to vector<8x8xf32>
    %101 = arith.truncf %100 : vector<8x8xf32> to vector<8x8xbf16>
    %102 = vector.extract_strided_slice %40 {offsets = [0, 16], sizes = [8, 8], strides = [1, 1]} : vector<8x32xf32> to vector<8x8xf32>
    %103 = arith.truncf %102 : vector<8x8xf32> to vector<8x8xbf16>
    %cst_37 = arith.constant dense<0.000000e+00> : vector<8x8xf32>
    %104 = tpu.matmul %99, %101, %cst_37 {dimension_numbers = #tpu.dot_dimension_numbers<[1], [1], [0], [0], [0, 0, 1, 0], [], []>} : vector<8x8xbf16>, vector<8x8xbf16>, vector<8x8xf32> -> vector<8x8xf32>
    %cst_38 = arith.constant 0.353553385 : f32
    %105 = vector.broadcast %cst_38 : f32 to vector<8x8xf32>
    %106 = arith.mulf %104, %105 : vector<8x8xf32>
    %107 = arith.addf %106, %31 : vector<8x8xf32>
    %cst_39 = arith.constant dense<0xFF800000> : vector<8xf32>
    %108 = vector.multi_reduction <maximumf>, %107, %cst_39 [1] : vector<8x8xf32> to vector<8xf32>
    %109 = vector.shape_cast %108 : vector<8xf32> to vector<8x1xf32>
    %110 = vector.broadcast %109 : vector<8x1xf32> to vector<8x8xf32>
    %111 = arith.subf %107, %110 : vector<8x8xf32>
    %112 = math.exp %111 : vector<8x8xf32>
    %cst_40 = arith.constant dense<0.000000e+00> : vector<8xf32>
    %113 = vector.multi_reduction <add>, %112, %cst_40 [1] : vector<8x8xf32> to vector<8xf32>
    %114 = vector.shape_cast %113 : vector<8xf32> to vector<8x1xf32>
    %115 = tpu.reciprocal %114 {approx = true} : vector<8x1xf32> -> vector<8x1xf32>
    %116 = vector.broadcast %115 : vector<8x1xf32> to vector<8x8xf32>
    %117 = arith.mulf %112, %116 : vector<8x8xf32>
    %118 = vector.broadcast %37 : vector<8x1xf32> to vector<8x8xf32>
    %119 = arith.mulf %117, %118 : vector<8x8xf32>
    %120 = arith.truncf %119 : vector<8x8xf32> to vector<8x8xbf16>
    %cst_41 = arith.constant dense<0.000000e+00> : vector<8x8xf32>
    %121 = tpu.matmul %120, %103, %cst_41 {dimension_numbers = #tpu.dot_dimension_numbers<[1], [0], [0], [1], [0, 0, 1, 1], [], []>} : vector<8x8xbf16>, vector<8x8xbf16>, vector<8x8xf32> -> vector<8x8xf32>
    %122 = arith.truncf %121 : vector<8x8xf32> to vector<8x8xbf16>
    %c2 = arith.constant 2 : index
    %c0_42 = arith.constant 0 : index
    %c0_43 = arith.constant 0 : index
    %123 = vector.load %arg9[%c2, %c0_42, %c0_43] : memref<4x8x32xbf16, #tpu.memory_space<vmem>>, vector<1x8x32xbf16>
    %124 = vector.shape_cast %123 : vector<1x8x32xbf16> to vector<8x32xbf16>
    %cst_44 = arith.constant dense<0.000000e+00> : vector<8x32xf32>
    %125 = tpu.matmul %122, %124, %cst_44 {dimension_numbers = #tpu.dot_dimension_numbers<[1], [0], [0], [1], [0, 0, 1, 1], [], []>} : vector<8x8xbf16>, vector<8x32xbf16>, vector<8x32xf32> -> vector<8x32xf32>
    %126 = arith.addf %97, %125 : vector<8x32xf32>
    %127 = vector.extract_strided_slice %38 {offsets = [0, 24], sizes = [8, 8], strides = [1, 1]} : vector<8x32xf32> to vector<8x8xf32>
    %128 = arith.truncf %127 : vector<8x8xf32> to vector<8x8xbf16>
    %129 = vector.extract_strided_slice %39 {offsets = [0, 24], sizes = [8, 8], strides = [1, 1]} : vector<8x32xf32> to vector<8x8xf32>
    %130 = arith.truncf %129 : vector<8x8xf32> to vector<8x8xbf16>
    %131 = vector.extract_strided_slice %40 {offsets = [0, 24], sizes = [8, 8], strides = [1, 1]} : vector<8x32xf32> to vector<8x8xf32>
    %132 = arith.truncf %131 : vector<8x8xf32> to vector<8x8xbf16>
    %cst_45 = arith.constant dense<0.000000e+00> : vector<8x8xf32>
    %133 = tpu.matmul %128, %130, %cst_45 {dimension_numbers = #tpu.dot_dimension_numbers<[1], [1], [0], [0], [0, 0, 1, 0], [], []>} : vector<8x8xbf16>, vector<8x8xbf16>, vector<8x8xf32> -> vector<8x8xf32>
    %cst_46 = arith.constant 0.353553385 : f32
    %134 = vector.broadcast %cst_46 : f32 to vector<8x8xf32>
    %135 = arith.mulf %133, %134 : vector<8x8xf32>
    %136 = arith.addf %135, %31 : vector<8x8xf32>
    %cst_47 = arith.constant dense<0xFF800000> : vector<8xf32>
    %137 = vector.multi_reduction <maximumf>, %136, %cst_47 [1] : vector<8x8xf32> to vector<8xf32>
    %138 = vector.shape_cast %137 : vector<8xf32> to vector<8x1xf32>
    %139 = vector.broadcast %138 : vector<8x1xf32> to vector<8x8xf32>
    %140 = arith.subf %136, %139 : vector<8x8xf32>
    %141 = math.exp %140 : vector<8x8xf32>
    %cst_48 = arith.constant dense<0.000000e+00> : vector<8xf32>
    %142 = vector.multi_reduction <add>, %141, %cst_48 [1] : vector<8x8xf32> to vector<8xf32>
    %143 = vector.shape_cast %142 : vector<8xf32> to vector<8x1xf32>
    %144 = tpu.reciprocal %143 {approx = true} : vector<8x1xf32> -> vector<8x1xf32>
    %145 = vector.broadcast %144 : vector<8x1xf32> to vector<8x8xf32>
    %146 = arith.mulf %141, %145 : vector<8x8xf32>
    %147 = vector.broadcast %37 : vector<8x1xf32> to vector<8x8xf32>
    %148 = arith.mulf %146, %147 : vector<8x8xf32>
    %149 = arith.truncf %148 : vector<8x8xf32> to vector<8x8xbf16>
    %cst_49 = arith.constant dense<0.000000e+00> : vector<8x8xf32>
    %150 = tpu.matmul %149, %132, %cst_49 {dimension_numbers = #tpu.dot_dimension_numbers<[1], [0], [0], [1], [0, 0, 1, 1], [], []>} : vector<8x8xbf16>, vector<8x8xbf16>, vector<8x8xf32> -> vector<8x8xf32>
    %151 = arith.truncf %150 : vector<8x8xf32> to vector<8x8xbf16>
    %c3 = arith.constant 3 : index
    %c0_50 = arith.constant 0 : index
    %c0_51 = arith.constant 0 : index
    %152 = vector.load %arg9[%c3, %c0_50, %c0_51] : memref<4x8x32xbf16, #tpu.memory_space<vmem>>, vector<1x8x32xbf16>
    %153 = vector.shape_cast %152 : vector<1x8x32xbf16> to vector<8x32xbf16>
    %cst_52 = arith.constant dense<0.000000e+00> : vector<8x32xf32>
    %154 = tpu.matmul %151, %153, %cst_52 {dimension_numbers = #tpu.dot_dimension_numbers<[1], [0], [0], [1], [0, 0, 1, 1], [], []>} : vector<8x8xbf16>, vector<8x32xbf16>, vector<8x32xf32> -> vector<8x32xf32>
    %155 = arith.addf %126, %154 : vector<8x32xf32>
    %156 = arith.addf %1, %155 : vector<8x32xf32>
    %c0_53 = arith.constant 0 : index
    %c0_54 = arith.constant 0 : index
    %157 = vector.load %arg10[%c0_53, %c0_54] : memref<1x32xf32, #tpu.memory_space<vmem>>, vector<1x32xf32>
    %158 = vector.broadcast %157 : vector<1x32xf32> to vector<8x32xf32>
    %159 = arith.addf %156, %158 : vector<8x32xf32>
    %c0_55 = arith.constant 0 : index
    %c0_56 = arith.constant 0 : index
    %160 = vector.load %arg11[%c0_55, %c0_56] : memref<1x32xf32, #tpu.memory_space<vmem>>, vector<1x32xf32>
    %c0_57 = arith.constant 0 : index
    %c0_58 = arith.constant 0 : index
    %161 = vector.load %arg12[%c0_57, %c0_58] : memref<1x32xf32, #tpu.memory_space<vmem>>, vector<1x32xf32>
    %cst_59 = arith.constant dense<0.000000e+00> : vector<8xf32>
    %162 = vector.multi_reduction <add>, %159, %cst_59 [1] : vector<8x32xf32> to vector<8xf32>
    %163 = vector.shape_cast %162 : vector<8xf32> to vector<8x1xf32>
    %cst_60 = arith.constant 3.200000e+01 : f32
    %164 = vector.broadcast %cst_60 : f32 to vector<8x1xf32>
    %165 = arith.divf %163, %164 : vector<8x1xf32>
    %166 = vector.broadcast %165 : vector<8x1xf32> to vector<8x32xf32>
    %167 = arith.subf %159, %166 : vector<8x32xf32>
    %168 = arith.mulf %167, %167 : vector<8x32xf32>
    %cst_61 = arith.constant dense<0.000000e+00> : vector<8xf32>
    %169 = vector.multi_reduction <add>, %168, %cst_61 [1] : vector<8x32xf32> to vector<8xf32>
    %170 = vector.shape_cast %169 : vector<8xf32> to vector<8x1xf32>
    %cst_62 = arith.constant 3.200000e+01 : f32
    %171 = vector.broadcast %cst_62 : f32 to vector<8x1xf32>
    %172 = arith.divf %170, %171 : vector<8x1xf32>
    %cst_63 = arith.constant 9.99999996E-13 : f32
    %173 = vector.broadcast %cst_63 : f32 to vector<8x1xf32>
    %174 = arith.addf %172, %173 : vector<8x1xf32>
    %175 = math.rsqrt %174 : vector<8x1xf32>
    %176 = vector.broadcast %175 : vector<8x1xf32> to vector<8x32xf32>
    %177 = arith.mulf %167, %176 : vector<8x32xf32>
    %178 = vector.broadcast %160 : vector<1x32xf32> to vector<8x32xf32>
    %179 = arith.mulf %177, %178 : vector<8x32xf32>
    %180 = vector.broadcast %161 : vector<1x32xf32> to vector<8x32xf32>
    %181 = arith.addf %179, %180 : vector<8x32xf32>
    %182 = arith.truncf %181 : vector<8x32xf32> to vector<8x32xbf16>
    %c0_64 = arith.constant 0 : index
    %c0_65 = arith.constant 0 : index
    %183 = vector.load %arg13[%c0_64, %c0_65] : memref<32x32xbf16, #tpu.memory_space<vmem>>, vector<32x32xbf16>
    %cst_66 = arith.constant dense<0.000000e+00> : vector<8x32xf32>
    %184 = tpu.matmul %182, %183, %cst_66 {dimension_numbers = #tpu.dot_dimension_numbers<[1], [0], [0], [1], [0, 0, 1, 1], [], []>} : vector<8x32xbf16>, vector<32x32xbf16>, vector<8x32xf32> -> vector<8x32xf32>
    %c0_67 = arith.constant 0 : index
    %c0_68 = arith.constant 0 : index
    %185 = vector.load %arg14[%c0_67, %c0_68] : memref<1x32xf32, #tpu.memory_space<vmem>>, vector<1x32xf32>
    %186 = vector.broadcast %185 : vector<1x32xf32> to vector<8x32xf32>
    %187 = arith.addf %184, %186 : vector<8x32xf32>
    %c0_69 = arith.constant 0 : index
    %c0_70 = arith.constant 0 : index
    %c0_71 = arith.constant 0 : index
    %188 = vector.load %arg3[%c0_69, %c0_70, %c0_71] : memref<1x16x32xbf16, #tpu.memory_space<vmem>>, vector<1x16x32xbf16>
    %189 = vector.shape_cast %188 : vector<1x16x32xbf16> to vector<16x32xbf16>
    %c0_72 = arith.constant 0 : index
    %c0_73 = arith.constant 0 : index
    %190 = vector.load %arg15[%c0_72, %c0_73] : memref<32x64xbf16, #tpu.memory_space<vmem>>, vector<32x64xbf16>
    %cst_74 = arith.constant dense<0.000000e+00> : vector<16x64xf32>
    %191 = tpu.matmul %189, %190, %cst_74 {dimension_numbers = #tpu.dot_dimension_numbers<[1], [0], [0], [1], [0, 0, 1, 1], [], []>} : vector<16x32xbf16>, vector<32x64xbf16>, vector<16x64xf32> -> vector<16x64xf32>
    %c0_75 = arith.constant 0 : index
    %c0_76 = arith.constant 0 : index
    %192 = vector.load %arg16[%c0_75, %c0_76] : memref<1x64xf32, #tpu.memory_space<vmem>>, vector<1x64xf32>
    %193 = vector.broadcast %192 : vector<1x64xf32> to vector<16x64xf32>
    %194 = arith.addf %191, %193 : vector<16x64xf32>
    %c0_77 = arith.constant 0 : index
    %c0_78 = arith.constant 0 : index
    %c0_79 = arith.constant 0 : index
    %195 = vector.load %arg4[%c0_77, %c0_78, %c0_79] : memref<1x1x16xf32, #tpu.memory_space<vmem>>, vector<1x1x16xf32>
    %196 = vector.shape_cast %195 : vector<1x1x16xf32> to vector<1x16xf32>
    %cst_80 = arith.constant dense<0xFF800000> : vector<1xf32>
    %197 = vector.multi_reduction <maximumf>, %196, %cst_80 [1] : vector<1x16xf32> to vector<1xf32>
    %198 = vector.shape_cast %197 : vector<1xf32> to vector<1x1xf32>
    %cst_81 = arith.constant -1.000000e+00 : f32
    %199 = vector.broadcast %cst_81 : f32 to vector<1x1xf32>
    %200 = arith.cmpf ogt, %198, %199 : vector<1x1xf32>
    %201 = arith.extui %200 : vector<1x1xi1> to vector<1x1xi32>
    %202 = arith.sitofp %201 : vector<1x1xi32> to vector<1x1xf32>
    %203 = vector.extract_strided_slice %194 {offsets = [0, 0], sizes = [16, 32], strides = [1, 1]} : vector<16x64xf32> to vector<16x32xf32>
    %204 = vector.extract_strided_slice %194 {offsets = [0, 32], sizes = [16, 32], strides = [1, 1]} : vector<16x64xf32> to vector<16x32xf32>
    %205 = vector.extract_strided_slice %187 {offsets = [0, 0], sizes = [8, 8], strides = [1, 1]} : vector<8x32xf32> to vector<8x8xf32>
    %206 = arith.truncf %205 : vector<8x8xf32> to vector<8x8xbf16>
    %207 = vector.extract_strided_slice %203 {offsets = [0, 0], sizes = [16, 8], strides = [1, 1]} : vector<16x32xf32> to vector<16x8xf32>
    %208 = arith.truncf %207 : vector<16x8xf32> to vector<16x8xbf16>
    %209 = vector.extract_strided_slice %204 {offsets = [0, 0], sizes = [16, 8], strides = [1, 1]} : vector<16x32xf32> to vector<16x8xf32>
    %210 = arith.truncf %209 : vector<16x8xf32> to vector<16x8xbf16>
    %cst_82 = arith.constant dense<0.000000e+00> : vector<8x16xf32>
    %211 = tpu.matmul %206, %208, %cst_82 {dimension_numbers = #tpu.dot_dimension_numbers<[1], [1], [0], [0], [0, 0, 1, 0], [], []>} : vector<8x8xbf16>, vector<16x8xbf16>, vector<8x16xf32> -> vector<8x16xf32>
    %cst_83 = arith.constant 0.353553385 : f32
    %212 = vector.broadcast %cst_83 : f32 to vector<8x16xf32>
    %213 = arith.mulf %211, %212 : vector<8x16xf32>
    %214 = vector.broadcast %196 : vector<1x16xf32> to vector<8x16xf32>
    %215 = arith.addf %213, %214 : vector<8x16xf32>
    %cst_84 = arith.constant dense<0xFF800000> : vector<8xf32>
    %216 = vector.multi_reduction <maximumf>, %215, %cst_84 [1] : vector<8x16xf32> to vector<8xf32>
    %217 = vector.shape_cast %216 : vector<8xf32> to vector<8x1xf32>
    %218 = vector.broadcast %217 : vector<8x1xf32> to vector<8x16xf32>
    %219 = arith.subf %215, %218 : vector<8x16xf32>
    %220 = math.exp %219 : vector<8x16xf32>
    %cst_85 = arith.constant dense<0.000000e+00> : vector<8xf32>
    %221 = vector.multi_reduction <add>, %220, %cst_85 [1] : vector<8x16xf32> to vector<8xf32>
    %222 = vector.shape_cast %221 : vector<8xf32> to vector<8x1xf32>
    %223 = tpu.reciprocal %222 {approx = true} : vector<8x1xf32> -> vector<8x1xf32>
    %224 = vector.broadcast %223 : vector<8x1xf32> to vector<8x16xf32>
    %225 = arith.mulf %220, %224 : vector<8x16xf32>
    %226 = vector.broadcast %202 : vector<1x1xf32> to vector<8x16xf32>
    %227 = arith.mulf %225, %226 : vector<8x16xf32>
    %228 = arith.truncf %227 : vector<8x16xf32> to vector<8x16xbf16>
    %cst_86 = arith.constant dense<0.000000e+00> : vector<8x8xf32>
    %229 = tpu.matmul %228, %210, %cst_86 {dimension_numbers = #tpu.dot_dimension_numbers<[1], [0], [0], [1], [0, 0, 1, 1], [], []>} : vector<8x16xbf16>, vector<16x8xbf16>, vector<8x8xf32> -> vector<8x8xf32>
    %230 = arith.truncf %229 : vector<8x8xf32> to vector<8x8xbf16>
    %c0_87 = arith.constant 0 : index
    %c0_88 = arith.constant 0 : index
    %c0_89 = arith.constant 0 : index
    %231 = vector.load %arg17[%c0_87, %c0_88, %c0_89] : memref<4x8x32xbf16, #tpu.memory_space<vmem>>, vector<1x8x32xbf16>
    %232 = vector.shape_cast %231 : vector<1x8x32xbf16> to vector<8x32xbf16>
    %cst_90 = arith.constant dense<0.000000e+00> : vector<8x32xf32>
    %233 = tpu.matmul %230, %232, %cst_90 {dimension_numbers = #tpu.dot_dimension_numbers<[1], [0], [0], [1], [0, 0, 1, 1], [], []>} : vector<8x8xbf16>, vector<8x32xbf16>, vector<8x32xf32> -> vector<8x32xf32>
    %234 = vector.extract_strided_slice %187 {offsets = [0, 8], sizes = [8, 8], strides = [1, 1]} : vector<8x32xf32> to vector<8x8xf32>
    %235 = arith.truncf %234 : vector<8x8xf32> to vector<8x8xbf16>
    %236 = vector.extract_strided_slice %203 {offsets = [0, 8], sizes = [16, 8], strides = [1, 1]} : vector<16x32xf32> to vector<16x8xf32>
    %237 = arith.truncf %236 : vector<16x8xf32> to vector<16x8xbf16>
    %238 = vector.extract_strided_slice %204 {offsets = [0, 8], sizes = [16, 8], strides = [1, 1]} : vector<16x32xf32> to vector<16x8xf32>
    %239 = arith.truncf %238 : vector<16x8xf32> to vector<16x8xbf16>
    %cst_91 = arith.constant dense<0.000000e+00> : vector<8x16xf32>
    %240 = tpu.matmul %235, %237, %cst_91 {dimension_numbers = #tpu.dot_dimension_numbers<[1], [1], [0], [0], [0, 0, 1, 0], [], []>} : vector<8x8xbf16>, vector<16x8xbf16>, vector<8x16xf32> -> vector<8x16xf32>
    %cst_92 = arith.constant 0.353553385 : f32
    %241 = vector.broadcast %cst_92 : f32 to vector<8x16xf32>
    %242 = arith.mulf %240, %241 : vector<8x16xf32>
    %243 = vector.broadcast %196 : vector<1x16xf32> to vector<8x16xf32>
    %244 = arith.addf %242, %243 : vector<8x16xf32>
    %cst_93 = arith.constant dense<0xFF800000> : vector<8xf32>
    %245 = vector.multi_reduction <maximumf>, %244, %cst_93 [1] : vector<8x16xf32> to vector<8xf32>
    %246 = vector.shape_cast %245 : vector<8xf32> to vector<8x1xf32>
    %247 = vector.broadcast %246 : vector<8x1xf32> to vector<8x16xf32>
    %248 = arith.subf %244, %247 : vector<8x16xf32>
    %249 = math.exp %248 : vector<8x16xf32>
    %cst_94 = arith.constant dense<0.000000e+00> : vector<8xf32>
    %250 = vector.multi_reduction <add>, %249, %cst_94 [1] : vector<8x16xf32> to vector<8xf32>
    %251 = vector.shape_cast %250 : vector<8xf32> to vector<8x1xf32>
    %252 = tpu.reciprocal %251 {approx = true} : vector<8x1xf32> -> vector<8x1xf32>
    %253 = vector.broadcast %252 : vector<8x1xf32> to vector<8x16xf32>
    %254 = arith.mulf %249, %253 : vector<8x16xf32>
    %255 = vector.broadcast %202 : vector<1x1xf32> to vector<8x16xf32>
    %256 = arith.mulf %254, %255 : vector<8x16xf32>
    %257 = arith.truncf %256 : vector<8x16xf32> to vector<8x16xbf16>
    %cst_95 = arith.constant dense<0.000000e+00> : vector<8x8xf32>
    %258 = tpu.matmul %257, %239, %cst_95 {dimension_numbers = #tpu.dot_dimension_numbers<[1], [0], [0], [1], [0, 0, 1, 1], [], []>} : vector<8x16xbf16>, vector<16x8xbf16>, vector<8x8xf32> -> vector<8x8xf32>
    %259 = arith.truncf %258 : vector<8x8xf32> to vector<8x8xbf16>
    %c1_96 = arith.constant 1 : index
    %c0_97 = arith.constant 0 : index
    %c0_98 = arith.constant 0 : index
    %260 = vector.load %arg17[%c1_96, %c0_97, %c0_98] : memref<4x8x32xbf16, #tpu.memory_space<vmem>>, vector<1x8x32xbf16>
    %261 = vector.shape_cast %260 : vector<1x8x32xbf16> to vector<8x32xbf16>
    %cst_99 = arith.constant dense<0.000000e+00> : vector<8x32xf32>
    %262 = tpu.matmul %259, %261, %cst_99 {dimension_numbers = #tpu.dot_dimension_numbers<[1], [0], [0], [1], [0, 0, 1, 1], [], []>} : vector<8x8xbf16>, vector<8x32xbf16>, vector<8x32xf32> -> vector<8x32xf32>
    %263 = arith.addf %233, %262 : vector<8x32xf32>
    %264 = vector.extract_strided_slice %187 {offsets = [0, 16], sizes = [8, 8], strides = [1, 1]} : vector<8x32xf32> to vector<8x8xf32>
    %265 = arith.truncf %264 : vector<8x8xf32> to vector<8x8xbf16>
    %266 = vector.extract_strided_slice %203 {offsets = [0, 16], sizes = [16, 8], strides = [1, 1]} : vector<16x32xf32> to vector<16x8xf32>
    %267 = arith.truncf %266 : vector<16x8xf32> to vector<16x8xbf16>
    %268 = vector.extract_strided_slice %204 {offsets = [0, 16], sizes = [16, 8], strides = [1, 1]} : vector<16x32xf32> to vector<16x8xf32>
    %269 = arith.truncf %268 : vector<16x8xf32> to vector<16x8xbf16>
    %cst_100 = arith.constant dense<0.000000e+00> : vector<8x16xf32>
    %270 = tpu.matmul %265, %267, %cst_100 {dimension_numbers = #tpu.dot_dimension_numbers<[1], [1], [0], [0], [0, 0, 1, 0], [], []>} : vector<8x8xbf16>, vector<16x8xbf16>, vector<8x16xf32> -> vector<8x16xf32>
    %cst_101 = arith.constant 0.353553385 : f32
    %271 = vector.broadcast %cst_101 : f32 to vector<8x16xf32>
    %272 = arith.mulf %270, %271 : vector<8x16xf32>
    %273 = vector.broadcast %196 : vector<1x16xf32> to vector<8x16xf32>
    %274 = arith.addf %272, %273 : vector<8x16xf32>
    %cst_102 = arith.constant dense<0xFF800000> : vector<8xf32>
    %275 = vector.multi_reduction <maximumf>, %274, %cst_102 [1] : vector<8x16xf32> to vector<8xf32>
    %276 = vector.shape_cast %275 : vector<8xf32> to vector<8x1xf32>
    %277 = vector.broadcast %276 : vector<8x1xf32> to vector<8x16xf32>
    %278 = arith.subf %274, %277 : vector<8x16xf32>
    %279 = math.exp %278 : vector<8x16xf32>
    %cst_103 = arith.constant dense<0.000000e+00> : vector<8xf32>
    %280 = vector.multi_reduction <add>, %279, %cst_103 [1] : vector<8x16xf32> to vector<8xf32>
    %281 = vector.shape_cast %280 : vector<8xf32> to vector<8x1xf32>
    %282 = tpu.reciprocal %281 {approx = true} : vector<8x1xf32> -> vector<8x1xf32>
    %283 = vector.broadcast %282 : vector<8x1xf32> to vector<8x16xf32>
    %284 = arith.mulf %279, %283 : vector<8x16xf32>
    %285 = vector.broadcast %202 : vector<1x1xf32> to vector<8x16xf32>
    %286 = arith.mulf %284, %285 : vector<8x16xf32>
    %287 = arith.truncf %286 : vector<8x16xf32> to vector<8x16xbf16>
    %cst_104 = arith.constant dense<0.000000e+00> : vector<8x8xf32>
    %288 = tpu.matmul %287, %269, %cst_104 {dimension_numbers = #tpu.dot_dimension_numbers<[1], [0], [0], [1], [0, 0, 1, 1], [], []>} : vector<8x16xbf16>, vector<16x8xbf16>, vector<8x8xf32> -> vector<8x8xf32>
    %289 = arith.truncf %288 : vector<8x8xf32> to vector<8x8xbf16>
    %c2_105 = arith.constant 2 : index
    %c0_106 = arith.constant 0 : index
    %c0_107 = arith.constant 0 : index
    %290 = vector.load %arg17[%c2_105, %c0_106, %c0_107] : memref<4x8x32xbf16, #tpu.memory_space<vmem>>, vector<1x8x32xbf16>
    %291 = vector.shape_cast %290 : vector<1x8x32xbf16> to vector<8x32xbf16>
    %cst_108 = arith.constant dense<0.000000e+00> : vector<8x32xf32>
    %292 = tpu.matmul %289, %291, %cst_108 {dimension_numbers = #tpu.dot_dimension_numbers<[1], [0], [0], [1], [0, 0, 1, 1], [], []>} : vector<8x8xbf16>, vector<8x32xbf16>, vector<8x32xf32> -> vector<8x32xf32>
    %293 = arith.addf %263, %292 : vector<8x32xf32>
    %294 = vector.extract_strided_slice %187 {offsets = [0, 24], sizes = [8, 8], strides = [1, 1]} : vector<8x32xf32> to vector<8x8xf32>
    %295 = arith.truncf %294 : vector<8x8xf32> to vector<8x8xbf16>
    %296 = vector.extract_strided_slice %203 {offsets = [0, 24], sizes = [16, 8], strides = [1, 1]} : vector<16x32xf32> to vector<16x8xf32>
    %297 = arith.truncf %296 : vector<16x8xf32> to vector<16x8xbf16>
    %298 = vector.extract_strided_slice %204 {offsets = [0, 24], sizes = [16, 8], strides = [1, 1]} : vector<16x32xf32> to vector<16x8xf32>
    %299 = arith.truncf %298 : vector<16x8xf32> to vector<16x8xbf16>
    %cst_109 = arith.constant dense<0.000000e+00> : vector<8x16xf32>
    %300 = tpu.matmul %295, %297, %cst_109 {dimension_numbers = #tpu.dot_dimension_numbers<[1], [1], [0], [0], [0, 0, 1, 0], [], []>} : vector<8x8xbf16>, vector<16x8xbf16>, vector<8x16xf32> -> vector<8x16xf32>
    %cst_110 = arith.constant 0.353553385 : f32
    %301 = vector.broadcast %cst_110 : f32 to vector<8x16xf32>
    %302 = arith.mulf %300, %301 : vector<8x16xf32>
    %303 = vector.broadcast %196 : vector<1x16xf32> to vector<8x16xf32>
    %304 = arith.addf %302, %303 : vector<8x16xf32>
    %cst_111 = arith.constant dense<0xFF800000> : vector<8xf32>
    %305 = vector.multi_reduction <maximumf>, %304, %cst_111 [1] : vector<8x16xf32> to vector<8xf32>
    %306 = vector.shape_cast %305 : vector<8xf32> to vector<8x1xf32>
    %307 = vector.broadcast %306 : vector<8x1xf32> to vector<8x16xf32>
    %308 = arith.subf %304, %307 : vector<8x16xf32>
    %309 = math.exp %308 : vector<8x16xf32>
    %cst_112 = arith.constant dense<0.000000e+00> : vector<8xf32>
    %310 = vector.multi_reduction <add>, %309, %cst_112 [1] : vector<8x16xf32> to vector<8xf32>
    %311 = vector.shape_cast %310 : vector<8xf32> to vector<8x1xf32>
    %312 = tpu.reciprocal %311 {approx = true} : vector<8x1xf32> -> vector<8x1xf32>
    %313 = vector.broadcast %312 : vector<8x1xf32> to vector<8x16xf32>
    %314 = arith.mulf %309, %313 : vector<8x16xf32>
    %315 = vector.broadcast %202 : vector<1x1xf32> to vector<8x16xf32>
    %316 = arith.mulf %314, %315 : vector<8x16xf32>
    %317 = arith.truncf %316 : vector<8x16xf32> to vector<8x16xbf16>
    %cst_113 = arith.constant dense<0.000000e+00> : vector<8x8xf32>
    %318 = tpu.matmul %317, %299, %cst_113 {dimension_numbers = #tpu.dot_dimension_numbers<[1], [0], [0], [1], [0, 0, 1, 1], [], []>} : vector<8x16xbf16>, vector<16x8xbf16>, vector<8x8xf32> -> vector<8x8xf32>
    %319 = arith.truncf %318 : vector<8x8xf32> to vector<8x8xbf16>
    %c3_114 = arith.constant 3 : index
    %c0_115 = arith.constant 0 : index
    %c0_116 = arith.constant 0 : index
    %320 = vector.load %arg17[%c3_114, %c0_115, %c0_116] : memref<4x8x32xbf16, #tpu.memory_space<vmem>>, vector<1x8x32xbf16>
    %321 = vector.shape_cast %320 : vector<1x8x32xbf16> to vector<8x32xbf16>
    %cst_117 = arith.constant dense<0.000000e+00> : vector<8x32xf32>
    %322 = tpu.matmul %319, %321, %cst_117 {dimension_numbers = #tpu.dot_dimension_numbers<[1], [0], [0], [1], [0, 0, 1, 1], [], []>} : vector<8x8xbf16>, vector<8x32xbf16>, vector<8x32xf32> -> vector<8x32xf32>
    %323 = arith.addf %293, %322 : vector<8x32xf32>
    %324 = arith.addf %159, %323 : vector<8x32xf32>
    %c0_118 = arith.constant 0 : index
    %c0_119 = arith.constant 0 : index
    %325 = vector.load %arg18[%c0_118, %c0_119] : memref<1x32xf32, #tpu.memory_space<vmem>>, vector<1x32xf32>
    %326 = vector.broadcast %325 : vector<1x32xf32> to vector<8x32xf32>
    %327 = arith.addf %324, %326 : vector<8x32xf32>
    %c0_120 = arith.constant 0 : index
    %c0_121 = arith.constant 0 : index
    %328 = vector.load %arg19[%c0_120, %c0_121] : memref<1x32xf32, #tpu.memory_space<vmem>>, vector<1x32xf32>
    %c0_122 = arith.constant 0 : index
    %c0_123 = arith.constant 0 : index
    %329 = vector.load %arg20[%c0_122, %c0_123] : memref<1x32xf32, #tpu.memory_space<vmem>>, vector<1x32xf32>
    %cst_124 = arith.constant dense<0.000000e+00> : vector<8xf32>
    %330 = vector.multi_reduction <add>, %327, %cst_124 [1] : vector<8x32xf32> to vector<8xf32>
    %331 = vector.shape_cast %330 : vector<8xf32> to vector<8x1xf32>
    %cst_125 = arith.constant 3.200000e+01 : f32
    %332 = vector.broadcast %cst_125 : f32 to vector<8x1xf32>
    %333 = arith.divf %331, %332 : vector<8x1xf32>
    %334 = vector.broadcast %333 : vector<8x1xf32> to vector<8x32xf32>
    %335 = arith.subf %327, %334 : vector<8x32xf32>
    %336 = arith.mulf %335, %335 : vector<8x32xf32>
    %cst_126 = arith.constant dense<0.000000e+00> : vector<8xf32>
    %337 = vector.multi_reduction <add>, %336, %cst_126 [1] : vector<8x32xf32> to vector<8xf32>
    %338 = vector.shape_cast %337 : vector<8xf32> to vector<8x1xf32>
    %cst_127 = arith.constant 3.200000e+01 : f32
    %339 = vector.broadcast %cst_127 : f32 to vector<8x1xf32>
    %340 = arith.divf %338, %339 : vector<8x1xf32>
    %cst_128 = arith.constant 9.99999996E-13 : f32
    %341 = vector.broadcast %cst_128 : f32 to vector<8x1xf32>
    %342 = arith.addf %340, %341 : vector<8x1xf32>
    %343 = math.rsqrt %342 : vector<8x1xf32>
    %344 = vector.broadcast %343 : vector<8x1xf32> to vector<8x32xf32>
    %345 = arith.mulf %335, %344 : vector<8x32xf32>
    %346 = vector.broadcast %328 : vector<1x32xf32> to vector<8x32xf32>
    %347 = arith.mulf %345, %346 : vector<8x32xf32>
    %348 = vector.broadcast %329 : vector<1x32xf32> to vector<8x32xf32>
    %349 = arith.addf %347, %348 : vector<8x32xf32>
    %350 = arith.truncf %349 : vector<8x32xf32> to vector<8x32xbf16>
    %c0_129 = arith.constant 0 : index
    %c0_130 = arith.constant 0 : index
    %351 = vector.load %arg21[%c0_129, %c0_130] : memref<32x64xbf16, #tpu.memory_space<vmem>>, vector<32x64xbf16>
    %cst_131 = arith.constant dense<0.000000e+00> : vector<8x64xf32>
    %352 = tpu.matmul %350, %351, %cst_131 {dimension_numbers = #tpu.dot_dimension_numbers<[1], [0], [0], [1], [0, 0, 1, 1], [], []>} : vector<8x32xbf16>, vector<32x64xbf16>, vector<8x64xf32> -> vector<8x64xf32>
    %c0_132 = arith.constant 0 : index
    %c0_133 = arith.constant 0 : index
    %353 = vector.load %arg22[%c0_132, %c0_133] : memref<1x64xf32, #tpu.memory_space<vmem>>, vector<1x64xf32>
    %354 = vector.broadcast %353 : vector<1x64xf32> to vector<8x64xf32>
    %355 = arith.addf %352, %354 : vector<8x64xf32>
    %cst_134 = arith.constant 0.000000e+00 : f32
    %356 = vector.broadcast %cst_134 : f32 to vector<8x64xf32>
    %357 = arith.maximumf %355, %356 : vector<8x64xf32>
    %358 = arith.truncf %357 : vector<8x64xf32> to vector<8x64xbf16>
    %c0_135 = arith.constant 0 : index
    %c0_136 = arith.constant 0 : index
    %359 = vector.load %arg23[%c0_135, %c0_136] : memref<64x32xbf16, #tpu.memory_space<vmem>>, vector<64x32xbf16>
    %cst_137 = arith.constant dense<0.000000e+00> : vector<8x32xf32>
    %360 = tpu.matmul %358, %359, %cst_137 {dimension_numbers = #tpu.dot_dimension_numbers<[1], [0], [0], [1], [0, 0, 1, 1], [], []>} : vector<8x64xbf16>, vector<64x32xbf16>, vector<8x32xf32> -> vector<8x32xf32>
    %c0_138 = arith.constant 0 : index
    %c0_139 = arith.constant 0 : index
    %361 = vector.load %arg24[%c0_138, %c0_139] : memref<1x32xf32, #tpu.memory_space<vmem>>, vector<1x32xf32>
    %362 = vector.broadcast %361 : vector<1x32xf32> to vector<8x32xf32>
    %363 = arith.addf %360, %362 : vector<8x32xf32>
    %364 = arith.addf %327, %363 : vector<8x32xf32>
    %c0_140 = arith.constant 0 : index
    %c0_141 = arith.constant 0 : index
    %c0_142 = arith.constant 0 : index
    %365 = vector.load %arg25[%c0_140, %c0_141, %c0_142] : memref<1x8x32xf32, #tpu.memory_space<vmem>>, vector<1x8x32xf32>
    %366 = vector.shape_cast %365 : vector<1x8x32xf32> to vector<8x32xf32>
    %367 = vector.shape_cast %364 : vector<8x32xf32> to vector<1x8x32xf32>
    tpu.vector_store %arg25[%c0_140, %c0_141, %c0_142], %367 {strides = array<i32>} : memref<1x8x32xf32, #tpu.memory_space<vmem>>, vector<1x8x32xf32>,
    return
  }
  func.func @transform_0(%arg0: i32) -> (i32, i32, i32) {
    %c0_i32 = arith.constant 0 : i32
    %c0_i32_0 = arith.constant 0 : i32
    %c0_i32_1 = arith.constant 0 : i32
    return %arg0, %c0_i32, %c0_i32_0 : i32, i32, i32
  }
  func.func @transform_1(%arg0: i32) -> (i32, i32, i32) {
    %c0_i32 = arith.constant 0 : i32
    %c0_i32_0 = arith.constant 0 : i32
    %c0_i32_1 = arith.constant 0 : i32
    return %arg0, %c0_i32, %c0_i32_0 : i32, i32, i32
  }
  func.func @transform_2(%arg0: i32) -> (i32, i32, i32) {
    %c0_i32 = arith.constant 0 : i32
    %c0_i32_0 = arith.constant 0 : i32
    %c0_i32_1 = arith.constant 0 : i32
    return %arg0, %c0_i32, %c0_i32_0 : i32, i32, i32
  }
  func.func @transform_3(%arg0: i32) -> (i32, i32, i32) {
    %c0_i32 = arith.constant 0 : i32
    %c0_i32_0 = arith.constant 0 : i32
    %c0_i32_1 = arith.constant 0 : i32
    return %arg0, %c0_i32, %c0_i32_0 : i32, i32, i32
  }
  func.func @transform_4(%arg0: i32) -> (i32, i32) {
    %c0_i32 = arith.constant 0 : i32
    %c0_i32_0 = arith.constant 0 : i32
    %c0_i32_1 = arith.constant 0 : i32
    return %c0_i32, %c0_i32_0 : i32, i32
  }
  func.func @transform_5(%arg0: i32) -> (i32, i32) {
    %c0_i32 = arith.constant 0 : i32
    %c0_i32_0 = arith.constant 0 : i32
    %c0_i32_1 = arith.constant 0 : i32
    return %c0_i32, %c0_i32_0 : i32, i32
  }
  func.func @transform_6(%arg0: i32) -> (i32, i32) {
    %c0_i32 = arith.constant 0 : i32
    %c0_i32_0 = arith.constant 0 : i32
    %c0_i32_1 = arith.constant 0 : i32
    return %c0_i32, %c0_i32_0 : i32, i32
  }
  func.func @transform_7(%arg0: i32) -> (i32, i32) {
    %c0_i32 = arith.constant 0 : i32
    %c0_i32_0 = arith.constant 0 : i32
    %c0_i32_1 = arith.constant 0 : i32
    return %c0_i32, %c0_i32_0 : i32, i32
  }
  func.func @transform_8(%arg0: i32) -> (i32, i32, i32) {
    %c0_i32 = arith.constant 0 : i32
    %c0_i32_0 = arith.constant 0 : i32
    %c0_i32_1 = arith.constant 0 : i32
    %c0_i32_2 = arith.constant 0 : i32
    return %c0_i32, %c0_i32_0, %c0_i32_1 : i32, i32, i32
  }
  func.func @transform_9(%arg0: i32) -> (i32, i32) {
    %c0_i32 = arith.constant 0 : i32
    %c0_i32_0 = arith.constant 0 : i32
    %c0_i32_1 = arith.constant 0 : i32
    return %c0_i32, %c0_i32_0 : i32, i32
  }
  func.func @transform_10(%arg0: i32) -> (i32, i32) {
    %c0_i32 = arith.constant 0 : i32
    %c0_i32_0 = arith.constant 0 : i32
    %c0_i32_1 = arith.constant 0 : i32
    return %c0_i32, %c0_i32_0 : i32, i32
  }
  func.func @transform_11(%arg0: i32) -> (i32, i32) {
    %c0_i32 = arith.constant 0 : i32
    %c0_i32_0 = arith.constant 0 : i32
    %c0_i32_1 = arith.constant 0 : i32
    return %c0_i32, %c0_i32_0 : i32, i32
  }
  func.func @transform_12(%arg0: i32) -> (i32, i32) {
    %c0_i32 = arith.constant 0 : i32
    %c0_i32_0 = arith.constant 0 : i32
    %c0_i32_1 = arith.constant 0 : i32
    return %c0_i32, %c0_i32_0 : i32, i32
  }
  func.func @transform_13(%arg0: i32) -> (i32, i32) {
    %c0_i32 = arith.constant 0 : i32
    %c0_i32_0 = arith.constant 0 : i32
    %c0_i32_1 = arith.constant 0 : i32
    return %c0_i32, %c0_i32_0 : i32, i32
  }
  func.func @transform_14(%arg0: i32) -> (i32, i32) {
    %c0_i32 = arith.constant 0 : i32
    %c0_i32_0 = arith.constant 0 : i32
    %c0_i32_1 = arith.constant 0 : i32
    return %c0_i32, %c0_i32_0 : i32, i32
  }
  func.func @transform_15(%arg0: i32) -> (i32, i32) {
    %c0_i32 = arith.constant 0 : i32
    %c0_i32_0 = arith.constant 0 : i32
    %c0_i32_1 = arith.constant 0 : i32
    return %c0_i32, %c0_i32_0 : i32, i32
  }
  func.func @transform_16(%arg0: i32) -> (i32, i32, i32) {
    %c0_i32 = arith.constant 0 : i32
    %c0_i32_0 = arith.constant 0 : i32
    %c0_i32_1 = arith.constant 0 : i32
    %c0_i32_2 = arith.constant 0 : i32
    return %c0_i32, %c0_i32_0, %c0_i32_1 : i32, i32, i32
  }
  func.func @transform_17(%arg0: i32) -> (i32, i32) {
    %c0_i32 = arith.constant 0 : i32
    %c0_i32_0 = arith.constant 0 : i32
    %c0_i32_1 = arith.constant 0 : i32
    return %c0_i32, %c0_i32_0 : i32, i32
  }
  func.func @transform_18(%arg0: i32) -> (i32, i32) {
    %c0_i32 = arith.constant 0 : i32
    %c0_i32_0 = arith.constant 0 : i32
    %c0_i32_1 = arith.constant 0 : i32
    return %c0_i32, %c0_i32_0 : i32, i32
  }
  func.func @transform_19(%arg0: i32) -> (i32, i32) {
    %c0_i32 = arith.constant 0 : i32
    %c0_i32_0 = arith.constant 0 : i32
    %c0_i32_1 = arith.constant 0 : i32
    return %c0_i32, %c0_i32_0 : i32, i32
  }
  func.func @transform_20(%arg0: i32) -> (i32, i32) {
    %c0_i32 = arith.constant 0 : i32
    %c0_i32_0 = arith.constant 0 : i32
    %c0_i32_1 = arith.constant 0 : i32
    return %c0_i32, %c0_i32_0 : i32, i32
  }
  func.func @transform_21(%arg0: i32) -> (i32, i32) {
    %c0_i32 = arith.constant 0 : i32
    %c0_i32_0 = arith.constant 0 : i32
    %c0_i32_1 = arith.constant 0 : i32
    return %c0_i32, %c0_i32_0 : i32, i32
  }
  func.func @transform_22(%arg0: i32) -> (i32, i32) {
    %c0_i32 = arith.constant 0 : i32
    %c0_i32_0 = arith.constant 0 : i32
    %c0_i32_1 = arith.constant 0 : i32
    return %c0_i32, %c0_i32_0 : i32, i32
  }
  func.func @transform_23(%arg0: i32) -> (i32, i32) {
    %c0_i32 = arith.constant 0 : i32
    %c0_i32_0 = arith.constant 0 : i32
    %c0_i32_1 = arith.constant 0 : i32
    return %c0_i32, %c0_i32_0 : i32, i32
  }
  func.func @transform_24(%arg0: i32) -> (i32, i32, i32) {
    %c0_i32 = arith.constant 0 : i32
    %c0_i32_0 = arith.constant 0 : i32
    %c0_i32_1 = arith.constant 0 : i32
    return %arg0, %c0_i32, %c0_i32_0 : i32, i32, i32
  }
}

</mosaic_0001>

<bundles_post_ra>
// kernel: decoder_forward.5
= control target key start
LH: loop header
LB: loop body
LE: loop exit
PB: predicated region body
PF: predicated region fallthrough
CT: control target
= control target key end

     0   :  { %10 = vsyncpa [#allocation3], 0  ;;  %s528_s0 = inlined_call_operand.hbm [shape: f32[16,32], index: 0, kind: input, shape index: {}]   ;;  %s529_s1 = inlined_call_operand.hbm [shape: f32[1,32], index: 1, kind: input, shape index: {}]   ;;  %s530_s2 = inlined_call_operand.hbm [shape: f32[1,32], index: 2, kind: input, shape index: {}]   ;;  %s531_s3 = inlined_call_operand.hbm [shape: bf16[32,128], index: 3, kind: input, shape index: {}]   ;;  %s532_s4 = inlined_call_operand.hbm [shape: f32[1,128], index: 4, kind: input, shape index: {}]   ;;  %s533_s5 = inlined_call_operand.hbm [shape: f32[16,128], index: 5, kind: output, shape index: {}]  }
   0x1   :  { %11 = vsyncpa [#allocation6], 0 }
   0x2   :  { %12 = vsyncpa [#allocation9], 0 }
   0x3   :  { %13 = vsyncpa [#allocation4], 0  ;;  %s396_s18 = smov [#allocation5]   ;;  %s397_s20 = smov [#allocation8]  }
   0x4   :  { %s32_s19 = sshll.u32 %s396_s18, 4  ;;  %s51_s21 = sshll.u32 %s397_s20, 4  ;;  %s33_s19 = int_to_ptr.vmem [resolvable:$true] %s32_s19  ;;  %s438_s21 = int_to_ptr.vmem [resolvable:$true] %s51_s21 }
   0x5   :  { %s256_s24 = scalar_lea.hbm %s529_s1, 16 }
   0x6   :  { %p257_p0 = scmp.ne.s32.totalorder %s529_s1, %s256_s24  ;;  %p260_p1 = scmp.lt.u32.totalorder %s256_s24, %s529_s1 }
   0x8   :  { %p262_p2 = pnand %p260_p1, %p257_p0 }
   0xa   :  { %265 = shalt.err (!%p262_p2)
}
   0xb   :  { %s266_s29 = scalar_lea.vmem %s33_s19, 16  ;;  %s270_s30 = scalar_lea.vmem %s33_s19, 32 }
   0xc   :  { %p267_p3 = scmp.ne.s32.totalorder %s33_s19, %s266_s29  ;;  %p271_p4 = scmp.lt.s32.totalorder %s33_s19, %s33_s19 }
   0xd   :  { %p272_p5 = scmp.lt.s32.totalorder %s270_s30, %s266_s29 }
   0xf   :  { %p273_p6 = por %p272_p5, %p271_p4 }
  0x11   :  { %p274_p7 = pnand %p273_p6, %p267_p3 }
  0x13   :  { %277 = shalt.err (!%p274_p7)
}
  0x14   :  { %35 = dma.hbm_to_vmem [thread:$0]  %s529_s1, 16, %s33_s19, [#allocation6]  }
  0x15   :  { %s278_s10 = scalar_lea.hbm %s531_s3, 256 }
  0x16   :  { %p279_p8 = scmp.ne.s32.totalorder %s531_s3, %s278_s10  ;;  %p282_p9 = scmp.lt.u32.totalorder %s278_s10, %s531_s3 }
  0x18   :  { %p284_p10 = pnand %p282_p9, %p279_p8 }
  0x1a   :  { %287 = shalt.err (!%p284_p10)
}
  0x1b   :  { %s288_s15 = scalar_lea.vmem %s438_s21, 256  ;;  %p293_p12 = scmp.lt.s32.totalorder %s438_s21, %s438_s21 }
  0x1c   :  { %p289_p11 = scmp.ne.s32.totalorder %s438_s21, %s288_s15  ;;  %p294_p13 = scmp.lt.s32.totalorder %s288_s15, %s288_s15 }
  0x1e   :  { %p295_p0 = por %p294_p13, %p293_p12 }
  0x20   :  { %p296_p1 = pnand %p295_p0, %p289_p11 }
  0x22   :  { %299 = shalt.err (!%p296_p1)
}
  0x23   :  { %s398_s1 = smov 64   ;;  %s399_s16 = smov 4  }
  0x24   :  { %57 = dma.hbm_to_vmem [thread:$0]  %s531_s3, 256, %s438_s21, [#allocation9], %s398_s1, %s398_s1, %s399_s16  }
  0x25   :  { %s400_s19 = smov [#allocation2]   ;;  %s300_s24 = scalar_lea.hbm %s528_s0, 256 }
  0x26   :  { %s19_s20 = sshll.u32 %s400_s19, 4  ;;  %p301_p2 = scmp.ne.s32.totalorder %s528_s0, %s300_s24  ;;  %s20_s20 = int_to_ptr.vmem [resolvable:$true] %s19_s20 }
  0x27   :  { %p304_p3 = scmp.lt.u32.totalorder %s300_s24, %s528_s0 }
  0x29   :  { %p306_p4 = pnand %p304_p3, %p301_p2 }
  0x2b   :  { %309 = shalt.err (!%p306_p4)
}
  0x2c   :  { %s310_s29 = scalar_lea.vmem %s20_s20, 256  ;;  %p315_p6 = scmp.lt.s32.totalorder %s20_s20, %s20_s20 }
  0x2d   :  { %p311_p5 = scmp.ne.s32.totalorder %s20_s20, %s310_s29  ;;  %p316_p7 = scmp.lt.s32.totalorder %s310_s29, %s310_s29 }
  0x2f   :  { %p317_p8 = por %p316_p7, %p315_p6 }
  0x31   :  { %p318_p9 = pnand %p317_p8, %p311_p5 }
  0x33   :  { %321 = shalt.err (!%p318_p9)
}
  0x34   :  { %s401_s3 = smov 128   ;;  %s402_s21 = smov 8  }
  0x35   :  { %25 = dma.hbm_to_vmem [thread:$0]  %s528_s0, 256, %s20_s20, [#allocation3], %s401_s3, %s401_s3, %s402_s21  }
  0x36   :  { %s403_s7 = smov [#allocation7]   ;;  %s404_s9 = smov [#allocation10]  }
  0x37   :  { %s42_s8 = sshll.u32 %s403_s7, 4  ;;  %s64_s10 = sshll.u32 %s404_s9, 4  ;;  %s43_s8 = int_to_ptr.vmem [resolvable:$true] %s42_s8  ;;  %s65_s10 = int_to_ptr.vmem [resolvable:$true] %s64_s10 }
  0x38   :  { %s322_s13 = scalar_lea.hbm %s530_s2, 16 }
  0x39   :  { %p323_p10 = scmp.ne.s32.totalorder %s530_s2, %s322_s13  ;;  %p326_p11 = scmp.lt.u32.totalorder %s322_s13, %s530_s2 }
  0x3b   :  { %p328_p12 = pnand %p326_p11, %p323_p10 }
  0x3d   :  { %331 = shalt.err (!%p328_p12)
}
  0x3e   :  { %s332_s0 = scalar_lea.vmem %s43_s8, 16  ;;  %s336_s17 = scalar_lea.vmem %s43_s8, 32 }
  0x3f   :  { %p333_p13 = scmp.ne.s32.totalorder %s43_s8, %s332_s0  ;;  %p337_p0 = scmp.lt.s32.totalorder %s43_s8, %s43_s8 }
  0x40   :  { %p338_p1 = scmp.lt.s32.totalorder %s336_s17, %s332_s0 }
  0x42   :  { %p339_p2 = por %p338_p1, %p337_p0 }
  0x44   :  { %p340_p3 = pnand %p339_p2, %p333_p13 }
  0x46   :  { %343 = shalt.err (!%p340_p3)
}
  0x47   :  { %45 = dma.hbm_to_vmem [thread:$0]  %s530_s2, 16, %s43_s8, [#allocation6]  }
  0x48   :  { %s344_s23 = scalar_lea.hbm %s532_s4, 16 }
  0x49   :  { %p345_p4 = scmp.ne.s32.totalorder %s532_s4, %s344_s23  ;;  %p348_p5 = scmp.lt.u32.totalorder %s344_s23, %s532_s4 }
  0x4b   :  { %p350_p6 = pnand %p348_p5, %p345_p4 }
  0x4d   :  { %353 = shalt.err (!%p350_p6)
}
  0x4e   :  { %s354_s28 = scalar_lea.vmem %s65_s10, 16  ;;  %s358_s29 = scalar_lea.vmem %s65_s10, 32 }
  0x4f   :  { %p355_p7 = scmp.ne.s32.totalorder %s65_s10, %s354_s28  ;;  %p359_p8 = scmp.lt.s32.totalorder %s65_s10, %s65_s10 }
  0x50   :  { %p360_p9 = scmp.lt.s32.totalorder %s358_s29, %s354_s28 }
  0x52   :  { %p361_p10 = por %p360_p9, %p359_p8 }
  0x54   :  { %p362_p11 = pnand %p361_p10, %p355_p7 }
  0x56   :  { %365 = shalt.err (!%p362_p11)
}
  0x57   :  { %67 = dma.hbm_to_vmem [thread:$0]  %s532_s4, 16, %s65_s10, [#allocation9]  }
  0x58   :  { %388 = dma.done.wait [#allocation3], 256  }
  0x59   :  { %389 = vsyncadd [#allocation3], 4294967040 }
  0x5a   :  { %390 = dma.done.wait [#allocation6], 32  }
  0x5b   :  { %391 = vsyncadd [#allocation6], 4294967264 }
  0x5c   :  { %392 = dma.done.wait [#allocation9], 272  }
  0x5d   :  { %393 = vsyncadd [#allocation9], 4294967024  ;;  %vm88_vm0 = vcmask 261120   ;;  %v84_v0 = vld [vmem:[#allocation2] sm:$0xff]  ;;  %v85_v1 = vld [vmem:[#allocation2 + $0x8] sm:$0xff]  ;;  %v405_v15 = vmov 0.0  }
  0x5e   :  { %v89_v2 = vsel %vm88_vm0, %v84_v0, 0.0  ;;  %v92_v3 = vsel %vm88_vm0, %v85_v1, 0.0  ;;  %v250_v14 = vld [vmem:[#allocation8] sm:$0xff]   ;;  %230 = vmatprep.subr.bf16.mxu0 %v405_v15  ;;  %v251_v16 = vld [vmem:[#allocation8 + $0x8] sm:$0xff]   ;;  %vm406_vm1 = vmmov 0   ;;  %s407_s4 = smov [#allocation11]  }
  0x5f   :  { %90 = vadd.xlane.f32.xlu0 %v89_v2  ;;  %231 = vmatpush3.bf16.msra.mxu0 %v250_v14  ;;  %v221_v25 = vld [vmem:[#allocation5] ss:$0 sm:$0xff]  ;;  %v222_v29 = vld [vmem:[#allocation7] ss:$0 sm:$0xff]  ;;  %v223_v34 = vld [vmem:[#allocation10] ss:$0 sm:$0xff] }
  0x60   :  { %234 = vmatprep.mubr.msk.bf16.mxu0 %vm406_vm1, %v405_v15  ;;  %232 = vmatprep.subr.bf16.mxu0 %v405_v15  ;;  %s207_s6 = sshll.u32 %s407_s4, 4  ;;  %s208_s6 = int_to_ptr.vmem [resolvable:$true] %s207_s6 }
  0x61   :  { %s366_s7 = scalar_lea.vmem %s208_s6, 256  ;;  %p371_p13 = scmp.lt.s32.totalorder %s208_s6, %s208_s6 }
  0x62   :  { %p367_p12 = scmp.ne.s32.totalorder %s208_s6, %s366_s7  ;;  %p372_p0 = scmp.lt.s32.totalorder %s366_s7, %s366_s7 }
  0x63   :  { %93 = vadd.xlane.f32.xlu0 %v92_v3  ;;  %233 = vmatpush3.bf16.msra.mxu0 %v251_v16 }
  0x64   :  { %p373_p1 = por %p372_p0, %p371_p13 }
  0x66   :  { %p374_p2 = pnand %p373_p1, %p367_p12 }
  0xec   :  { %v91_v4 = vpop.xlane.xlu0 %90 }
  0xed   :  { %v96_v5 = vmul.f32 0.03125, %v91_v4 }
  0xef   :  { %v98_v6 = vsub.f32 %v84_v0, %v96_v5 }
  0xf0   :  { %v94_v7 = vpop.xlane.xlu0 %93 }
  0xf1   :  { %v97_v8 = vmul.f32 0.03125, %v94_v7  ;;  %v100_v9 = vmul.f32 %v98_v6, %v98_v6 }
  0xf3   :  { %v99_v10 = vsub.f32 %v85_v1, %v97_v8  ;;  %v102_v11 = vsel %vm88_vm0, %v100_v9, 0.0 }
  0xf4   :  { %103 = vadd.xlane.f32.xlu1 %v102_v11 }
  0xf5   :  { %v101_v12 = vmul.f32 %v99_v10, %v99_v10 }
  0xf7   :  { %v105_v13 = vsel %vm88_vm0, %v101_v12, 0.0 }
  0xf8   :  { %106 = vadd.xlane.f32.xlu1 %v105_v13 }
 0x181   :  { %v104_v17 = vpop.xlane.xlu1 %103 }
 0x182   :  { %v108_v18 = vmul.f32 0.03125, %v104_v17 }
 0x184   :  { %v110_v19 = vadd.f32 1e-12, %v108_v18 }
 0x185   :  { %v107_v20 = vpop.xlane.xlu1 %106 }
 0x186   :  { %252 = vrsqrt.f32 %v110_v19  ;;  %v109_v21 = vmul.f32 0.03125, %v107_v20 }
 0x188   :  { %v111_v22 = vadd.f32 1e-12, %v109_v21 }
 0x18a   :  { %254 = vrsqrt.f32 %v111_v22 }
 0x190   :  { %v253_v23 = vpop.eup %252 }
 0x191   :  { %v114_v24 = vmul.f32 %v253_v23, %v98_v6 }
 0x193   :  { %v122_v28 = vmul.f32 %v221_v25, %v114_v24 }
 0x194   :  { %v255_v26 = vpop.eup %254 }
 0x195   :  { %v115_v27 = vmul.f32 %v255_v26, %v99_v10  ;;  %v130_v31 = vadd.f32 %v222_v29, %v122_v28 }
 0x197   :  { %v123_v30 = vmul.f32 %v221_v25, %v115_v27 }
 0x199   :  { %v131_v32 = vadd.f32 %v222_v29, %v123_v30 }
 0x19b   :  { %v132_v33 = vpack.c.bf16 %v131_v32, %v130_v31 }
 0x19d   :  { %235 = vmatmul.mubr.msk.bf16.vlgmr.msra.gmra.mrb[0].mxu0 %vm88_vm0, %v132_v33 }
 0x270   :  { %v193_v35 = vpop.f32.mrb[0].mxu0 }
 0x271   :  { %v194_v36 = vadd.f32 %v223_v34, %v193_v35  ;;  %v236_v37 = vpop.f32.mrb[1].mxu0 }
 0x272   :  { %v196_v38 = vpop.f32.mrb[2].mxu0 }
 0x273   :  { %200 = vst [vmem:[#allocation11] sm:$0xff] %v194_v36  ;;  %v197_v39 = vadd.f32 %v223_v34, %v196_v38  ;;  %v237_v40 = vpop.f32.mrb[3].mxu0 }
 0x275   :  { %201 = vst [vmem:[#allocation11 + $0x8] sm:$0xff] %v197_v39 }
 0x276   :  { %377 = shalt.err (!%p374_p2)
}
 0x277   :  { %s378_s10 = scalar_lea.hbm %s533_s5, 256 }
 0x278   :  { %p379_p3 = scmp.ne.s32.totalorder %s533_s5, %s378_s10  ;;  %p382_p4 = scmp.lt.u32.totalorder %s378_s10, %s533_s5 }
 0x27a   :  { %p384_p5 = pnand %p382_p4, %p379_p3 }
 0x27c   :  { %387 = shalt.err (!%p384_p5)
}
 0x27d   :  { %213 = dma.vmem_to_hbm [thread:$0]  %s208_s6, 256, %s533_s5, [#allocation4], %s401_s3, %s401_s3, %s402_s21  }
 0x27e   :  { %394 = dma.done.wait [#allocation4], 256  }
 0x27f   :  { %395 = vsyncadd [#allocation4], 4294967040 }
 0x280   :  { %217 = vsyncpa [#allocation3], 1 }
 0x281   :  { %218 = vsyncpa [#allocation6], 1 }
 0x282   :  { %219 = vsyncpa [#allocation9], 1 }
 0x283   :  { %220 = vsyncpa [#allocation4], 1 }

// kernel: decoder_forward.3
= control target key start
LH: loop header
LB: loop body
LE: loop exit
PB: predicated region body
PF: predicated region fallthrough
CT: control target
= control target key end

     0   :  { %s5960_s0 = inlined_call_operand.hbm [shape: f32[2,8,32], index: 0, kind: input, shape index: {}]   ;;  %s5961_s1 = inlined_call_operand.hbm [shape: f32[2,8,8], index: 1, kind: input, shape index: {}]   ;;  %s5962_s2 = inlined_call_operand.hbm [shape: bf16[2,16,32], index: 2, kind: input, shape index: {}]   ;;  %s5963_s3 = inlined_call_operand.hbm [shape: f32[2,1,16], index: 3, kind: input, shape index: {}]   ;;  %s5964_s4 = inlined_call_operand.hbm [shape: f32[1,32], index: 4, kind: input, shape index: {}]   ;;  %s5965_s5 = inlined_call_operand.hbm [shape: f32[1,32], index: 5, kind: input, shape index: {}]   ;;  %s5966_s6 = inlined_call_operand.hbm [shape: bf16[32,96], index: 6, kind: input, shape index: {}]   ;;  %s5967_s7 = inlined_call_operand.hbm [shape: f32[1,96], index: 7, kind: input, shape index: {}]   ;;  %s5968_s8 = inlined_call_operand.hbm [shape: bf16[4,8,32], index: 8, kind: input, shape index: {}]   ;;  %s5969_s9 = inlined_call_operand.hbm [shape: f32[1,32], index: 9, kind: input, shape index: {}]   ;;  %s5970_s10 = inlined_call_operand.hbm [shape: f32[1,32], index: 10, kind: input, shape index: {}]   ;;  %s5971_s11 = inlined_call_operand.hbm [shape: f32[1,32], index: 11, kind: input, shape index: {}]   ;;  %s5972_s12 = inlined_call_operand.hbm [shape: bf16[32,32], index: 12, kind: input, shape index: {}]   ;;  %s5973_s13 = inlined_call_operand.hbm [shape: f32[1,32], index: 13, kind: input, shape index: {}]   ;;  %s5974_s14 = inlined_call_operand.hbm [shape: bf16[32,64], index: 14, kind: input, shape index: {}]   ;;  %s5975_s15 = inlined_call_operand.hbm [shape: f32[1,64], index: 15, kind: input, shape index: {}]   ;;  %s5976_s16 = inlined_call_operand.hbm [shape: bf16[4,8,32], index: 16, kind: input, shape index: {}]   ;;  %s5977_s17 = inlined_call_operand.hbm [shape: f32[1,32], index: 17, kind: input, shape index: {}]   ;;  %s5978_s18 = inlined_call_operand.hbm [shape: f32[1,32], index: 18, kind: input, shape index: {}]   ;;  %s5979_s19 = inlined_call_operand.hbm [shape: f32[1,32], index: 19, kind: input, shape index: {}]   ;;  %s5980_s20 = inlined_call_operand.hbm [shape: bf16[32,64], index: 20, kind: input, shape index: {}]   ;;  %s5981_s21 = inlined_call_operand.hbm [shape: f32[1,64], index: 21, kind: input, shape index: {}]   ;;  %s5982_s22 = inlined_call_operand.hbm [shape: bf16[64,32], index: 22, kind: input, shape index: {}]   ;;  %s5983_s23 = inlined_call_operand.hbm [shape: f32[1,32], index: 23, kind: input, shape index: {}]   ;;  %s5984_s24 = inlined_call_operand.hbm [shape: f32[2,8,32], index: 24, kind: output, shape index: {}]  }
   0x1   :  { %6042 = sst [smem:[#allocation66_spill]] %s5960_s0 }
   0x2   :  { %6043 = sst [smem:[#allocation67_spill]] %s5961_s1 }
   0x3   :  { %6044 = sst [smem:[#allocation68_spill]] %s5962_s2 }
   0x4   :  { %6045 = sst [smem:[#allocation69_spill]] %s5963_s3 }
   0x5   :  { %6046 = sst [smem:[#allocation70_spill]] %s5964_s4 }
   0x6   :  { %6047 = sst [smem:[#allocation71_spill]] %s5965_s5 }
   0x7   :  { %6048 = sst [smem:[#allocation72_spill]] %s5966_s6 }
   0x8   :  { %6049 = sst [smem:[#allocation73_spill]] %s5967_s7 }
   0x9   :  { %6050 = sst [smem:[#allocation74_spill]] %s5968_s8 }
   0xa   :  { %6051 = sst [smem:[#allocation75_spill]] %s5969_s9 }
   0xb   :  { %6052 = sst [smem:[#allocation76_spill]] %s5970_s10 }
   0xc   :  { %6053 = sst [smem:[#allocation77_spill]] %s5971_s11 }
   0xd   :  { %6054 = sst [smem:[#allocation78_spill]] %s5972_s12 }
   0xe   :  { %6055 = sst [smem:[#allocation79_spill]] %s5973_s13 }
   0xf   :  { %6056 = sst [smem:[#allocation80_spill]] %s5974_s14 }
  0x10   :  { %6057 = sst [smem:[#allocation81_spill]] %s5975_s15 }
  0x11   :  { %6058 = sst [smem:[#allocation82_spill]] %s5976_s16 }
  0x12   :  { %6059 = sst [smem:[#allocation83_spill]] %s5977_s17 }
  0x13   :  { %6060 = sst [smem:[#allocation84_spill]] %s5978_s18 }
  0x14   :  { %6061 = sst [smem:[#allocation85_spill]] %s5979_s19 }
  0x15   :  { %6062 = sst [smem:[#allocation86_spill]] %s5980_s20 }
  0x16   :  { %6063 = sst [smem:[#allocation87_spill]] %s5981_s21 }
  0x17   :  { %6064 = sst [smem:[#allocation88_spill]] %s5982_s22 }
  0x18   :  { %6065 = sst [smem:[#allocation89_spill]] %s5983_s23 }
  0x19   :  { %6066 = sst [smem:[#allocation90_spill]] %s5984_s24 }
  0x1a   :  { %29 = vsyncpa [#allocation3], 0 }
  0x1b   :  { %31 = vsyncpa [#allocation3 + $0x1], 0 }
  0x1c   :  { %32 = vsyncpa [#allocation6], 0 }
  0x1d   :  { %34 = vsyncpa [#allocation6 + $0x1], 0 }
  0x1e   :  { %35 = vsyncpa [#allocation9], 0 }
  0x1f   :  { %37 = vsyncpa [#allocation9 + $0x1], 0 }
  0x20   :  { %38 = vsyncpa [#allocation12], 0 }
  0x21   :  { %39 = vsyncpa [#allocation15], 0 }
  0x22   :  { %40 = vsyncpa [#allocation18], 0 }
  0x23   :  { %41 = vsyncpa [#allocation21], 0 }
  0x24   :  { %42 = vsyncpa [#allocation24], 0 }
  0x25   :  { %43 = vsyncpa [#allocation27], 0 }
  0x26   :  { %44 = vsyncpa [#allocation30], 0 }
  0x27   :  { %45 = vsyncpa [#allocation33], 0 }
  0x28   :  { %46 = vsyncpa [#allocation36], 0 }
  0x29   :  { %47 = vsyncpa [#allocation39], 0 }
  0x2a   :  { %48 = vsyncpa [#allocation4], 0 }
  0x2b   :  { %50 = vsyncpa [#allocation4 + $0x1], 0  ;;  %s4915_s5 = smov 0   ;;  %s4917_s26 = smov 0  }
  0x2c   :  { %s4919_s27 = smov 0   ;;  %s4921_s28 = smov 0  }
  0x2d LB: > { %6067 = sst [smem:[#allocation56_spill]] %s4736_s5  ;;  %s4750_s6 = smov [#allocation10]   ;;  %s4748_s28 = sphi %s4921_s28, %s6155_s28   ;;  %s4744_s27 = sphi %s4919_s27, %s6158_s27   ;;  %s4740_s26 = sphi %s4917_s26, %s6157_s26   ;;  %s4736_s5 = sphi %s4915_s5, %s6156_s5  }
  0x2e   : > { %6068 = sst [smem:[#allocation57_spill]] %s4740_s26  ;;  %s624_s2 = sshll.u32 %s4750_s6, 4  ;;  %s4941_s2 = int_to_ptr.vmem [resolvable:$true] %s624_s2 }
  0x2f   : > { %6069 = sst [smem:[#allocation58_spill]] %s4744_s27  ;;  %s4936_s29 = sadd.s32 4294967295, %s4748_s28  }
  0x30   : > { %6070 = sst [smem:[#allocation59_spill]] %s4936_s29  ;;  %p3252_p0 = scmp.ge.s32.totalorder %s4748_s28, 1 }
  0x31   : > { %p6003_p1 = scmp.eq.s32.totalorder %s4936_s29, 0  ;;  %p611_p2 = scmp.lt.s32.totalorder %s4748_s28, 3 }
  0x32   : > { %s4751_s7 = smov [#allocation11]   ;;  %s4752_s3 = smov [#allocation14]  }
  0x33   : > { %p4943_p3 = pnand %p3252_p0, %p611_p2  ;;  %s635_s30 = sshll.u32 %s4751_s7, 4  ;;  %s4950_s30 = int_to_ptr.vmem [resolvable:$true] %s635_s30 }
  0x34   : > { %s659_s25 = sshll.u32 %s4752_s3, 4  ;;  %s4753_s4 = smov [#allocation17]   ;;  %s4958_s25 = int_to_ptr.vmem [resolvable:$true] %s659_s25 }
  0x35   : > { %s6071_s0 = scalar_select %p4943_p3, 1, 0 }
  0x36   : > { %p3712_p5 = pneg %p4943_p3  ;;  %s4960_s1 = sshll.u32 %s4753_s4, 4  ;;  %s684_s1 = int_to_ptr.vmem [resolvable:$true] %s4960_s1 }
  0x37   : > { %6072 = sst [smem:[#allocation60_spill]] %s6071_s0  ;;  %s6074_s0 = sld [smem:[#allocation70_spill]] }
  0x38   : > { %p4954_p6 = pnand %p3712_p5, %p6003_p1 }
  0x3a   : > { %s6073_s8 = scalar_select %p4954_p6, 1, 0 }
  0x3b   : > { %p4970_p8 = pneg %p4954_p6 }
  0x3d   : > { %s3950_s23 = scalar_lea.hbm %s6074_s0, 16 }
  0x3e   : > { %p3951_p7 = scmp.ne.s32.totalorder %s6074_s0, %s3950_s23  ;;  %p3957_p11 = scmp.lt.u32.totalorder %s3950_s23, %s6074_s0 }
  0x3f   : > { %s6075_s3 = scalar_select %p4970_p8, 1, 0 }
  0x40   : > { %p3953_p9 = pnand %p4970_p8, %p3951_p7 }
  0x42   : > { %p3954_p10 = pneg %p3953_p9 }
  0x44   : > { %p3959_p12 = pnand %p3957_p11, %p3954_p10 }
  0x46   : > { %3962 = shalt.err (!%p3959_p12)
}
  0x47   : > { %s3963_s22 = scalar_lea.vmem %s4941_s2, 16  ;;  %s3970_s24 = scalar_lea.vmem %s4941_s2, 32 }
  0x48   : > { %p3964_p13 = scmp.ne.s32.totalorder %s4941_s2, %s3963_s22  ;;  %p3971_p5 = scmp.lt.s32.totalorder %s4941_s2, %s4941_s2 }
  0x49   : > { %p3972_p7 = scmp.lt.s32.totalorder %s3970_s24, %s3963_s22 }
  0x4a   : > { %p3966_p0 = pnand %p3964_p13, %p4970_p8 }
  0x4b   : > { %p3973_p9 = por %p3972_p7, %p3971_p5 }
  0x4c   : > { %p3967_p2 = pneg %p3966_p0 }
  0x4e   : > { %p3974_p4 = pnand %p3973_p9, %p3967_p2 }
  0x50   : > { %3977 = shalt.err (!%p3974_p4)
}
  0x51   : > { %3715 = dma.hbm_to_vmem [thread:$0]  (!%p4954_p6), %s6074_s0, 16, %s4941_s2, [#allocation9]  }
  0x52   : > { %s6076_s4 = sld [smem:[#allocation71_spill]] }
  0x58   : > { %s3978_s18 = scalar_lea.hbm %s6076_s4, 16 }
  0x59   : > { %p3979_p10 = scmp.ne.s32.totalorder %s6076_s4, %s3978_s18  ;;  %p3985_p4 = scmp.lt.u32.totalorder %s3978_s18, %s6076_s4 }
  0x5b   : > { %p3981_p11 = pnand %p3979_p10, %p4970_p8 }
  0x5d   : > { %p3982_p12 = pneg %p3981_p11 }
  0x5f   : > { %p3987_p13 = pnand %p3985_p4, %p3982_p12 }
  0x61   : > { %3990 = shalt.err (!%p3987_p13)
}
  0x62   : > { %s3991_s2 = scalar_lea.vmem %s4950_s30, 16  ;;  %s3998_s14 = scalar_lea.vmem %s4950_s30, 32 }
  0x63   : > { %p3992_p0 = scmp.ne.s32.totalorder %s4950_s30, %s3991_s2  ;;  %p3999_p7 = scmp.lt.s32.totalorder %s4950_s30, %s4950_s30 }
  0x64   : > { %p4000_p9 = scmp.lt.s32.totalorder %s3998_s14, %s3991_s2 }
  0x65   : > { %p3994_p2 = pnand %p3992_p0, %p4970_p8 }
  0x66   : > { %p4001_p10 = por %p4000_p9, %p3999_p7 }
  0x67   : > { %p3995_p5 = pneg %p3994_p2 }
  0x69   : > { %p4002_p11 = pnand %p4001_p10, %p3995_p5 }
  0x6b   : > { %4005 = shalt.err (!%p4002_p11)
}
  0x6c   : > { %3718 = dma.hbm_to_vmem [thread:$0]  (!%p4954_p6), %s6076_s4, 16, %s4950_s30, [#allocation12]  }
  0x6d   : > { %s6077_s6 = sld [smem:[#allocation73_spill]] }
  0x73   : > { %s4006_s7 = scalar_lea.hbm %s6077_s6, 16 }
  0x74   : > { %p4007_p12 = scmp.ne.s32.totalorder %s6077_s6, %s4006_s7  ;;  %p4013_p0 = scmp.lt.u32.totalorder %s4006_s7, %s6077_s6 }
  0x76   : > { %p4009_p4 = pnand %p4007_p12, %p4970_p8 }
  0x78   : > { %p4010_p13 = pneg %p4009_p4 }
  0x7a   : > { %p4015_p2 = pnand %p4013_p0, %p4010_p13 }
  0x7c   : > { %4018 = shalt.err (!%p4015_p2)
}
  0x7d   : > { %s4019_s30 = scalar_lea.vmem %s4958_s25, 16  ;;  %s4026_s16 = scalar_lea.vmem %s4958_s25, 32 }
  0x7e   : > { %p4020_p5 = scmp.ne.s32.totalorder %s4958_s25, %s4019_s30  ;;  %p4027_p10 = scmp.lt.s32.totalorder %s4958_s25, %s4958_s25 }
  0x7f   : > { %p4028_p11 = scmp.lt.s32.totalorder %s4026_s16, %s4019_s30 }
  0x80   : > { %p4022_p7 = pnand %p4020_p5, %p4970_p8 }
  0x81   : > { %p4029_p12 = por %p4028_p11, %p4027_p10 }
  0x82   : > { %p4023_p9 = pneg %p4022_p7 }
  0x84   : > { %p4030_p4 = pnand %p4029_p12, %p4023_p9 }
  0x86   : > { %4033 = shalt.err (!%p4030_p4)
}
  0x87   : > { %3724 = dma.hbm_to_vmem [thread:$0]  (!%p4954_p6), %s6077_s6, 16, %s4958_s25, [#allocation15]  }
  0x88   : > { %s4754_s23 = smov [#allocation20]   ;;  %s6078_s9 = sld [smem:[#allocation75_spill]] }
  0x89   : > { %s705_s7 = sshll.u32 %s4754_s23, 4  ;;  %s706_s7 = int_to_ptr.vmem [resolvable:$true] %s705_s7 }
  0x8e   : > { %s4034_s2 = scalar_lea.hbm %s6078_s9, 16 }
  0x8f   : > { %p4035_p13 = scmp.ne.s32.totalorder %s6078_s9, %s4034_s2  ;;  %p4041_p5 = scmp.lt.u32.totalorder %s4034_s2, %s6078_s9 }
  0x91   : > { %p4037_p0 = pnand %p4035_p13, %p4970_p8 }
  0x93   : > { %p4038_p2 = pneg %p4037_p0 }
  0x95   : > { %p4043_p7 = pnand %p4041_p5, %p4038_p2 }
  0x97   : > { %4046 = shalt.err (!%p4043_p7)
}
  0x98   : > { %s4047_s25 = scalar_lea.vmem %s684_s1, 16  ;;  %s4054_s18 = scalar_lea.vmem %s684_s1, 32 }
  0x99   : > { %p4048_p9 = scmp.ne.s32.totalorder %s684_s1, %s4047_s25  ;;  %p4055_p12 = scmp.lt.s32.totalorder %s684_s1, %s684_s1 }
  0x9a   : > { %p4056_p4 = scmp.lt.s32.totalorder %s4054_s18, %s4047_s25 }
  0x9b   : > { %p4050_p10 = pnand %p4048_p9, %p4970_p8 }
  0x9c   : > { %p4057_p1 = por %p4056_p4, %p4055_p12 }
  0x9d   : > { %p4051_p11 = pneg %p4050_p10 }
  0x9f   : > { %p4058_p3 = pnand %p4057_p1, %p4051_p11 }
  0xa1   : > { %4061 = shalt.err (!%p4058_p3)
}
  0xa2   : > { %3730 = dma.hbm_to_vmem [thread:$0]  (!%p4954_p6), %s6078_s9, 16, %s684_s1, [#allocation18]  }
  0xa3   : > { %s6079_s11 = sld [smem:[#allocation77_spill]] }
  0xa9   : > { %s4062_s24 = scalar_lea.hbm %s6079_s11, 16 }
  0xaa   : > { %p4063_p13 = scmp.ne.s32.totalorder %s6079_s11, %s4062_s24  ;;  %p4069_p3 = scmp.lt.u32.totalorder %s4062_s24, %s6079_s11 }
  0xac   : > { %p4065_p0 = pnand %p4063_p13, %p4970_p8 }
  0xae   : > { %p4066_p1 = pneg %p4065_p0 }
  0xb0   : > { %p4071_p2 = pnand %p4069_p3, %p4066_p1 }
  0xb2   : > { %4074 = shalt.err (!%p4071_p2)
}
  0xb3   : > { %s4075_s25 = scalar_lea.vmem %s706_s7, 16  ;;  %s4082_s1 = scalar_lea.vmem %s706_s7, 32 }
  0xb4   : > { %p4076_p5 = scmp.ne.s32.totalorder %s706_s7, %s4075_s25  ;;  %p4083_p10 = scmp.lt.s32.totalorder %s706_s7, %s706_s7 }
  0xb5   : > { %p4084_p11 = scmp.lt.s32.totalorder %s4082_s1, %s4075_s25 }
  0xb6   : > { %p4078_p7 = pnand %p4076_p5, %p4970_p8 }
  0xb7   : > { %p4085_p12 = por %p4084_p11, %p4083_p10 }
  0xb8   : > { %p4079_p9 = pneg %p4078_p7 }
  0xba   : > { %p4086_p4 = pnand %p4085_p12, %p4079_p9 }
  0xbc   : > { %4089 = shalt.err (!%p4086_p4)
}
  0xbd   : > { %3736 = dma.hbm_to_vmem [thread:$0]  (!%p4954_p6), %s6079_s11, 16, %s706_s7, [#allocation21]  }
  0xbe   : > { %s4755_s23 = smov [#allocation23]   ;;  %s4756_s22 = smov [#allocation26]  }
  0xbf   : > { %s729_s0 = sshll.u32 %s4755_s23, 4  ;;  %s753_s24 = sshll.u32 %s4756_s22, 4  ;;  %s730_s0 = int_to_ptr.vmem [resolvable:$true] %s729_s0  ;;  %s754_s24 = int_to_ptr.vmem [resolvable:$true] %s753_s24 }
  0xc0   : > { %s6080_s13 = sld [smem:[#allocation79_spill]] }
  0xc6   : > { %s4090_s30 = scalar_lea.hbm %s6080_s13, 16 }
  0xc7   : > { %p4091_p13 = scmp.ne.s32.totalorder %s6080_s13, %s4090_s30  ;;  %p4097_p3 = scmp.lt.u32.totalorder %s4090_s30, %s6080_s13 }
  0xc9   : > { %p4093_p0 = pnand %p4091_p13, %p4970_p8 }
  0xcb   : > { %p4094_p1 = pneg %p4093_p0 }
  0xcd   : > { %p4099_p2 = pnand %p4097_p3, %p4094_p1 }
  0xcf   : > { %4102 = shalt.err (!%p4099_p2)
}
  0xd0   : > { %s4103_s7 = scalar_lea.vmem %s730_s0, 16  ;;  %s4110_s20 = scalar_lea.vmem %s730_s0, 32 }
  0xd1   : > { %p4104_p5 = scmp.ne.s32.totalorder %s730_s0, %s4103_s7  ;;  %p4111_p10 = scmp.lt.s32.totalorder %s730_s0, %s730_s0 }
  0xd2   : > { %p4112_p11 = scmp.lt.s32.totalorder %s4110_s20, %s4103_s7 }
  0xd3   : > { %p4106_p7 = pnand %p4104_p5, %p4970_p8 }
  0xd4   : > { %p4113_p12 = por %p4112_p11, %p4111_p10 }
  0xd5   : > { %p4107_p9 = pneg %p4106_p7 }
  0xd7   : > { %p4114_p4 = pnand %p4113_p12, %p4107_p9 }
  0xd9   : > { %4117 = shalt.err (!%p4114_p4)
}
  0xda   : > { %3742 = dma.hbm_to_vmem [thread:$0]  (!%p4954_p6), %s6080_s13, 16, %s730_s0, [#allocation24]  }
  0xdb   : > { %s6081_s15 = sld [smem:[#allocation81_spill]] }
  0xe1   : > { %s4118_s30 = scalar_lea.hbm %s6081_s15, 16 }
  0xe2   : > { %p4119_p13 = scmp.ne.s32.totalorder %s6081_s15, %s4118_s30  ;;  %p4125_p3 = scmp.lt.u32.totalorder %s4118_s30, %s6081_s15 }
  0xe4   : > { %p4121_p0 = pnand %p4119_p13, %p4970_p8 }
  0xe6   : > { %p4122_p1 = pneg %p4121_p0 }
  0xe8   : > { %p4127_p2 = pnand %p4125_p3, %p4122_p1 }
  0xea   : > { %4130 = shalt.err (!%p4127_p2)
}
  0xeb   : > { %s4131_s7 = scalar_lea.vmem %s754_s24, 16  ;;  %s4138_s0 = scalar_lea.vmem %s754_s24, 32 }
  0xec   : > { %p4132_p5 = scmp.ne.s32.totalorder %s754_s24, %s4131_s7  ;;  %p4139_p10 = scmp.lt.s32.totalorder %s754_s24, %s754_s24 }
  0xed   : > { %p4140_p11 = scmp.lt.s32.totalorder %s4138_s0, %s4131_s7 }
  0xee   : > { %p4134_p7 = pnand %p4132_p5, %p4970_p8 }
  0xef   : > { %p4141_p12 = por %p4140_p11, %p4139_p10 }
  0xf0   : > { %p4135_p9 = pneg %p4134_p7 }
  0xf2   : > { %p4142_p4 = pnand %p4141_p12, %p4135_p9 }
  0xf4   : > { %4145 = shalt.err (!%p4142_p4)
}
  0xf5   : > { %3748 = dma.hbm_to_vmem [thread:$0]  (!%p4954_p6), %s6081_s15, 16, %s754_s24, [#allocation27]  }
  0xf6   : > { %s4757_s22 = smov [#allocation29]   ;;  %s4758_s14 = smov [#allocation32]  }
  0xf7   : > { %s777_s2 = sshll.u32 %s4757_s22, 4  ;;  %s799_s30 = sshll.u32 %s4758_s14, 4  ;;  %s778_s2 = int_to_ptr.vmem [resolvable:$true] %s777_s2  ;;  %s800_s30 = int_to_ptr.vmem [resolvable:$true] %s799_s30 }
  0xf8   : > { %s6082_s17 = sld [smem:[#allocation83_spill]] }
  0xfe   : > { %s4146_s1 = scalar_lea.hbm %s6082_s17, 16 }
  0xff   : > { %p4147_p13 = scmp.ne.s32.totalorder %s6082_s17, %s4146_s1  ;;  %p4153_p3 = scmp.lt.u32.totalorder %s4146_s1, %s6082_s17 }
 0x101   : > { %p4149_p0 = pnand %p4147_p13, %p4970_p8 }
 0x103   : > { %p4150_p1 = pneg %p4149_p0 }
 0x105   : > { %p4155_p2 = pnand %p4153_p3, %p4150_p1 }
 0x107   : > { %4158 = shalt.err (!%p4155_p2)
}
 0x108   : > { %s4159_s24 = scalar_lea.vmem %s778_s2, 16  ;;  %s4166_s23 = scalar_lea.vmem %s778_s2, 32 }
 0x109   : > { %p4160_p5 = scmp.ne.s32.totalorder %s778_s2, %s4159_s24  ;;  %p4167_p10 = scmp.lt.s32.totalorder %s778_s2, %s778_s2 }
 0x10a   : > { %p4168_p11 = scmp.lt.s32.totalorder %s4166_s23, %s4159_s24 }
 0x10b   : > { %p4162_p7 = pnand %p4160_p5, %p4970_p8 }
 0x10c   : > { %p4169_p12 = por %p4168_p11, %p4167_p10 }
 0x10d   : > { %p4163_p9 = pneg %p4162_p7 }
 0x10f   : > { %p4170_p4 = pnand %p4169_p12, %p4163_p9 }
 0x111   : > { %4173 = shalt.err (!%p4170_p4)
}
 0x112   : > { %3754 = dma.hbm_to_vmem [thread:$0]  (!%p4954_p6), %s6082_s17, 16, %s778_s2, [#allocation30]  }
 0x113   : > { %s6083_s19 = sld [smem:[#allocation85_spill]] }
 0x119   : > { %s4174_s1 = scalar_lea.hbm %s6083_s19, 16 }
 0x11a   : > { %p4175_p13 = scmp.ne.s32.totalorder %s6083_s19, %s4174_s1  ;;  %p4181_p3 = scmp.lt.u32.totalorder %s4174_s1, %s6083_s19 }
 0x11c   : > { %p4177_p0 = pnand %p4175_p13, %p4970_p8 }
 0x11e   : > { %p4178_p1 = pneg %p4177_p0 }
 0x120   : > { %p4183_p2 = pnand %p4181_p3, %p4178_p1 }
 0x122   : > { %4186 = shalt.err (!%p4183_p2)
}
 0x123   : > { %s4187_s24 = scalar_lea.vmem %s800_s30, 16  ;;  %s4194_s2 = scalar_lea.vmem %s800_s30, 32 }
 0x124   : > { %p4188_p5 = scmp.ne.s32.totalorder %s800_s30, %s4187_s24  ;;  %p4195_p10 = scmp.lt.s32.totalorder %s800_s30, %s800_s30 }
 0x125   : > { %p4196_p11 = scmp.lt.s32.totalorder %s4194_s2, %s4187_s24 }
 0x126   : > { %p4190_p7 = pnand %p4188_p5, %p4970_p8 }
 0x127   : > { %p4197_p12 = por %p4196_p11, %p4195_p10 }
 0x128   : > { %p4191_p9 = pneg %p4190_p7 }
 0x12a   : > { %p4198_p4 = pnand %p4197_p12, %p4191_p9 }
 0x12c   : > { %4201 = shalt.err (!%p4198_p4)
}
 0x12d   : > { %3760 = dma.hbm_to_vmem [thread:$0]  (!%p4954_p6), %s6083_s19, 16, %s800_s30, [#allocation33]  }
 0x12e   : > { %s4759_s14 = smov [#allocation35]   ;;  %s6084_s21 = sld [smem:[#allocation87_spill]] }
 0x12f   : > { %s823_s16 = sshll.u32 %s4759_s14, 4  ;;  %s824_s16 = int_to_ptr.vmem [resolvable:$true] %s823_s16 }
 0x134   : > { %s4202_s18 = scalar_lea.hbm %s6084_s21, 16 }
 0x135   : > { %p4203_p13 = scmp.ne.s32.totalorder %s6084_s21, %s4202_s18  ;;  %p4209_p3 = scmp.lt.u32.totalorder %s4202_s18, %s6084_s21 }
 0x137   : > { %p4205_p0 = pnand %p4203_p13, %p4970_p8 }
 0x139   : > { %p4206_p1 = pneg %p4205_p0 }
 0x13b   : > { %p4211_p2 = pnand %p4209_p3, %p4206_p1 }
 0x13d   : > { %4214 = shalt.err (!%p4211_p2)
}
 0x13e   : > { %s4215_s30 = scalar_lea.vmem %s824_s16, 16  ;;  %s4222_s2 = scalar_lea.vmem %s824_s16, 32 }
 0x13f   : > { %p4216_p5 = scmp.ne.s32.totalorder %s824_s16, %s4215_s30  ;;  %p4223_p10 = scmp.lt.s32.totalorder %s824_s16, %s824_s16 }
 0x140   : > { %p4224_p11 = scmp.lt.s32.totalorder %s4222_s2, %s4215_s30 }
 0x141   : > { %p4218_p7 = pnand %p4216_p5, %p4970_p8 }
 0x142   : > { %p4225_p12 = por %p4224_p11, %p4223_p10 }
 0x143   : > { %p4219_p9 = pneg %p4218_p7 }
 0x145   : > { %p4226_p4 = pnand %p4225_p12, %p4219_p9 }
 0x147   : > { %4229 = shalt.err (!%p4226_p4)
}
 0x148   : > { %3766 = dma.hbm_to_vmem [thread:$0]  (!%p4954_p6), %s6084_s21, 16, %s824_s16, [#allocation36]  }
 0x149   : > { %s3251_s14 = sadd.s32 4294967294, %s4748_s28   ;;  %s5169_s25 = sadd.s32 1, %s4748_s28  }
 0x14a   : > { %6085 = sst [smem:[#allocation61_spill]] %s5169_s25  ;;  %s60_s1 = ssub.s32 %s4748_s28, %s5169_s25 }
 0x14b   : > { %s63_s18 = sadd.s32 1, %s4744_s27  ;;  %p61_p13 = scmp.eq.s32.totalorder %s60_s1, 0 }
 0x14c   : > { %p70_p0 = scmp.ne.s32.totalorder %s4744_s27, %s4740_s26  ;;  %p71_p1 = scmp.eq.s32.totalorder %s4748_s28, 0 }
 0x14d   : > { %p76_p3 = scmp.ne.s32.totalorder %s4740_s26, %s4736_s5  ;;  %p6087_p5 = scmp.eq.s32.totalorder %s4936_s29, 0 }
 0x14e   : > { %s5180_s7 = scalar_select %p61_p13, %s4744_s27, %s63_s18  }
 0x14f   : > { %p72_p2 = por %p71_p1, %p70_p0  ;;  %p5184_p7 = por %p6087_p5, %p76_p3 }
 0x150   : > { %6086 = sst [smem:[#allocation62_spill]] %s5180_s7  ;;  %p598_p9 = scmp.eq.s32.totalorder %s4936_s29, 1 }
 0x151   : > { %s6088_s0 = scalar_select %p5184_p7, 1, 0 }
 0x152   : > { %p604_p10 = scmp.eq.s32.totalorder %s3251_s14, 1  ;;  %p3810_p11 = scmp.lt.s32.totalorder %s4748_s28, 2 }
 0x153   : > { %6089 = sst [smem:[#allocation63_spill]] %s6088_s0  ;;  %s5191_s16 = sand.u32 1, %s4744_s27  }
 0x154   : > { %p5193_p12 = por %p598_p9, %p70_p0  ;;  %p5197_p4 = por %p604_p10, %p76_p3 }
 0x155   : > { %s5202_s30 = sshll.u32 %s5191_s16, 3  ;;  %s5205_s2 = sshll.u32 %s4748_s28, 7 }
 0x156   : > { %s6090_s20 = scalar_select %p5193_p12, 1, 0 }
 0x157   : > { %s6092_s24 = scalar_select %p5197_p4, 1, 0 }
 0x158   : > { %6091 = sst [smem:[#allocation64_spill]] %s6090_s20  ;;  %p5207_p13 = pnand %p3810_p11, %p72_p2 }
 0x159   : > { %6093 = sst [smem:[#allocation65_spill]] %s6092_s24  ;;  %s6008_s22 = sand.u32 1, %s4748_s28  }
 0x15a   : > { %s6094_s23 = scalar_select %p5207_p13, 1, 0 }
 0x15b   : > { %s6095_s18 = sld [smem:[#allocation67_spill]]  ;;  %s880_s6 = scalar_lea.vmem [#allocation5], %s5202_s30 }
 0x15c   : > { %s887_s9 = sshll.u32 %s880_s6, 4  ;;  %s6096_s15 = sld [smem:[#allocation68_spill]]  ;;  %s5219_s9 = int_to_ptr.vmem [resolvable:$true] %s887_s9 }
 0x15d   : > { %s5229_s19 = scalar_lea.sflag [#allocation6], %s6008_s22  ;;  %p5235_p1 = pneg %p5207_p13 }
 0x15f   : > { %s6097_s14 = scalar_select %p5235_p1, 1, 0 }
 0x161   : > { %s5216_s4 = scalar_lea.hbm %s6095_s18, %s5205_s2  ;;  %s4235_s11 = scalar_lea.hbm %s6095_s18, 256 }
 0x162   : > { %s5225_s17 = scalar_lea.hbm %s6096_s15, %s5205_s2  ;;  %s4230_s21 = scalar_lea.hbm %s5216_s4, 128 }
 0x163   : > { %p4231_p0 = scmp.ne.s32.totalorder %s5216_s4, %s4230_s21  ;;  %p4236_p5 = scmp.lt.u32.totalorder %s5216_s4, %s6095_s18 }
 0x164   : > { %p4237_p9 = scmp.lt.u32.totalorder %s4235_s11, %s4230_s21  ;;  %p4239_p11 = scmp.lt.u32.totalorder %s4230_s21, %s5216_s4 }
 0x165   : > { %p4233_p3 = pnand %p5235_p1, %p4231_p0 }
 0x166   : > { %p4238_p10 = por %p4237_p9, %p4236_p5 }
 0x167   : > { %p4234_p2 = pneg %p4233_p3 }
 0x168   : > { %p4240_p4 = por %p4239_p11, %p4238_p10 }
 0x16a   : > { %p4241_p12 = pnand %p4240_p4, %p4234_p2 }
 0x16c   : > { %4244 = shalt.err (!%p4241_p12)
}
 0x16d   : > { %s4245_s22 = scalar_lea.vmem %s5219_s9, 128  ;;  %s4760_s6 = smov [#allocation5]  }
 0x16e   : > { %p4246_p0 = scmp.ne.s32.totalorder %s5219_s9, %s4245_s22  ;;  %s4250_s1 = sshll.u32 %s4760_s6, 4  ;;  %s4251_s1 = int_to_ptr.vmem [resolvable:$false] %s4250_s1 }
 0x16f   : > { %s4252_s7 = scalar_lea.vmem %s4251_s1, 256  ;;  %p4253_p6 = scmp.lt.s32.totalorder %s5219_s9, %s4251_s1 }
 0x170   : > { %p4248_p3 = pnand %p4246_p0, %p5235_p1  ;;  %p4254_p8 = scmp.lt.s32.totalorder %s4252_s7, %s4245_s22 }
 0x172   : > { %p4249_p7 = pneg %p4248_p3  ;;  %p4255_p5 = por %p4254_p8, %p4253_p6 }
 0x174   : > { %p4256_p9 = pnand %p4255_p5, %p4249_p7 }
 0x176   : > { %4259 = shalt.err (!%p4256_p9)
}
 0x177   : > { %3779 = dma.hbm_to_vmem [thread:$0]  (!%p5207_p13), %s5216_s4, 128, %s5219_s9, %s5229_s19  }
 0x178   : > { %s898_s21 = scalar_lea.vmem [#allocation7], %s5202_s30  ;;  %s4761_s13 = smov [#allocation13]  }
 0x179   : > { %s905_s11 = sshll.u32 %s898_s21, 4  ;;  %s645_s6 = sshll.u32 %s4761_s13, 4  ;;  %s5260_s11 = int_to_ptr.vmem [resolvable:$true] %s905_s11  ;;  %s646_s6 = int_to_ptr.vmem [resolvable:$true] %s645_s6 }
 0x17a   : > { %s6098_s7 = sld [smem:[#allocation72_spill]]  ;;  %p6099_p8 = scmp.ne.s32.totalorder %s6075_s3, 0 }
 0x180   : > { %s4260_s18 = scalar_lea.hbm %s6098_s7, 256 }
 0x181   : > { %p4261_p6 = scmp.ne.s32.totalorder %s6098_s7, %s4260_s18  ;;  %p4267_p4 = scmp.lt.u32.totalorder %s4260_s18, %s6098_s7 }
 0x183   : > { %p4263_p7 = pnand %p4261_p6, %p6099_p8 }
 0x185   : > { %p4264_p12 = pneg %p4263_p7 }
 0x187   : > { %p4269_p2 = pnand %p4267_p4, %p4264_p12 }
 0x189   : > { %4272 = shalt.err (!%p4269_p2)
}
 0x18a   : > { %s4273_s4 = scalar_lea.vmem %s646_s6, 256  ;;  %p4281_p3 = scmp.lt.s32.totalorder %s646_s6, %s646_s6 }
 0x18b   : > { %p4274_p10 = scmp.ne.s32.totalorder %s646_s6, %s4273_s4  ;;  %p4282_p5 = scmp.lt.s32.totalorder %s4273_s4, %s4273_s4 }
 0x18d   : > { %p4276_p11 = pnand %p4274_p10, %p6099_p8  ;;  %p4283_p9 = por %p4282_p5, %p4281_p3 }
 0x18f   : > { %p4277_p0 = pneg %p4276_p11 }
 0x191   : > { %p4284_p13 = pnand %p4283_p9, %p4277_p0 }
 0x193   : > { %4287 = shalt.err (!%p4284_p13)
}
 0x194   : > { %s6032_s27 = smov 64   ;;  %s6034_s25 = smov 4  }
 0x195   : > { %p6100_p6 = scmp.ne.s32.totalorder %s6073_s8, 0  ;;  %s4764_s21 = smov [#allocation16]  }
 0x196   : > { %s669_s13 = sshll.u32 %s4764_s21, 4  ;;  %s4765_s1 = smov [#allocation19]   ;;  %s670_s13 = int_to_ptr.vmem [resolvable:$true] %s669_s13 }
 0x197   : > { %3721 = dma.hbm_to_vmem [thread:$0]  (!%p6100_p6), %s6098_s7, 256, %s646_s6, [#allocation12], %s6032_s27, %s6032_s27, %s6034_s25  }
 0x198   : > { %s694_s22 = sshll.u32 %s4765_s1, 4  ;;  %s6101_s5 = sld [smem:[#allocation74_spill]]  ;;  %s5283_s22 = int_to_ptr.vmem [resolvable:$true] %s694_s22 }
 0x19e   : > { %s6102_s20 = smov %s6101_s5  ;;  %s4288_s29 = scalar_lea.hbm %s6101_s5, 256 }
 0x19f   : > { %p4289_p13 = scmp.ne.s32.totalorder %s6102_s20, %s4288_s29  ;;  %p4295_p4 = scmp.lt.u32.totalorder %s4288_s29, %s6102_s20 }
 0x1a1   : > { %p4291_p7 = pnand %p4289_p13, %p6099_p8 }
 0x1a3   : > { %p4292_p12 = pneg %p4291_p7 }
 0x1a5   : > { %p4297_p2 = pnand %p4295_p4, %p4292_p12 }
 0x1a7   : > { %4300 = shalt.err (!%p4297_p2)
}
 0x1a8   : > { %s4301_s18 = scalar_lea.vmem %s670_s13, 256  ;;  %p4309_p3 = scmp.lt.s32.totalorder %s670_s13, %s670_s13 }
 0x1a9   : > { %p4302_p10 = scmp.ne.s32.totalorder %s670_s13, %s4301_s18  ;;  %p4310_p5 = scmp.lt.s32.totalorder %s4301_s18, %s4301_s18 }
 0x1ab   : > { %p4304_p11 = pnand %p4302_p10, %p6099_p8  ;;  %p4311_p9 = por %p4310_p5, %p4309_p3 }
 0x1ad   : > { %p4305_p0 = pneg %p4304_p11 }
 0x1af   : > { %p4312_p1 = pnand %p4311_p9, %p4305_p0 }
 0x1b1   : > { %4315 = shalt.err (!%p4312_p1)
}
 0x1b2   : > { %3727 = dma.hbm_to_vmem [thread:$0]  (!%p6100_p6), %s6102_s20, 256, %s670_s13, [#allocation15], %s6032_s27, %s6032_s27, %s6034_s25  }
 0x1b3   : > { %s6103_s10 = sld [smem:[#allocation76_spill]] }
 0x1b9   : > { %s4316_s21 = scalar_lea.hbm %s6103_s10, 16 }
 0x1ba   : > { %p4317_p13 = scmp.ne.s32.totalorder %s6103_s10, %s4316_s21  ;;  %p4323_p12 = scmp.lt.u32.totalorder %s4316_s21, %s6103_s10 }
 0x1bc   : > { %p4319_p1 = pnand %p4317_p13, %p6099_p8 }
 0x1be   : > { %p4320_p7 = pneg %p4319_p1 }
 0x1c0   : > { %p4325_p4 = pnand %p4323_p12, %p4320_p7 }
 0x1c2   : > { %4328 = shalt.err (!%p4325_p4)
}
 0x1c3   : > { %s4329_s13 = scalar_lea.vmem %s5283_s22, 16  ;;  %s4336_s6 = scalar_lea.vmem %s5283_s22, 32 }
 0x1c4   : > { %p4330_p2 = scmp.ne.s32.totalorder %s5283_s22, %s4329_s13  ;;  %p4337_p0 = scmp.lt.s32.totalorder %s5283_s22, %s5283_s22 }
 0x1c5   : > { %p4338_p3 = scmp.lt.s32.totalorder %s4336_s6, %s4329_s13 }
 0x1c6   : > { %p4332_p10 = pnand %p4330_p2, %p6099_p8 }
 0x1c7   : > { %p4339_p5 = por %p4338_p3, %p4337_p0 }
 0x1c8   : > { %p4333_p11 = pneg %p4332_p10 }
 0x1ca   : > { %p4340_p9 = pnand %p4339_p5, %p4333_p11 }
 0x1cc   : > { %4343 = shalt.err (!%p4340_p9)
}
 0x1cd   : > { %3733 = dma.hbm_to_vmem [thread:$0]  (!%p6100_p6), %s6103_s10, 16, %s5283_s22, [#allocation18]  }
 0x1ce   : > { %s4766_s26 = smov [#allocation22]   ;;  %s4767_s0 = smov [#allocation25]  }
 0x1cf   : > { %s715_s29 = sshll.u32 %s4766_s26, 4  ;;  %s739_s21 = sshll.u32 %s4767_s0, 4  ;;  %s716_s29 = int_to_ptr.vmem [resolvable:$true] %s715_s29  ;;  %s5330_s21 = int_to_ptr.vmem [resolvable:$true] %s739_s21 }
 0x1d0   : > { %s6104_s12 = sld [smem:[#allocation78_spill]] }
 0x1d6   : > { %s4344_s4 = scalar_lea.hbm %s6104_s12, 256 }
 0x1d7   : > { %p4345_p13 = scmp.ne.s32.totalorder %s6104_s12, %s4344_s4  ;;  %p4351_p12 = scmp.lt.u32.totalorder %s4344_s4, %s6104_s12 }
 0x1d9   : > { %p4347_p1 = pnand %p4345_p13, %p6099_p8 }
 0x1db   : > { %p4348_p7 = pneg %p4347_p1 }
 0x1dd   : > { %p4353_p4 = pnand %p4351_p12, %p4348_p7 }
 0x1df   : > { %4356 = shalt.err (!%p4353_p4)
}
 0x1e0   : > { %s4357_s18 = scalar_lea.vmem %s716_s29, 256  ;;  %p4365_p0 = scmp.lt.s32.totalorder %s716_s29, %s716_s29 }
 0x1e1   : > { %p4358_p2 = scmp.ne.s32.totalorder %s716_s29, %s4357_s18  ;;  %p4366_p3 = scmp.lt.s32.totalorder %s4357_s18, %s4357_s18 }
 0x1e3   : > { %p4360_p10 = pnand %p4358_p2, %p6099_p8  ;;  %p4367_p5 = por %p4366_p3, %p4365_p0 }
 0x1e5   : > { %p4361_p11 = pneg %p4360_p10 }
 0x1e7   : > { %p4368_p9 = pnand %p4367_p5, %p4361_p11 }
 0x1e9   : > { %4371 = shalt.err (!%p4368_p9)
}
 0x1ea   : > { %3739 = dma.hbm_to_vmem [thread:$0]  (!%p6100_p6), %s6104_s12, 256, %s716_s29, [#allocation21], %s6032_s27, %s6032_s27, %s6034_s25  }
 0x1eb   : > { %s6105_s9 = sld [smem:[#allocation80_spill]] }
 0x1f1   : > { %s4372_s4 = scalar_lea.hbm %s6105_s9, 256 }
 0x1f2   : > { %p4373_p13 = scmp.ne.s32.totalorder %s6105_s9, %s4372_s4  ;;  %p4379_p12 = scmp.lt.u32.totalorder %s4372_s4, %s6105_s9 }
 0x1f4   : > { %p4375_p1 = pnand %p4373_p13, %p6099_p8 }
 0x1f6   : > { %p4376_p7 = pneg %p4375_p1 }
 0x1f8   : > { %p4381_p4 = pnand %p4379_p12, %p4376_p7 }
 0x1fa   : > { %4384 = shalt.err (!%p4381_p4)
}
 0x1fb   : > { %s4385_s29 = scalar_lea.vmem %s5330_s21, 256  ;;  %p4393_p0 = scmp.lt.s32.totalorder %s5330_s21, %s5330_s21 }
 0x1fc   : > { %p4386_p2 = scmp.ne.s32.totalorder %s5330_s21, %s4385_s29  ;;  %p4394_p3 = scmp.lt.s32.totalorder %s4385_s29, %s4385_s29 }
 0x1fe   : > { %p4388_p10 = pnand %p4386_p2, %p6099_p8  ;;  %p4395_p5 = por %p4394_p3, %p4393_p0 }
 0x200   : > { %p4389_p11 = pneg %p4388_p10 }
 0x202   : > { %p4396_p9 = pnand %p4395_p5, %p4389_p11 }
 0x204   : > { %4399 = shalt.err (!%p4396_p9)
}
 0x205   : > { %3745 = dma.hbm_to_vmem [thread:$0]  (!%p6100_p6), %s6105_s9, 256, %s5330_s21, [#allocation24], %s6032_s27, %s6032_s27, %s6034_s25  }
 0x206   : > { %s4768_s26 = smov [#allocation28]   ;;  %s4769_s1 = smov [#allocation31]  }
 0x207   : > { %s763_s0 = sshll.u32 %s4768_s26, 4  ;;  %s788_s4 = sshll.u32 %s4769_s1, 4  ;;  %s764_s0 = int_to_ptr.vmem [resolvable:$true] %s763_s0  ;;  %s5379_s4 = int_to_ptr.vmem [resolvable:$true] %s788_s4 }
 0x208   : > { %s6106_s6 = sld [smem:[#allocation82_spill]] }
 0x20e   : > { %s4400_s22 = scalar_lea.hbm %s6106_s6, 256 }
 0x20f   : > { %p4401_p13 = scmp.ne.s32.totalorder %s6106_s6, %s4400_s22  ;;  %p4407_p12 = scmp.lt.u32.totalorder %s4400_s22, %s6106_s6 }
 0x211   : > { %p4403_p1 = pnand %p4401_p13, %p6099_p8 }
 0x213   : > { %p4404_p7 = pneg %p4403_p1 }
 0x215   : > { %p4409_p4 = pnand %p4407_p12, %p4404_p7 }
 0x217   : > { %4412 = shalt.err (!%p4409_p4)
}
 0x218   : > { %s4413_s5 = scalar_lea.vmem %s764_s0, 256  ;;  %p4421_p0 = scmp.lt.s32.totalorder %s764_s0, %s764_s0 }
 0x219   : > { %p4414_p2 = scmp.ne.s32.totalorder %s764_s0, %s4413_s5  ;;  %p4422_p3 = scmp.lt.s32.totalorder %s4413_s5, %s4413_s5 }
 0x21b   : > { %p4416_p10 = pnand %p4414_p2, %p6099_p8  ;;  %p4423_p5 = por %p4422_p3, %p4421_p0 }
 0x21d   : > { %p4417_p11 = pneg %p4416_p10 }
 0x21f   : > { %p4424_p9 = pnand %p4423_p5, %p4417_p11 }
 0x221   : > { %4427 = shalt.err (!%p4424_p9)
}
 0x222   : > { %3751 = dma.hbm_to_vmem [thread:$0]  (!%p6100_p6), %s6106_s6, 256, %s764_s0, [#allocation27], %s6032_s27, %s6032_s27, %s6034_s25  }
 0x223   : > { %s6107_s13 = sld [smem:[#allocation84_spill]] }
 0x229   : > { %s4428_s22 = scalar_lea.hbm %s6107_s13, 16 }
 0x22a   : > { %p4429_p13 = scmp.ne.s32.totalorder %s6107_s13, %s4428_s22  ;;  %p4435_p12 = scmp.lt.u32.totalorder %s4428_s22, %s6107_s13 }
 0x22c   : > { %p4431_p1 = pnand %p4429_p13, %p6099_p8 }
 0x22e   : > { %p4432_p7 = pneg %p4431_p1 }
 0x230   : > { %p4437_p4 = pnand %p4435_p12, %p4432_p7 }
 0x232   : > { %4440 = shalt.err (!%p4437_p4)
}
 0x233   : > { %s4441_s0 = scalar_lea.vmem %s5379_s4, 16  ;;  %s4448_s7 = scalar_lea.vmem %s5379_s4, 32 }
 0x234   : > { %p4442_p2 = scmp.ne.s32.totalorder %s5379_s4, %s4441_s0  ;;  %p4449_p0 = scmp.lt.s32.totalorder %s5379_s4, %s5379_s4 }
 0x235   : > { %p4450_p3 = scmp.lt.s32.totalorder %s4448_s7, %s4441_s0 }
 0x236   : > { %p4444_p10 = pnand %p4442_p2, %p6099_p8 }
 0x237   : > { %p4451_p5 = por %p4450_p3, %p4449_p0 }
 0x238   : > { %p4445_p11 = pneg %p4444_p10 }
 0x23a   : > { %p4452_p9 = pnand %p4451_p5, %p4445_p11 }
 0x23c   : > { %4455 = shalt.err (!%p4452_p9)
}
 0x23d   : > { %3757 = dma.hbm_to_vmem [thread:$0]  (!%p6100_p6), %s6107_s13, 16, %s5379_s4, [#allocation30]  }
 0x23e   : > { %s4770_s24 = smov [#allocation34]   ;;  %s4771_s29 = smov [#allocation37]  }
 0x23f   : > { %s809_s22 = sshll.u32 %s4770_s24, 4  ;;  %s833_s18 = sshll.u32 %s4771_s29, 4  ;;  %s810_s22 = int_to_ptr.vmem [resolvable:$true] %s809_s22  ;;  %s5426_s18 = int_to_ptr.vmem [resolvable:$true] %s833_s18 }
 0x240   : > { %s6108_s0 = sld [smem:[#allocation86_spill]] }
 0x246   : > { %s4456_s7 = scalar_lea.hbm %s6108_s0, 256 }
 0x247   : > { %p4457_p13 = scmp.ne.s32.totalorder %s6108_s0, %s4456_s7  ;;  %p4463_p12 = scmp.lt.u32.totalorder %s4456_s7, %s6108_s0 }
 0x249   : > { %p4459_p1 = pnand %p4457_p13, %p6099_p8 }
 0x24b   : > { %p4460_p7 = pneg %p4459_p1 }
 0x24d   : > { %p4465_p4 = pnand %p4463_p12, %p4460_p7 }
 0x24f   : > { %4468 = shalt.err (!%p4465_p4)
}
 0x250   : > { %s4469_s1 = scalar_lea.vmem %s810_s22, 256  ;;  %p4477_p0 = scmp.lt.s32.totalorder %s810_s22, %s810_s22 }
 0x251   : > { %p4470_p2 = scmp.ne.s32.totalorder %s810_s22, %s4469_s1  ;;  %p4478_p3 = scmp.lt.s32.totalorder %s4469_s1, %s4469_s1 }
 0x253   : > { %p4472_p10 = pnand %p4470_p2, %p6099_p8  ;;  %p4479_p5 = por %p4478_p3, %p4477_p0 }
 0x255   : > { %p4473_p11 = pneg %p4472_p10 }
 0x257   : > { %p4480_p9 = pnand %p4479_p5, %p4473_p11 }
 0x259   : > { %4483 = shalt.err (!%p4480_p9)
}
 0x25a   : > { %s6109_s27 = smov 4   ;;  %s6110_s25 = smov 64  }
 0x25b   : > { %3763 = dma.hbm_to_vmem [thread:$0]  (!%p6100_p6), %s6108_s0, 256, %s810_s22, [#allocation33], %s6110_s25, %s6110_s25, %s6109_s27  }
 0x25c   : > { %s6111_s7 = sld [smem:[#allocation88_spill]] }
 0x262   : > { %s4484_s26 = scalar_lea.hbm %s6111_s7, 512 }
 0x263   : > { %p4485_p13 = scmp.ne.s32.totalorder %s6111_s7, %s4484_s26  ;;  %p4491_p12 = scmp.lt.u32.totalorder %s4484_s26, %s6111_s7 }
 0x265   : > { %p4487_p1 = pnand %p4485_p13, %p6099_p8 }
 0x267   : > { %p4488_p7 = pneg %p4487_p1 }
 0x269   : > { %p4493_p4 = pnand %p4491_p12, %p4488_p7 }
 0x26b   : > { %4496 = shalt.err (!%p4493_p4)
}
 0x26c   : > { %s4497_s22 = scalar_lea.vmem %s5426_s18, 512  ;;  %p4505_p0 = scmp.lt.s32.totalorder %s5426_s18, %s5426_s18 }
 0x26d   : > { %p4498_p2 = scmp.ne.s32.totalorder %s5426_s18, %s4497_s22  ;;  %p4506_p3 = scmp.lt.s32.totalorder %s4497_s22, %s4497_s22 }
 0x26f   : > { %p4500_p10 = pnand %p4498_p2, %p6099_p8  ;;  %p4507_p5 = por %p4506_p3, %p4505_p0 }
 0x271   : > { %p4501_p11 = pneg %p4500_p10 }
 0x273   : > { %p4508_p9 = pnand %p4507_p5, %p4501_p11 }
 0x275   : > { %4511 = shalt.err (!%p4508_p9)
}
 0x276   : > { %3769 = dma.hbm_to_vmem [thread:$0]  (!%p6100_p6), %s6111_s7, 512, %s5426_s18, [#allocation36], %s6110_s25, %s6110_s25, %s6109_s27  }
 0x277   : > { %s4772_s24 = smov [#allocation38]   ;;  %s6112_s26 = sld [smem:[#allocation66_spill]] }
 0x278   : > { %s847_s29 = sshll.u32 %s4772_s24, 4  ;;  %s6114_s10 = sld [smem:[#allocation89_spill]]  ;;  %s848_s29 = int_to_ptr.vmem [resolvable:$true] %s847_s29 }
 0x27d   : > { %s6113_s4 = smov %s6112_s26  ;;  %s5479_s1 = scalar_lea.hbm %s6112_s26, %s5205_s2 }
 0x27e   : > { %s4512_s12 = scalar_lea.hbm %s6114_s10, 16 }
 0x27f   : > { %p4513_p13 = scmp.ne.s32.totalorder %s6114_s10, %s4512_s12  ;;  %p4519_p12 = scmp.lt.u32.totalorder %s4512_s12, %s6114_s10 }
 0x281   : > { %p4515_p1 = pnand %p4513_p13, %p6099_p8 }
 0x283   : > { %p4516_p7 = pneg %p4515_p1 }
 0x285   : > { %p4521_p4 = pnand %p4519_p12, %p4516_p7 }
 0x287   : > { %4524 = shalt.err (!%p4521_p4)
}
 0x288   : > { %s4525_s6 = scalar_lea.vmem %s848_s29, 16  ;;  %s4532_s2 = scalar_lea.vmem %s848_s29, 32 }
 0x289   : > { %p4526_p2 = scmp.ne.s32.totalorder %s848_s29, %s4525_s6  ;;  %p4533_p0 = scmp.lt.s32.totalorder %s848_s29, %s848_s29 }
 0x28a   : > { %p4534_p3 = scmp.lt.s32.totalorder %s4532_s2, %s4525_s6 }
 0x28b   : > { %p4528_p10 = pnand %p4526_p2, %p6099_p8 }
 0x28c   : > { %p4535_p5 = por %p4534_p3, %p4533_p0 }
 0x28d   : > { %p4529_p11 = pneg %p4528_p10 }
 0x28f   : > { %p4536_p9 = pnand %p4535_p5, %p4529_p11 }
 0x291   : > { %4539 = shalt.err (!%p4536_p9)
}
 0x292   : > { %3772 = dma.hbm_to_vmem [thread:$0]  (!%p6100_p6), %s6114_s10, 16, %s848_s29, [#allocation39]  }
 0x293   : > { %s862_s12 = scalar_lea.vmem [#allocation2], %s5202_s30  ;;  %s3281_s0 = sshll.u32 %s4748_s28, 4 }
 0x294   : > { %s869_s3 = sshll.u32 %s862_s12, 4  ;;  %s859_s24 = scalar_lea.sflag [#allocation3], %s5191_s16  ;;  %s5500_s3 = int_to_ptr.vmem [resolvable:$true] %s869_s3 }
 0x295   : > { %s4540_s21 = scalar_lea.hbm %s5479_s1, 128  ;;  %p6115_p13 = scmp.ne.s32.totalorder %s6097_s14, 0 }
 0x296   : > { %p4541_p8 = scmp.ne.s32.totalorder %s5479_s1, %s4540_s21  ;;  %s4545_s26 = scalar_lea.hbm %s6113_s4, 256 }
 0x297   : > { %p4546_p12 = scmp.lt.u32.totalorder %s5479_s1, %s6113_s4  ;;  %p4547_p6 = scmp.lt.u32.totalorder %s4545_s26, %s4540_s21 }
 0x298   : > { %p4543_p1 = pnand %p4541_p8, %p6115_p13  ;;  %p4549_p2 = scmp.lt.u32.totalorder %s4540_s21, %s5479_s1 }
 0x299   : > { %p4548_p4 = por %p4547_p6, %p4546_p12 }
 0x29a   : > { %p4544_p7 = pneg %p4543_p1 }
 0x29b   : > { %p4550_p10 = por %p4549_p2, %p4548_p4 }
 0x29d   : > { %p4551_p11 = pnand %p4550_p10, %p4544_p7 }
 0x29f   : > { %4554 = shalt.err (!%p4551_p11)
}
 0x2a0   : > { %s4555_s30 = scalar_lea.vmem %s5500_s3, 128  ;;  %s4773_s29 = smov [#allocation2]  }
 0x2a1   : > { %p4556_p0 = scmp.ne.s32.totalorder %s5500_s3, %s4555_s30  ;;  %s4560_s9 = sshll.u32 %s4773_s29, 4  ;;  %s4561_s9 = int_to_ptr.vmem [resolvable:$false] %s4560_s9 }
 0x2a2   : > { %s4562_s6 = scalar_lea.vmem %s4561_s9, 256  ;;  %p4563_p9 = scmp.lt.s32.totalorder %s5500_s3, %s4561_s9 }
 0x2a3   : > { %p4558_p3 = pnand %p4556_p0, %p6115_p13  ;;  %p4564_p8 = scmp.lt.s32.totalorder %s4562_s6, %s4555_s30 }
 0x2a5   : > { %p4559_p5 = pneg %p4558_p3  ;;  %p4565_p1 = por %p4564_p8, %p4563_p9 }
 0x2a7   : > { %p4566_p12 = pnand %p4565_p1, %p4559_p5 }
 0x2a9   : > { %4569 = shalt.err (!%p4566_p12)
}
 0x2aa   : > { %p6116_p7 = scmp.ne.s32.totalorder %s6094_s23, 0  ;;  %s4570_s2 = scalar_lea.hbm %s5225_s17, 128 }
 0x2ab   : > { %p4571_p6 = scmp.ne.s32.totalorder %s5225_s17, %s4570_s2  ;;  %s4575_s12 = scalar_lea.hbm %s6096_s15, 256 }
 0x2ac   : > { %3776 = dma.hbm_to_vmem [thread:$0]  (!%p6116_p7), %s5479_s1, 128, %s5500_s3, %s859_s24  }
 0x2ad   : > { %p4573_p4 = pnand %p4571_p6, %p6115_p13  ;;  %p4576_p10 = scmp.lt.u32.totalorder %s5225_s17, %s6096_s15 }
 0x2ae   : > { %p4577_p11 = scmp.lt.u32.totalorder %s4575_s12, %s4570_s2  ;;  %p4579_p3 = scmp.lt.u32.totalorder %s4570_s2, %s5225_s17 }
 0x2af   : > { %p4574_p2 = pneg %p4573_p4 }
 0x2b0   : > { %p4578_p0 = por %p4577_p11, %p4576_p10 }
 0x2b2   : > { %p4580_p5 = por %p4579_p3, %p4578_p0 }
 0x2b4   : > { %p4581_p9 = pnand %p4580_p5, %p4574_p2 }
 0x2b6   : > { %4584 = shalt.err (!%p4581_p9)
}
 0x2b7   : > { %s4585_s1 = scalar_lea.vmem %s5260_s11, 128  ;;  %s4774_s3 = smov [#allocation7]  }
 0x2b8   : > { %p4586_p8 = scmp.ne.s32.totalorder %s5260_s11, %s4585_s1  ;;  %s4590_s24 = sshll.u32 %s4774_s3, 4  ;;  %s4591_s24 = int_to_ptr.vmem [resolvable:$false] %s4590_s24 }
 0x2b9   : > { %s4592_s5 = scalar_lea.vmem %s4591_s24, 256  ;;  %p4593_p6 = scmp.lt.s32.totalorder %s5260_s11, %s4591_s24 }
 0x2ba   : > { %p4588_p1 = pnand %p4586_p8, %p6115_p13  ;;  %p4594_p4 = scmp.lt.s32.totalorder %s4592_s5, %s4585_s1 }
 0x2bc   : > { %p4589_p12 = pneg %p4588_p1  ;;  %p4595_p10 = por %p4594_p4, %p4593_p6 }
 0x2be   : > { %p4596_p11 = pnand %p4595_p10, %p4589_p12 }
 0x2c0   : > { %4599 = shalt.err (!%p4596_p11)
}
 0x2c1   : > { %3782 = dma.hbm_to_vmem [thread:$0]  (!%p6116_p7), %s5225_s17, 128, %s5260_s11, %s5229_s19, %s6110_s25, %s6110_s25, %s6109_s27  }
 0x2c2   : > { %s6117_s18 = sld [smem:[#allocation69_spill]]  ;;  %s918_s29 = scalar_lea.vmem [#allocation8], %s5191_s16 }
 0x2c3   : > { %s925_s9 = sshll.u32 %s918_s29, 4  ;;  %s6118_s6 = sand.u32 1, %s4748_s28   ;;  %s926_s9 = int_to_ptr.vmem [resolvable:$true] %s925_s9 }
 0x2c4   : > { %s916_s2 = scalar_lea.sflag [#allocation9], %s6118_s6 }
 0x2c8   : > { %s5555_s30 = scalar_lea.hbm %s6117_s18, %s3281_s0  ;;  %s4605_s11 = scalar_lea.hbm %s6117_s18, 32 }
 0x2c9   : > { %s4600_s20 = scalar_lea.hbm %s5555_s30, 16  ;;  %p4606_p5 = scmp.lt.u32.totalorder %s5555_s30, %s6117_s18 }
 0x2ca   : > { %p4601_p2 = scmp.ne.s32.totalorder %s5555_s30, %s4600_s20  ;;  %p4607_p9 = scmp.lt.u32.totalorder %s4605_s11, %s4600_s20 }
 0x2cb   : > { %p4609_p1 = scmp.lt.u32.totalorder %s4600_s20, %s5555_s30 }
 0x2cc   : > { %p4603_p0 = pnand %p4601_p2, %p6115_p13  ;;  %p4608_p8 = por %p4607_p9, %p4606_p5 }
 0x2ce   : > { %p4604_p3 = pneg %p4603_p0  ;;  %p4610_p12 = por %p4609_p1, %p4608_p8 }
 0x2d0   : > { %p4611_p6 = pnand %p4610_p12, %p4604_p3 }
 0x2d2   : > { %4614 = shalt.err (!%p4611_p6)
}
 0x2d3   : > { %s4615_s16 = scalar_lea.vmem %s926_s9, 16  ;;  %s4775_s0 = smov [#allocation8]  }
 0x2d4   : > { %p4616_p4 = scmp.ne.s32.totalorder %s926_s9, %s4615_s16  ;;  %s4620_s13 = sshll.u32 %s4775_s0, 4  ;;  %s4621_s13 = int_to_ptr.vmem [resolvable:$false] %s4620_s13 }
 0x2d5   : > { %s4622_s12 = scalar_lea.vmem %s4621_s13, 32  ;;  %p4623_p2 = scmp.lt.s32.totalorder %s926_s9, %s4621_s13 }
 0x2d6   : > { %p4618_p10 = pnand %p4616_p4, %p6115_p13  ;;  %p4624_p0 = scmp.lt.s32.totalorder %s4622_s12, %s4615_s16 }
 0x2d8   : > { %p4619_p11 = pneg %p4618_p10  ;;  %p4625_p7 = por %p4624_p0, %p4623_p2 }
 0x2da   : > { %p4626_p5 = pnand %p4625_p7, %p4619_p11 }
 0x2dc   : > { %4629 = shalt.err (!%p4626_p5)
}
 0x2dd   : > { %p6119_p9 = scmp.ne.s32.totalorder %s6094_s23, 0  ;;  %s6120_s21 = sld [smem:[#allocation60_spill]] }
 0x2df   : > { %3785 = dma.hbm_to_vmem [thread:$0]  (!%p6119_p9), %s5555_s30, 16, %s926_s9, %s916_s2  }
 0x2e3   : > { %p6121_p3 = scmp.ne.s32.totalorder %s6120_s21, 0 }
 0x2e4   : > { %s6122_s8 = sld [smem:[#allocation57_spill]] (!%p6121_p3)  ;;  %s6123_s14 = sld [smem:[#allocation63_spill]] (!%p6121_p3) }
 0x2e5   : > { %934 = sbr.rel (%p6121_p3) target bundleno = 7396 (0x1ce4), region = 116 }
 0x2ea   : > { %s5580_s1 = sand.u32 (!%p6121_p3), 1, %s6122_s8   ;;  %p6124_p13 = scmp.ne.s32.totalorder (!%p6121_p3), %s6123_s14, 0 }
 0x2eb   : > { %s5583_s3 = sshll.u32 (!%p6121_p3), %s5580_s1, 3  ;;  %s937_s24 = scalar_lea.sflag (!%p6121_p3), [#allocation3], %s5580_s1 }
 0x2ec   : > { %s940_s5 = scalar_lea.vmem [#allocation2], %s5583_s3 }
 0x2ed   : > { %4675 = dma.done.wait (%p6124_p13), %s937_s24, 128  }
 0x2ee   : > { %4677 = vsyncadd (%p6124_p13), %s937_s24, 4294967168  ;;  %s6125_s23 = sld [smem:[#allocation59_spill]]  ;;  %s949_s30 = scalar_lea.vmem [#allocation5], %s5583_s3 }
 0x2f4   : > { %s945_s26 = sand.u32 1, %s6125_s23  }
 0x2f5   : > { %s946_s22 = scalar_lea.sflag [#allocation6], %s945_s26 }
 0x2f6   : > { %4679 = dma.done.wait (%p6124_p13), %s946_s22, 256  }
 0x2f7   : > { %4681 = vsyncadd (%p6124_p13), %s946_s22, 4294967040  ;;  %s958_s29 = scalar_lea.vmem [#allocation7], %s5583_s3  ;;  %s964_s9 = scalar_lea.sflag [#allocation9], %s945_s26 }
 0x2f8   : > { %s966_s6 = scalar_lea.vmem [#allocation8], %s5580_s1 }
 0x2f9   : > { %4683 = dma.done.wait (%p6124_p13), %s964_s9, 16  }
 0x2fa   : > { %4685 = vsyncadd (%p6124_p13), %s964_s9, 4294967280  ;;  %p6126_p7 = scmp.eq.s32.totalorder %s6125_s23, 0 }
 0x2fc   : > { %4687 = dma.done.wait (%p6126_p7), [#allocation9], 16   ;;  %p6127_p8 = pmov %p6126_p7 }
 0x2fd   : > { %p6128_p1 = pmov %p6126_p7 }
 0x2fe   : > { %4689 = vsyncadd (%p6127_p8), [#allocation9], 4294967280 }
 0x2ff   : > { %4691 = dma.done.wait (%p6128_p1), [#allocation12], 272   ;;  %p6129_p12 = pmov %p6128_p1 }
 0x300   : > { %p6130_p6 = pmov %p6128_p1 }
 0x301   : > { %4693 = vsyncadd (%p6129_p12), [#allocation12], 4294967024 }
 0x302   : > { %4695 = dma.done.wait (%p6130_p6), [#allocation15], 272   ;;  %p6131_p4 = pmov %p6128_p1 }
 0x303   : > { %p6132_p10 = pmov %p6128_p1 }
 0x304   : > { %4697 = vsyncadd (%p6131_p4), [#allocation15], 4294967024 }
 0x305   : > { %4699 = dma.done.wait (%p6132_p10), [#allocation18], 32   ;;  %p6133_p11 = pmov %p6128_p1 }
 0x306   : > { %p6134_p2 = pmov %p6128_p1 }
 0x307   : > { %4701 = vsyncadd (%p6133_p11), [#allocation18], 4294967264 }
 0x308   : > { %4703 = dma.done.wait (%p6134_p2), [#allocation21], 272   ;;  %p6135_p0 = pmov %p6128_p1 }
 0x30a   : > { %4705 = vsyncadd (%p6135_p0), [#allocation21], 4294967024  ;;  %p6136_p5 = pmov %p6135_p0 }
 0x30b   : > { %p6137_p9 = pmov %p6135_p0 }
 0x30c   : > { %4707 = dma.done.wait (%p6136_p5), [#allocation24], 272  }
 0x30d   : > { %4709 = vsyncadd (%p6137_p9), [#allocation24], 4294967024  ;;  %p6138_p3 = pmov %p6135_p0 }
 0x30e   : > { %p6139_p13 = pmov %p6135_p0 }
 0x30f   : > { %4711 = dma.done.wait (%p6138_p3), [#allocation27], 272  }
 0x310   : > { %4713 = vsyncadd (%p6139_p13), [#allocation27], 4294967024  ;;  %p6140_p7 = pmov %p6135_p0 }
 0x311   : > { %p6141_p8 = pmov %p6135_p0 }
 0x312   : > { %4715 = dma.done.wait (%p6140_p7), [#allocation30], 32  }
 0x313   : > { %4717 = vsyncadd (%p6141_p8), [#allocation30], 4294967264  ;;  %p6142_p1 = pmov %p6135_p0 }
 0x314   : > { %p6143_p12 = pmov %p6135_p0 }
 0x315   : > { %4719 = dma.done.wait (%p6142_p1), [#allocation33], 272  }
 0x316   : > { %4721 = vsyncadd (%p6143_p12), [#allocation33], 4294967024  ;;  %p6144_p6 = pmov %p6135_p0 }
 0x317   : > { %p6145_p4 = pmov %p6135_p0 }
 0x318   : > { %4723 = dma.done.wait (%p6144_p6), [#allocation36], 528  }
 0x319   : > { %4725 = vsyncadd (%p6145_p4), [#allocation36], 4294966768  ;;  %p6146_p10 = pmov %p6135_p0 }
 0x31a   : > { %p6147_p11 = pmov %p6135_p0 }
 0x31b   : > { %4727 = dma.done.wait (%p6146_p10), [#allocation39], 16  }
 0x31c   : > { %4729 = vsyncadd (%p6147_p11), [#allocation39], 4294967280  ;;  %vm1129_vm0 = vcmask 261120   ;;  %v5649_v0 = vld [vmem:[%s940_s5] sm:$0xff]  ;;  %v3899_v7 = vld [vmem:[#allocation13] sm:$0xff]   ;;  %v4776_v8 = vmov 0.0  }
 0x31d   : > { %v1130_v1 = vsel %vm1129_vm0, %v5649_v0, 0.0  ;;  %3434 = vmatprep.subr.bf16.mxu1 %v4776_v8  ;;  %vm4777_vm1 = vmmov 0   ;;  %v3900_v9 = vld [vmem:[#allocation13 + $0x8] sm:$0xff]   ;;  %3448 = vmatprep.subr.bf16.mxu0 %v4776_v8  ;;  %v3307_v14 = vld [vmem:[#allocation10] ss:$0 sm:$0xff]  ;;  %s4778_s2 = smov 120  }
 0x31e   : > { %1131 = vadd.xlane.f32.xlu0 %v1130_v1  ;;  %3438 = vmatprep.mubr.msk.bf16.mxu1 %vm4777_vm1, %v4776_v8  ;;  %v3308_v16 = vld [vmem:[#allocation11] ss:$0 sm:$0xff]  ;;  %v3309_v20 = vld [vmem:[#allocation14] ss:$0 sm:$0xff]  ;;  %s4779_s20 = smov 96   ;;  %s4780_s17 = smov 88  }
 0x31f   : > { %3435 = vmatpush3.bf16.msra.mxu1 %v3899_v7  ;;  %3450 = vmatprep.mubr.msk.bf16.mxu0 %vm4777_vm1, %v4776_v8  ;;  %vm1226_vm2 = vcmask 64512   ;;  %v5687_v33 = vld [vmem:[%s949_s30] sm:$0xff]  ;;  %s4781_s19 = smov 56   ;;  %s4782_s11 = smov 64   ;;  %vm1303_vm4 = vcmask 1043456   ;;  %vm2126_vm5 = vcmask 130048  }
 0x320   : > { %3436 = vmatprep.subr.bf16.mxu1 %v4776_v8  ;;  %v1227_v47 = vsel %vm1226_vm2, %v5687_v33, -inf  ;;  %s4783_s27 = smov 80   ;;  %s4784_s25 = smov 112   ;;  %vm2063_vm6 = vcmask 122880   ;;  %vm2868_vm8 = vcmask 523264  }
 0x321   : > { %s4785_s16 = smov 72   ;;  %s4786_s0 = smov 104  }
 0x322   : > { %s4787_s13 = smov 48   ;;  %s4788_s12 = smov 40  }
 0x323   : > { %3437 = vmatpush3.bf16.msra.mxu1 %v3900_v9  ;;  %s6148_s21 = sld [smem:[#allocation64_spill]]  ;;  %s3365_s8 = sshll.u32 %s6125_s23, 7 }
 0x324   : > { %3442 = vmatprep.subr.bf16.mxu1 %v4776_v8  ;;  %s1124_s14 = scalar_lea.vmem [#allocation40], %s5583_s3  ;;  %s6149_s22 = sld [smem:[#allocation90_spill]] }
 0x325   : > { %s2928_s24 = sshll.u32 %s1124_s14, 4  ;;  %s2915_s23 = scalar_lea.sflag [#allocation4], %s5580_s1  ;;  %s5917_s24 = int_to_ptr.vmem [resolvable:$true] %s2928_s24 }
 0x326   : > { %s4630_s3 = scalar_lea.vmem %s5917_s24, 128 }
 0x327   : > { %p4631_p2 = scmp.ne.s32.totalorder %s5917_s24, %s4630_s3 }
 0x329   : > { %p6150_p0 = scmp.ne.s32.totalorder %s6148_s21, 0 }
 0x32a   : > { %s5915_s30 = scalar_lea.hbm %s6149_s22, %s3365_s8 }
 0x32b   : > { %p4632_p5 = pnand %p4631_p2, %p6150_p0 }
 0x32d   : > { %p4633_p9 = pneg %p4632_p5 }
 0x3ab   : > { %v1132_v2 = vpop.xlane.xlu0 %1131 }
 0x3ac   : > { %v1134_v3 = vmul.f32 0.03125, %v1132_v2 }
 0x3ae   : > { %v1135_v4 = vsub.f32 %v5649_v0, %v1134_v3 }
 0x3b0   : > { %v1136_v5 = vmul.f32 %v1135_v4, %v1135_v4 }
 0x3b2   : > { %v1137_v6 = vsel %vm1129_vm0, %v1136_v5, 0.0 }
 0x3b3   : > { %1138 = vadd.xlane.f32.xlu0 %v1137_v6 }
 0x440   : > { %v1139_v10 = vpop.xlane.xlu0 %1138 }
 0x441   : > { %v1140_v11 = vmul.f32 0.03125, %v1139_v10 }
 0x443   : > { %v1141_v12 = vadd.f32 1e-12, %v1140_v11 }
 0x445   : > { %3912 = vrsqrt.f32 %v1141_v12  ;;  %v1348_v12 = vld [vmem:[#allocation16] sm:$0xf] }
 0x44f   : > { %v3913_v13 = vpop.eup %3912 }
 0x450   : > { %v1143_v15 = vmul.f32 %v3913_v13, %v1135_v4  ;;  %v1515_v13 = vsel %vm1303_vm4, %v1348_v12, 0 }
 0x452   : > { %v1150_v17 = vmul.f32 %v3307_v14, %v1143_v15  ;;  %v1464_v14 = vld [vmem:[#allocation16 + $0x4] sm:$0xf] }
 0x453   : > { %v1469_v15 = vsel %vm1303_vm4, %v1464_v14, 0 }
 0x454   : > { %v1157_v18 = vadd.f32 %v3308_v16, %v1150_v17 }
 0x456   : > { %v1158_v19 = vpack.c.bf16 %v1157_v18, %v1157_v18 }
 0x458   : > { %3439 = vmatmul.mubr.msk.bf16.vlgmr.msra.gmra.mrb[0].mxu1 %vm1129_vm0, %v1158_v19 }
 0x459   : > { %3444 = vmatprep.mubr.msk.bf16.mxu1 %vm4777_vm1, %v4776_v8 }
 0x52b   : > { %v1219_v21 = vpop.f32.mrb[0].mxu1 }
 0x52c   : > { %v1220_v22 = vadd.f32 %v3309_v20, %v1219_v21  ;;  %v3440_v23 = vpop.f32.mrb[1].mxu1 }
 0x52d   : > { %v1222_v24 = vpop.f32.mrb[2].mxu1 }
 0x52e   : > { %v5666_v25 = vpack.c.bf16 %v1220_v22, %v1220_v22  ;;  %v3441_v26 = vpop.f32.mrb[3].mxu1 }
 0x530   : > { %1349 = vrot.lane.b32.xlu0 %v5666_v25, %s4778_s2  ;;  %1235 = vrot.lane.b32.xlu1 %v5666_v25, %s4779_s20 }
 0x534   : > { %1351 = vrot.lane.b32.xlu1 %v5666_v25, %s4780_s17 }
 0x5a2   : > { %v1236_v27 = vpop.permute.xlu1 %1235  ;;  %v1350_v31 = vpop.permute.xlu0 %1349 }
 0x5a3   : > { %v1241_v28 = vsel %vm1226_vm2, %v1236_v27, 0 }
 0x5a4   : > { %3443 = vmatpush3.bf16.xpose.msra.mxu1 %v1241_v28 }
 0x5a5   : > { %3454 = vmatprep.subr.bf16.mxu1 %v4776_v8 }
 0x5a6   : > { %v1352_v29 = vpop.permute.xlu1 %1351 }
 0x5a7   : > { %v1357_v30 = vsel %vm1226_vm2, %v1352_v29, 0 }
 0x5ab   : > { %3445 = vmatmul.mubr.msk.bf16.vlgmr.msra.gmra.mrb[4].mxu1 %vm1226_vm2, %v5666_v25 }
 0x5ac   : > { %3455 = vmatpush3.bf16.xpose.msra.mxu1 %v1357_v30  ;;  %3456 = vmatprep.mubr.msk.bf16.mxu1 %vm4777_vm1, %v4776_v8 }
 0x5ad   : > { %3466 = vmatprep.subr.bf16.mxu1 %v4776_v8 }
 0x5b3   : > { %3457 = vmatmul.mubr.msk.bf16.vlgmr.msra.gmra.mrb[8].mxu1 %vm1226_vm2, %v1350_v31 }
 0x5b4   : > { %3468 = vmatprep.mubr.msk.bf16.mxu1 %vm4777_vm1, %v4776_v8  ;;  %3467 = vmatpush3.bf16.msra.mxu1 %v1469_v15 }
 0x5b5   : > { %3478 = vmatprep.subr.bf16.mxu1 %v4776_v8 }
 0x67e   : > { %v1277_v32 = vpop.f32.mrb[4].mxu1 }
 0x67f   : > { %v1283_v34 = vmul.f32 0.35355338, %v1277_v32  ;;  %v3446_v35 = vpop.f32.mrb[5].mxu1 }
 0x680   : > { %v1280_v36 = vpop.f32.mrb[6].mxu1 }
 0x681   : > { %v3447_v37 = vpop.f32.mrb[7].mxu1  ;;  %v1284_v38 = vadd.f32 %v1283_v34, %v5687_v33 }
 0x683   : > { %v1285_v39 = vsel %vm1226_vm2, %v1284_v38, -inf }
 0x684   : > { %1286 = vmax.xlane.f32.xlu1 %v1285_v39 }
 0x686   : > { %v1393_v40 = vpop.f32.mrb[8].mxu1 }
 0x687   : > { %v1399_v41 = vmul.f32 0.35355338, %v1393_v40  ;;  %v3458_v42 = vpop.f32.mrb[9].mxu1 }
 0x688   : > { %v1396_v43 = vpop.f32.mrb[10].mxu1  ;;  %1228 = vmax.xlane.f32.xlu1 %v1227_v47 }
 0x689   : > { %v3459_v44 = vpop.f32.mrb[11].mxu1  ;;  %v1400_v45 = vadd.f32 %v1399_v41, %v5687_v33 }
 0x68b   : > { %v1401_v46 = vsel %vm1226_vm2, %v1400_v45, -inf }
 0x68c   : > { %1402 = vmax.xlane.f32.xlu0 %v1401_v46 }
 0x6a2   : > { %1414 = vrot.lane.b32.xlu0 %v5666_v25, %s4781_s19 }
 0x711   : > { %v1287_v48 = vpop.xlane.xlu1 %1286 }
 0x712   : > { %v1288_v49 = vsub.f32 %v1284_v38, %v1287_v48 }
 0x714   : > { %v1289_v50 = vmul.f32 1.442695, %v1288_v49 }
 0x715   : > { %v1229_v58 = vpop.xlane.xlu1 %1228 }
 0x716   : > { %3914 = vpow2.f32 %v1289_v50  ;;  %vm1230_vm3 = vcmp.gt.f32.partialorder %v1229_v58, -1.0 }
 0x717   : > { %v5704_v1 = vsel %vm1230_vm3, 1.0, %v4776_v8 }
 0x719   : > { %v1403_v51 = vpop.xlane.xlu0 %1402 }
 0x71a   : > { %v1404_v52 = vsub.f32 %v1400_v45, %v1403_v51 }
 0x71c   : > { %v1405_v53 = vmul.f32 1.442695, %v1404_v52 }
 0x71d   : > { %v1415_v4 = vpop.permute.xlu0 %1414 }
 0x71e   : > { %3916 = vpow2.f32 %v1405_v53  ;;  %v1420_v6 = vsel %vm1303_vm4, %v1415_v4, 0 }
 0x720   : > { %v3915_v54 = vpop.eup %3914 }
 0x721   : > { %v1291_v55 = vsel %vm1226_vm2, %v3915_v54, 0.0 }
 0x722   : > { %1292 = vadd.xlane.f32.xlu1 %v1291_v55 }
 0x728   : > { %v3917_v56 = vpop.eup %3916 }
 0x729   : > { %v1407_v57 = vsel %vm1226_vm2, %v3917_v56, 0.0 }
 0x72a   : > { %1408 = vadd.xlane.f32.xlu1 %v1407_v57 }
 0x73b   : > { %1298 = vrot.lane.b32.xlu1 %v5666_v25, %s4782_s11 }
 0x73f   : > { %1559 = vrot.lane.b32.xlu1 %v5666_v25, %s4783_s27 }
 0x743   : > { %1557 = vrot.lane.b32.xlu1 %v5666_v25, %s4784_s25 }
 0x7af   : > { %v1293_v59 = vpop.xlane.xlu1 %1292 }
 0x7b0   : > { %3918 = vrcp.f32 %v1293_v59 }
 0x7b7   : > { %v1409_v60 = vpop.xlane.xlu1 %1408 }
 0x7b8   : > { %3920 = vrcp.f32 %v1409_v60 }
 0x7ba   : > { %v3919_v61 = vpop.eup %3918 }
 0x7bb   : > { %v1299_v62 = vpop.permute.xlu1 %1298  ;;  %v1295_v63 = vmul.f32 %v3919_v61, %v3915_v54 }
 0x7bc   : > { %v1305_v2 = vsel %vm1303_vm4, %v1299_v62, 0  ;;  %v1672_v62 = vld [vmem:[#allocation16 + $0x8] sm:$0xf] }
 0x7bd   : > { %3449 = vmatpush3.bf16.msra.mxu0 %v1305_v2  ;;  %v1296_v3 = vmul.f32 %v5704_v1, %v1295_v63  ;;  %v1677_v63 = vsel %vm1303_vm4, %v1672_v62, 0  ;;  %v3328_v62 = vld [vmem:[#allocation20] ss:$0 sm:$0xff] }
 0x7be   : > { %3460 = vmatprep.subr.bf16.mxu0 %v4776_v8 }
 0x7bf   : > { %v1297_v5 = vpack.c.bf16 %v1296_v3, %v1296_v3  ;;  %v1560_v21 = vpop.permute.xlu1 %1559 }
 0x7c0   : > { %v1565_v27 = vsel %vm1226_vm2, %v1560_v21, 0 }
 0x7c1   : > { %3451 = vmatmul.mubr.msk.bf16.vlgmr.msra.gmra.mrb[0].mxu0 %vm1226_vm2, %v1297_v5 }
 0x7c2   : > { %v3921_v7 = vpop.eup %3920  ;;  %3461 = vmatpush3.bf16.msra.mxu0 %v1420_v6  ;;  %3462 = vmatprep.mubr.msk.bf16.mxu0 %vm4777_vm1, %v4776_v8 }
 0x7c3   : > { %v1411_v9 = vmul.f32 %v3921_v7, %v3917_v56  ;;  %3472 = vmatprep.subr.bf16.mxu0 %v4776_v8  ;;  %v1558_v29 = vpop.permute.xlu1 %1557 }
 0x7c5   : > { %v1412_v10 = vmul.f32 %v5704_v1, %v1411_v9 }
 0x7c7   : > { %v1413_v11 = vpack.c.bf16 %v1412_v10, %v1412_v10 }
 0x7c9   : > { %3463 = vmatmul.mubr.msk.bf16.vlgmr.msra.gmra.mrb[4].mxu0 %vm1226_vm2, %v1413_v11 }
 0x7ca   : > { %3474 = vmatprep.mubr.msk.bf16.mxu0 %vm4777_vm1, %v4776_v8  ;;  %3473 = vmatpush3.bf16.msra.mxu0 %v1515_v13 }
 0x7cb   : > { %3484 = vmatprep.subr.bf16.mxu0 %v4776_v8 }
 0x894   : > { %v1341_v16 = vpop.f32.mrb[0].mxu0 }
 0x895   : > { %v1347_v17 = vpack.c.bf16 %v1341_v16, %v1341_v16  ;;  %v3452_v18 = vpop.f32.mrb[1].mxu0 }
 0x896   : > { %v1344_v19 = vpop.f32.mrb[2].mxu0 }
 0x897   : > { %v3453_v20 = vpop.f32.mrb[3].mxu0  ;;  %3475 = vmatmul.mubr.msk.bf16.vlgmr.msra.gmra.mrb[8].mxu0 %vm1226_vm2, %v1347_v17 }
 0x898   : > { %3486 = vmatprep.mubr.msk.bf16.mxu0 %vm4777_vm1, %v4776_v8 }
 0x89c   : > { %v1456_v22 = vpop.f32.mrb[4].mxu0 }
 0x89d   : > { %v1462_v23 = vpack.c.bf16 %v1456_v22, %v1456_v22  ;;  %v3464_v24 = vpop.f32.mrb[5].mxu0 }
 0x89e   : > { %v1459_v26 = vpop.f32.mrb[6].mxu0 }
 0x89f   : > { %v3465_v28 = vpop.f32.mrb[7].mxu0  ;;  %3469 = vmatmul.mubr.msk.bf16.vlgmr.msra.gmra.mrb[12].mxu1 %vm1226_vm2, %v1462_v23 }
 0x8a0   : > { %3479 = vmatpush3.bf16.xpose.msra.mxu1 %v1565_v27  ;;  %3480 = vmatprep.mubr.msk.bf16.mxu1 %vm4777_vm1, %v4776_v8 }
 0x8a1   : > { %3490 = vmatprep.subr.bf16.mxu1 %v4776_v8 }
 0x8a7   : > { %3481 = vmatmul.mubr.msk.bf16.vlgmr.msra.gmra.mrb[16].mxu1 %vm1226_vm2, %v1558_v29 }
 0x8a8   : > { %3492 = vmatprep.mubr.msk.bf16.mxu1 %vm4777_vm1, %v4776_v8  ;;  %3491 = vmatpush3.bf16.msra.mxu1 %v1677_v63 }
 0x8a9   : > { %3502 = vmatprep.subr.bf16.mxu1 %v4776_v8 }
 0x96a   : > { %v1551_v30 = vpop.f32.mrb[8].mxu0 }
 0x96b   : > { %v3476_v31 = vpop.f32.mrb[9].mxu0 }
 0x96c   : > { %v1554_v32 = vpop.f32.mrb[10].mxu0 }
 0x96d   : > { %v3477_v34 = vpop.f32.mrb[11].mxu0 }
 0x972   : > { %v1505_v35 = vpop.f32.mrb[12].mxu1 }
 0x973   : > { %v5733_v36 = vadd.f32 %v1551_v30, %v1505_v35  ;;  %v3470_v37 = vpop.f32.mrb[13].mxu1 }
 0x974   : > { %v1508_v38 = vpop.f32.mrb[14].mxu1 }
 0x975   : > { %v3471_v39 = vpop.f32.mrb[15].mxu1 }
 0x97a   : > { %v1601_v40 = vpop.f32.mrb[16].mxu1 }
 0x97b   : > { %v1607_v41 = vmul.f32 0.35355338, %v1601_v40  ;;  %v3482_v42 = vpop.f32.mrb[17].mxu1 }
 0x97c   : > { %v1604_v43 = vpop.f32.mrb[18].mxu1 }
 0x97d   : > { %v3483_v44 = vpop.f32.mrb[19].mxu1  ;;  %v1608_v45 = vadd.f32 %v1607_v41, %v5687_v33 }
 0x97f   : > { %v1609_v46 = vsel %vm1226_vm2, %v1608_v45, -inf }
 0x980   : > { %1610 = vmax.xlane.f32.xlu1 %v1609_v46 }
 0x991   : > { %1722 = vrot.lane.b32.xlu1 %v5666_v25, %s4785_s16 }
 0x995   : > { %1720 = vrot.lane.b32.xlu1 %v5666_v25, %s4786_s0 }
 0xa0d   : > { %v1611_v47 = vpop.xlane.xlu1 %1610 }
 0xa0e   : > { %v1612_v48 = vsub.f32 %v1608_v45, %v1611_v47 }
 0xa10   : > { %v1613_v49 = vmul.f32 1.442695, %v1612_v48 }
 0xa11   : > { %v1723_v58 = vpop.permute.xlu1 %1722 }
 0xa12   : > { %3922 = vpow2.f32 %v1613_v49  ;;  %v1728_v60 = vsel %vm1226_vm2, %v1723_v58, 0 }
 0xa15   : > { %v1721_v61 = vpop.permute.xlu1 %1720 }
 0xa1c   : > { %v3923_v50 = vpop.eup %3922 }
 0xa1d   : > { %v1615_v51 = vsel %vm1226_vm2, %v3923_v50, 0.0 }
 0xa1e   : > { %1616 = vadd.xlane.f32.xlu0 %v1615_v51 }
 0xa34   : > { %1622 = vrot.lane.b32.xlu0 %v5666_v25, %s4787_s13 }
 0xaab   : > { %v1617_v52 = vpop.xlane.xlu0 %1616 }
 0xaac   : > { %3924 = vrcp.f32 %v1617_v52  ;;  %v3901_v52 = vld [vmem:[#allocation25] sm:$0xff]  }
 0xaaf   : > { %v1623_v53 = vpop.permute.xlu0 %1622 }
 0xab0   : > { %v1628_v54 = vsel %vm1303_vm4, %v1623_v53, 0  ;;  %v3903_v53 = vld [vmem:[%s958_s29] sm:$0xff]   ;;  %s4789_s29 = smov [#allocation40]  }
 0xab1   : > { %3485 = vmatpush3.bf16.msra.mxu0 %v1628_v54  ;;  %v3904_v54 = vld [vmem:[#allocation22] sm:$0xff]   ;;  %s4634_s9 = sshll.u32 %s4789_s29, 4  ;;  %s4635_s9 = int_to_ptr.vmem [resolvable:$false] %s4634_s9 }
 0xab2   : > { %3496 = vmatprep.subr.bf16.mxu0 %v4776_v8  ;;  %p4637_p3 = scmp.lt.s32.totalorder %s5917_s24, %s4635_s9 }
 0xab6   : > { %v3925_v55 = vpop.eup %3924 }
 0xab7   : > { %v1619_v56 = vmul.f32 %v3925_v55, %v3923_v50  ;;  %v3905_v55 = vld [vmem:[#allocation22 + $0x8] sm:$0xff]  }
 0xab9   : > { %v1620_v57 = vmul.f32 %v5704_v1, %v1619_v56 }
 0xabb   : > { %v1621_v59 = vpack.c.bf16 %v1620_v57, %v1620_v57 }
 0xabd   : > { %3487 = vmatmul.mubr.msk.bf16.vlgmr.msra.gmra.mrb[12].mxu0 %vm1226_vm2, %v1621_v59 }
 0xabe   : > { %3497 = vmatpush3.bf16.xpose.msra.mxu0 %v1728_v60  ;;  %3498 = vmatprep.mubr.msk.bf16.mxu0 %vm4777_vm1, %v4776_v8  ;;  %v3327_v60 = vld [vmem:[#allocation19] ss:$0 sm:$0xff] }
 0xabf   : > { %3508 = vmatprep.subr.bf16.mxu0 %v4776_v8 }
 0xac5   : > { %3499 = vmatmul.mubr.msk.bf16.vlgmr.msra.gmra.mrb[16].mxu0 %vm1226_vm2, %v1721_v61 }
 0xac6   : > { %3510 = vmatprep.mubr.msk.bf16.mxu0 %vm4777_vm1, %v4776_v8 }
 0xb90   : > { %v1664_v2 = vpop.f32.mrb[12].mxu0 }
 0xb91   : > { %v1670_v3 = vpack.c.bf16 %v1664_v2, %v1664_v2  ;;  %v3488_v4 = vpop.f32.mrb[13].mxu0 }
 0xb92   : > { %v1667_v5 = vpop.f32.mrb[14].mxu0  ;;  %v3333_v4 = vld [vmem:[#allocation26] ss:$0 sm:$0xff] }
 0xb93   : > { %v3489_v6 = vpop.f32.mrb[15].mxu0  ;;  %3493 = vmatmul.mubr.msk.bf16.vlgmr.msra.gmra.mrb[20].mxu1 %vm1226_vm2, %v1670_v3 }
 0xb94   : > { %3504 = vmatprep.mubr.msk.bf16.mxu1 %vm4777_vm1, %v4776_v8 }
 0xb98   : > { %v1764_v7 = vpop.f32.mrb[16].mxu0 }
 0xb99   : > { %v1770_v9 = vmul.f32 0.35355338, %v1764_v7  ;;  %v3500_v10 = vpop.f32.mrb[17].mxu0 }
 0xb9a   : > { %v1767_v11 = vpop.f32.mrb[18].mxu0 }
 0xb9b   : > { %v3501_v12 = vpop.f32.mrb[19].mxu0  ;;  %v1771_v13 = vadd.f32 %v1770_v9, %v5687_v33  ;;  %v1835_v33 = vld [vmem:[#allocation16 + $0xc] sm:$0xf] }
 0xb9c   : > { %v1840_v22 = vsel %vm1303_vm4, %v1835_v33, 0 }
 0xb9d   : > { %v1772_v14 = vsel %vm1226_vm2, %v1771_v13, -inf  ;;  %3509 = vmatpush3.bf16.msra.mxu0 %v1840_v22 }
 0xb9e   : > { %1773 = vmax.xlane.f32.xlu0 %v1772_v14  ;;  %3522 = vmatprep.subr.bf16.mxu0 %v4776_v8  ;;  %v3329_v14 = vld [vmem:[#allocation23] ss:$0 sm:$0xff] }
 0xbb4   : > { %1785 = vrot.lane.b32.xlu0 %v5666_v25, %s4788_s12 }
 0xc2b   : > { %v1774_v15 = vpop.xlane.xlu0 %1773 }
 0xc2c   : > { %v1775_v16 = vsub.f32 %v1771_v13, %v1774_v15 }
 0xc2e   : > { %v1776_v17 = vmul.f32 1.442695, %v1775_v16 }
 0xc2f   : > { %v1786_v18 = vpop.permute.xlu0 %1785 }
 0xc30   : > { %3926 = vpow2.f32 %v1776_v17  ;;  %v1791_v19 = vsel %vm1303_vm4, %v1786_v18, 0 }
 0xc31   : > { %3503 = vmatpush3.bf16.msra.mxu1 %v1791_v19 }
 0xc32   : > { %3514 = vmatprep.subr.bf16.mxu1 %v4776_v8 }
 0xc3a   : > { %v3927_v20 = vpop.eup %3926 }
 0xc3b   : > { %v1778_v21 = vsel %vm1226_vm2, %v3927_v20, 0.0 }
 0xc3c   : > { %1779 = vadd.xlane.f32.xlu1 %v1778_v21 }
 0xc66   : > { %v1713_v25 = vpop.f32.mrb[20].mxu1 }
 0xc67   : > { %v1719_v23 = vadd.f32 %v1713_v25, %v5733_v36  ;;  %v3494_v24 = vpop.f32.mrb[21].mxu1  ;;  %v2120_v25 = vlaneseq }
 0xc68   : > { %v1716_v26 = vpop.f32.mrb[22].mxu1 }
 0xc69   : > { %v3495_v27 = vpop.f32.mrb[23].mxu1  ;;  %v2062_v26 = vld [vmem:[%s966_s6] sm:$0x1]  ;;  %s4636_s6 = scalar_lea.vmem %s4635_s9, 256 }
 0xc6a   : > { %p4638_p13 = scmp.lt.s32.totalorder %s4636_s6, %s4630_s3 }
 0xc6c   : > { %p4639_p7 = por %p4638_p13, %p4637_p3 }
 0xc6e   : > { %p4640_p8 = pnand %p4639_p7, %p4633_p9 }
 0xcc9   : > { %v1780_v28 = vpop.xlane.xlu1 %1779 }
 0xcca   : > { %3928 = vrcp.f32 %v1780_v28 }
 0xcd4   : > { %v3929_v29 = vpop.eup %3928 }
 0xcd5   : > { %v1782_v30 = vmul.f32 %v3929_v29, %v3927_v20 }
 0xcd7   : > { %v1783_v31 = vmul.f32 %v5704_v1, %v1782_v30  ;;  %v3326_v1 = vld [vmem:[#allocation17] ss:$0 sm:$0xff] }
 0xcd9   : > { %v1784_v32 = vpack.c.bf16 %v1783_v31, %v1783_v31 }
 0xcdb   : > { %3505 = vmatmul.mubr.msk.bf16.vlgmr.msra.gmra.mrb[24].mxu1 %vm1226_vm2, %v1784_v32 }
 0xcdc   : > { %3518 = vmatprep.mubr.msk.bf16.mxu1 %vm4777_vm1, %v4776_v8  ;;  %3515 = vmatpush3.bf16.msra.mxu1 %v3904_v54 }
 0xcdd   : > { %3516 = vmatprep.subr.bf16.mxu1 %v4776_v8 }
 0xce0   : > { %3517 = vmatpush3.bf16.msra.mxu1 %v3905_v55 }
 0xce1   : > { %3530 = vmatprep.subr.bf16.mxu1 %v4776_v8 }
 0xdae   : > { %v1827_v34 = vpop.f32.mrb[24].mxu1 }
 0xdaf   : > { %v1833_v35 = vpack.c.bf16 %v1827_v34, %v1827_v34  ;;  %v3506_v37 = vpop.f32.mrb[25].mxu1 }
 0xdb0   : > { %v1830_v38 = vpop.f32.mrb[26].mxu1 }
 0xdb1   : > { %v3507_v36 = vpop.f32.mrb[27].mxu1  ;;  %3511 = vmatmul.mubr.msk.bf16.vlgmr.msra.gmra.mrb[20].mxu0 %vm1226_vm2, %v1833_v35 }
 0xdb2   : > { %3526 = vmatprep.mubr.msk.bf16.mxu0 %vm4777_vm1, %v4776_v8  ;;  %3523 = vmatpush3.bf16.msra.mxu0 %v3901_v52 }
 0xdb3   : > { %3524 = vmatprep.subr.bf16.mxu0 %v4776_v8 }
 0xe84   : > { %v1876_v39 = vpop.f32.mrb[20].mxu0 }
 0xe85   : > { %v1882_v40 = vadd.f32 %v1876_v39, %v1719_v23  ;;  %v3512_v41 = vpop.f32.mrb[21].mxu0  ;;  %v2121_v23 = vshrl.u32 %v2120_v25, 7 }
 0xe86   : > { %v1879_v42 = vpop.f32.mrb[22].mxu0 }
 0xe87   : > { %v1883_v43 = vadd.f32 %v1882_v40, %v5649_v0  ;;  %v3513_v44 = vpop.f32.mrb[23].mxu0  ;;  %v3902_v0 = vld [vmem:[#allocation25 + $0x8] sm:$0xff]   ;;  %v2122_v24 = vsub.s32 0, %v2121_v23 }
 0xe88   : > { %3525 = vmatpush3.bf16.msra.mxu0 %v3902_v0 }
 0xe89   : > { %v5776_v45 = vadd.f32 %v3326_v1, %v1883_v43  ;;  %3536 = vmatprep.subr.bf16.mxu0 %v4776_v8  ;;  %v5816_v27 = vrot.slane %v2062_v26, %v2122_v24 }
 0xe8b   : > { %v1894_v46 = vsel %vm1129_vm0, %v5776_v45, 0.0  ;;  %3527 = vmatmul.mubr.msk.bf16.vlgmr.msra.gmra.mrb[24].mxu0 %vm1129_vm0, %v3903_v53 }
 0xe8c   : > { %1895 = vadd.xlane.f32.xlu1 %v1894_v46  ;;  %3538 = vmatprep.mubr.msk.bf16.mxu0 %vm4777_vm1, %v4776_v8 }
 0xf19   : > { %v1896_v47 = vpop.xlane.xlu1 %1895 }
 0xf1a   : > { %v1897_v48 = vmul.f32 0.03125, %v1896_v47 }
 0xf1c   : > { %v1898_v49 = vsub.f32 %v5776_v45, %v1897_v48  ;;  %v2064_v48 = vsel %vm2063_vm6, %v2062_v26, -inf }
 0xf1e   : > { %v1899_v50 = vmul.f32 %v1898_v49, %v1898_v49 }
 0xf20   : > { %v1900_v51 = vsel %vm1129_vm0, %v1899_v50, 0.0 }
 0xf21   : > { %1901 = vadd.xlane.f32.xlu1 %v1900_v51 }
 0xf5e   : > { %v2055_v5 = vpop.f32.mrb[24].mxu0 }
 0xf5f   : > { %v2056_v6 = vadd.f32 %v3333_v4, %v2055_v5  ;;  %v3528_v7 = vpop.f32.mrb[25].mxu0 }
 0xf60   : > { %v2058_v9 = vpop.f32.mrb[26].mxu0 }
 0xf61   : > { %v2059_v10 = vadd.f32 %v3333_v4, %v2058_v9  ;;  %v3529_v11 = vpop.f32.mrb[27].mxu0 }
 0xf63   : > { %v5794_v12 = vpack.c.bf16 %v2059_v10, %v2056_v6  ;;  %v2192_v6 = vld [vmem:[#allocation28] sm:$0xf] }
 0xf64   : > { %v2358_v10 = vsel %vm1303_vm4, %v2192_v6, 0 }
 0xf65   : > { %2196 = vrot.lane.b32.xlu1 %v5794_v12, %s4778_s2  ;;  %v2076_v13 = vsel %vm1226_vm2, %v5794_v12, 0 }
 0xfae   : > { %v1902_v56 = vpop.xlane.xlu1 %1901 }
 0xfaf   : > { %v1903_v57 = vmul.f32 0.03125, %v1902_v56 }
 0xfb1   : > { %v1904_v58 = vadd.f32 1e-12, %v1903_v57 }
 0xfb3   : > { %3930 = vrsqrt.f32 %v1904_v58 }
 0xfbd   : > { %v3931_v59 = vpop.eup %3930 }
 0xfbe   : > { %v1906_v61 = vmul.f32 %v3931_v59, %v1898_v49 }
 0xfc0   : > { %v1913_v63 = vmul.f32 %v3327_v60, %v1906_v61 }
 0xfc2   : > { %v1920_v2 = vadd.f32 %v3328_v62, %v1913_v63  ;;  %v2307_v62 = vld [vmem:[#allocation28 + $0x4] sm:$0xf] }
 0xfc3   : > { %v2312_v63 = vsel %vm1303_vm4, %v2307_v62, 0 }
 0xfc4   : > { %v1921_v3 = vpack.c.bf16 %v1920_v2, %v1920_v2 }
 0xfc6   : > { %3519 = vmatmul.mubr.msk.bf16.vlgmr.msra.gmra.mrb[28].mxu1 %vm1129_vm0, %v1921_v3 }
 0xfc7   : > { %3532 = vmatprep.mubr.msk.bf16.mxu1 %vm4777_vm1, %v4776_v8  ;;  %3531 = vmatpush3.bf16.xpose.msra.mxu1 %v2076_v13 }
 0xfc8   : > { %3542 = vmatprep.subr.bf16.mxu1 %v4776_v8 }
 0xfd7   : > { %v2197_v16 = vpop.permute.xlu1 %2196 }
 0xfd8   : > { %v2202_v33 = vsel %vm1226_vm2, %v2197_v16, 0 }
0x1099   : > { %v1982_v15 = vpop.f32.mrb[28].mxu1 }
0x109a   : > { %v1983_v17 = vadd.f32 %v3329_v14, %v1982_v15  ;;  %v3520_v18 = vpop.f32.mrb[29].mxu1 }
0x109b   : > { %v1985_v19 = vpop.f32.mrb[30].mxu1 }
0x109c   : > { %v5801_v20 = vpack.c.bf16 %v1983_v17, %v1983_v17  ;;  %v3521_v21 = vpop.f32.mrb[31].mxu1 }
0x109e   : > { %2194 = vrot.lane.b32.xlu0 %v5801_v20, %s4778_s2  ;;  %3533 = vmatmul.mubr.msk.bf16.vlgmr.msra.gmra.mrb[32].mxu1 %vm1226_vm2, %v5801_v20 }
0x109f   : > { %3543 = vmatpush3.bf16.xpose.msra.mxu1 %v2202_v33  ;;  %3544 = vmatprep.mubr.msk.bf16.mxu1 %vm4777_vm1, %v4776_v8 }
0x10a0   : > { %3554 = vmatprep.subr.bf16.mxu1 %v4776_v8 }
0x1110   : > { %v2195_v22 = vpop.permute.xlu0 %2194 }
0x1111   : > { %3545 = vmatmul.mubr.msk.bf16.vlgmr.msra.gmra.mrb[36].mxu1 %vm1226_vm2, %v2195_v22 }
0x1112   : > { %3556 = vmatprep.mubr.msk.bf16.mxu1 %vm4777_vm1, %v4776_v8  ;;  %3555 = vmatpush3.bf16.msra.mxu1 %v2312_v63 }
0x1113   : > { %3566 = vmatprep.subr.bf16.mxu1 %v4776_v8 }
0x1171   : > { %v2112_v28 = vpop.f32.mrb[32].mxu1 }
0x1172   : > { %v2118_v29 = vmul.f32 0.35355338, %v2112_v28  ;;  %v3534_v30 = vpop.f32.mrb[33].mxu1 }
0x1173   : > { %v2115_v31 = vpop.f32.mrb[34].mxu1 }
0x1174   : > { %v3535_v32 = vpop.f32.mrb[35].mxu1  ;;  %v2125_v34 = vadd.f32 %v5816_v27, %v2118_v29 }
0x1176   : > { %v2127_v35 = vsel %vm2126_vm5, %v2125_v34, -inf }
0x1177   : > { %2128 = vmax.xlane.f32.xlu0 %v2127_v35 }
0x11e4   : > { %v2238_v37 = vpop.f32.mrb[36].mxu1 }
0x11e5   : > { %v2244_v38 = vmul.f32 0.35355338, %v2238_v37  ;;  %v3546_v36 = vpop.f32.mrb[37].mxu1 }
0x11e6   : > { %v2241_v39 = vpop.f32.mrb[38].mxu1 }
0x11e7   : > { %v3547_v40 = vpop.f32.mrb[39].mxu1  ;;  %v2245_v41 = vadd.f32 %v2244_v38, %v5816_v27 }
0x11e9   : > { %v2246_v1 = vsel %vm2126_vm5, %v2245_v41, -inf }
0x11ea   : > { %2247 = vmax.xlane.f32.xlu1 %v2246_v1 }
0x11fb   : > { %2145 = vrot.lane.b32.xlu1 %v5794_v12, %s4779_s20 }
0x11ff   : > { %2402 = vrot.lane.b32.xlu1 %v5794_v12, %s4784_s25 }
0x1203   : > { %2400 = vrot.lane.b32.xlu1 %v5801_v20, %s4784_s25 }
0x1204   : > { %v2129_v42 = vpop.xlane.xlu0 %2128 }
0x1205   : > { %v2130_v43 = vsub.f32 %v2125_v34, %v2129_v42 }
0x1207   : > { %v2131_v44 = vmul.f32 1.442695, %v2130_v43 }
0x1209   : > { %3932 = vpow2.f32 %v2131_v44 }
0x1213   : > { %v3933_v46 = vpop.eup %3932 }
0x1214   : > { %v2133_v47 = vsel %vm2126_vm5, %v3933_v46, 0.0 }
0x1215   : > { %2134 = vadd.xlane.f32.xlu0 %v2133_v47 }
0x1219   : > { %2065 = vmax.xlane.f32.xlu0 %v2064_v48 }
0x1277   : > { %v2248_v49 = vpop.xlane.xlu1 %2247 }
0x1278   : > { %v2249_v50 = vsub.f32 %v2245_v41, %v2248_v49 }
0x127a   : > { %v2250_v51 = vmul.f32 1.442695, %v2249_v50 }
0x127b   : > { %v2146_v52 = vpop.permute.xlu1 %2145 }
0x127c   : > { %3934 = vpow2.f32 %v2250_v51  ;;  %3537 = vmatpush3.bf16.msra.mxu0 %v2146_v52 }
0x127d   : > { %3548 = vmatprep.subr.bf16.mxu0 %v4776_v8 }
0x127f   : > { %v2403_v17 = vpop.permute.xlu1 %2402 }
0x1280   : > { %v2408_v22 = vsel %vm1226_vm2, %v2403_v17, 0 }
0x1283   : > { %v2401_v23 = vpop.permute.xlu1 %2400 }
0x1286   : > { %v3935_v0 = vpop.eup %3934 }
0x1287   : > { %v2252_v53 = vsel %vm2126_vm5, %v3935_v0, 0.0 }
0x1288   : > { %2253 = vadd.xlane.f32.xlu0 %v2252_v53 }
0x129e   : > { %2259 = vrot.lane.b32.xlu0 %v5794_v12, %s4780_s17 }
0x12a2   : > { %v2135_v54 = vpop.xlane.xlu0 %2134 }
0x12a3   : > { %3936 = vrcp.f32 %v2135_v54 }
0x12a6   : > { %v2066_v55 = vpop.xlane.xlu0 %2065 }
0x12a7   : > { %vm2067_vm7 = vcmp.gt.f32.partialorder %v2066_v55, -1.0  ;;  %v2513_v55 = vld [vmem:[#allocation28 + $0x8] sm:$0xf] }
0x12a8   : > { %v3338_v56 = vsel %vm2067_vm7, 1.0, %v4776_v8 }
0x12a9   : > { %v5834_v57 = vrot.slane %v3338_v56, %v2122_v24  ;;  %v2518_v56 = vsel %vm1303_vm4, %v2513_v55, 0 }
0x12ad   : > { %v3937_v58 = vpop.eup %3936 }
0x12ae   : > { %v2137_v59 = vmul.f32 %v3937_v58, %v3933_v46 }
0x12b0   : > { %v2142_v60 = vmul.f32 %v5834_v57, %v2137_v59 }
0x12b2   : > { %v2143_v61 = vpack.c.bf16 %v2142_v60, %v2142_v60 }
0x12b4   : > { %3539 = vmatmul.mubr.msk.bf16.vlgmr.msra.gmra.mrb[28].mxu0 %vm2126_vm5, %v2143_v61 }
0x12b5   : > { %3550 = vmatprep.mubr.msk.bf16.mxu0 %vm4777_vm1, %v4776_v8 }
0x1315   : > { %v2254_v2 = vpop.xlane.xlu0 %2253 }
0x1316   : > { %3938 = vrcp.f32 %v2254_v2 }
0x1319   : > { %v2260_v3 = vpop.permute.xlu0 %2259 }
0x131a   : > { %3549 = vmatpush3.bf16.msra.mxu0 %v2260_v3 }
0x131b   : > { %3560 = vmatprep.subr.bf16.mxu0 %v4776_v8 }
0x1320   : > { %v3939_v4 = vpop.eup %3938 }
0x1321   : > { %v2256_v5 = vmul.f32 %v3939_v4, %v3935_v0 }
0x1323   : > { %v2257_v7 = vmul.f32 %v2256_v5, %v5834_v57 }
0x1325   : > { %v2258_v9 = vpack.c.bf16 %v2257_v7, %v2257_v7 }
0x1327   : > { %3551 = vmatmul.mubr.msk.bf16.vlgmr.msra.gmra.mrb[32].mxu0 %vm2126_vm5, %v2258_v9 }
0x1328   : > { %3561 = vmatpush3.bf16.msra.mxu0 %v2358_v10  ;;  %3562 = vmatprep.mubr.msk.bf16.mxu0 %vm4777_vm1, %v4776_v8 }
0x1329   : > { %3572 = vmatprep.subr.bf16.mxu0 %v4776_v8 }
0x1387   : > { %v2185_v11 = vpop.f32.mrb[28].mxu0 }
0x1388   : > { %v2191_v13 = vpack.c.bf16 %v2185_v11, %v2185_v11  ;;  %v3540_v14 = vpop.f32.mrb[29].mxu0 }
0x1389   : > { %v2188_v15 = vpop.f32.mrb[30].mxu0 }
0x138a   : > { %v3541_v16 = vpop.f32.mrb[31].mxu0  ;;  %3563 = vmatmul.mubr.msk.bf16.vlgmr.msra.gmra.mrb[36].mxu0 %vm1226_vm2, %v2191_v13  ;;  %v2674_v15 = vld [vmem:[#allocation28 + $0xc] sm:$0xf] }
0x138b   : > { %3574 = vmatprep.mubr.msk.bf16.mxu0 %vm4777_vm1, %v4776_v8  ;;  %v2679_v16 = vsel %vm1303_vm4, %v2674_v15, 0 }
0x13fa   : > { %v2299_v18 = vpop.f32.mrb[32].mxu0 }
0x13fb   : > { %v2305_v19 = vpack.c.bf16 %v2299_v18, %v2299_v18  ;;  %v3552_v21 = vpop.f32.mrb[33].mxu0 }
0x13fc   : > { %v2302_v33 = vpop.f32.mrb[34].mxu0 }
0x13fd   : > { %v3553_v25 = vpop.f32.mrb[35].mxu0  ;;  %3557 = vmatmul.mubr.msk.bf16.vlgmr.msra.gmra.mrb[40].mxu1 %vm1226_vm2, %v2305_v19 }
0x13fe   : > { %3567 = vmatpush3.bf16.xpose.msra.mxu1 %v2408_v22  ;;  %3568 = vmatprep.mubr.msk.bf16.mxu1 %vm4777_vm1, %v4776_v8 }
0x13ff   : > { %3578 = vmatprep.subr.bf16.mxu1 %v4776_v8 }
0x1405   : > { %3569 = vmatmul.mubr.msk.bf16.vlgmr.msra.gmra.mrb[44].mxu1 %vm1226_vm2, %v2401_v23 }
0x1406   : > { %3580 = vmatprep.mubr.msk.bf16.mxu1 %vm4777_vm1, %v4776_v8  ;;  %3579 = vmatpush3.bf16.msra.mxu1 %v2518_v56 }
0x1407   : > { %3590 = vmatprep.subr.bf16.mxu1 %v4776_v8 }
0x145d   : > { %v2394_v24 = vpop.f32.mrb[36].mxu0 }
0x145e   : > { %v3564_v26 = vpop.f32.mrb[37].mxu0 }
0x145f   : > { %v2397_v28 = vpop.f32.mrb[38].mxu0 }
0x1460   : > { %v3565_v29 = vpop.f32.mrb[39].mxu0 }
0x14d0   : > { %v2348_v30 = vpop.f32.mrb[40].mxu1 }
0x14d1   : > { %v5860_v31 = vadd.f32 %v2394_v24, %v2348_v30  ;;  %v3558_v32 = vpop.f32.mrb[41].mxu1 }
0x14d2   : > { %v2351_v34 = vpop.f32.mrb[42].mxu1 }
0x14d3   : > { %v3559_v35 = vpop.f32.mrb[43].mxu1 }
0x14d8   : > { %v2444_v37 = vpop.f32.mrb[44].mxu1 }
0x14d9   : > { %v2450_v38 = vmul.f32 0.35355338, %v2444_v37  ;;  %v3570_v36 = vpop.f32.mrb[45].mxu1 }
0x14da   : > { %v2447_v39 = vpop.f32.mrb[46].mxu1 }
0x14db   : > { %v3571_v40 = vpop.f32.mrb[47].mxu1  ;;  %v2451_v41 = vadd.f32 %v2450_v38, %v5816_v27 }
0x14dd   : > { %v2452_v1 = vsel %vm2126_vm5, %v2451_v41, -inf }
0x14de   : > { %2453 = vmax.xlane.f32.xlu0 %v2452_v1 }
0x14f4   : > { %2465 = vrot.lane.b32.xlu0 %v5794_v12, %s4783_s27 }
0x14f8   : > { %2561 = vrot.lane.b32.xlu0 %v5801_v20, %s4786_s0 }
0x156b   : > { %v2454_v42 = vpop.xlane.xlu0 %2453 }
0x156c   : > { %v2455_v43 = vsub.f32 %v2451_v41, %v2454_v42 }
0x156e   : > { %v2456_v44 = vmul.f32 1.442695, %v2455_v43 }
0x156f   : > { %v2466_v46 = vpop.permute.xlu0 %2465 }
0x1570   : > { %3940 = vpow2.f32 %v2456_v44  ;;  %3573 = vmatpush3.bf16.msra.mxu0 %v2466_v46  ;;  %v3906_v46 = vld [vmem:[#allocation34] sm:$0xff]  }
0x1571   : > { %3584 = vmatprep.subr.bf16.mxu0 %v4776_v8 }
0x1573   : > { %v2562_v54 = vpop.permute.xlu0 %2561 }
0x157a   : > { %v3941_v47 = vpop.eup %3940 }
0x157b   : > { %v2458_v48 = vsel %vm2126_vm5, %v3941_v47, 0.0 }
0x157c   : > { %2459 = vadd.xlane.f32.xlu1 %v2458_v48  ;;  %v3908_v48 = vld [vmem:[#allocation37] sm:$0xff]  }
0x158d   : > { %2563 = vrot.lane.b32.xlu1 %v5794_v12, %s4786_s0 }
0x1609   : > { %v2460_v49 = vpop.xlane.xlu1 %2459 }
0x160a   : > { %3942 = vrcp.f32 %v2460_v49 }
0x160d   : > { %v2564_v52 = vpop.permute.xlu1 %2563 }
0x160e   : > { %v2569_v53 = vsel %vm1226_vm2, %v2564_v52, 0  ;;  %v3352_v52 = vld [vmem:[#allocation31] ss:$0 sm:$0xff] }
0x1614   : > { %v3943_v50 = vpop.eup %3942 }
0x1615   : > { %v2462_v51 = vmul.f32 %v3943_v50, %v3941_v47  ;;  %v3907_v47 = vld [vmem:[#allocation34 + $0x8] sm:$0xff]  }
0x1617   : > { %v2463_v20 = vmul.f32 %v2462_v51, %v5834_v57 }
0x1619   : > { %v2464_v0 = vpack.c.bf16 %v2463_v20, %v2463_v20 }
0x161b   : > { %3575 = vmatmul.mubr.msk.bf16.vlgmr.msra.gmra.mrb[40].mxu0 %vm2126_vm5, %v2464_v0 }
0x161c   : > { %3585 = vmatpush3.bf16.xpose.msra.mxu0 %v2569_v53  ;;  %3586 = vmatprep.mubr.msk.bf16.mxu0 %vm4777_vm1, %v4776_v8  ;;  %v3353_v53 = vld [vmem:[#allocation32] ss:$0 sm:$0xff] }
0x161d   : > { %3596 = vmatprep.subr.bf16.mxu0 %v4776_v8 }
0x1623   : > { %3587 = vmatmul.mubr.msk.bf16.vlgmr.msra.gmra.mrb[44].mxu0 %vm1226_vm2, %v2562_v54 }
0x1624   : > { %3598 = vmatprep.mubr.msk.bf16.mxu0 %vm4777_vm1, %v4776_v8  ;;  %3597 = vmatpush3.bf16.msra.mxu0 %v2679_v16 }
0x1625   : > { %3610 = vmatprep.subr.bf16.mxu0 %v4776_v8 }
0x16ee   : > { %v2505_v58 = vpop.f32.mrb[40].mxu0 }
0x16ef   : > { %v2511_v59 = vpack.c.bf16 %v2505_v58, %v2505_v58  ;;  %v3576_v60 = vpop.f32.mrb[41].mxu0  ;;  %v3910_v58 = vld [vmem:[#allocation37 + $0x10] sm:$0xff]  }
0x16f0   : > { %v2508_v61 = vpop.f32.mrb[42].mxu0  ;;  %v3354_v60 = vld [vmem:[#allocation35] ss:$0 sm:$0xff] }
0x16f1   : > { %v3577_v62 = vpop.f32.mrb[43].mxu0  ;;  %3581 = vmatmul.mubr.msk.bf16.vlgmr.msra.gmra.mrb[48].mxu1 %vm1226_vm2, %v2511_v59  ;;  %v3911_v59 = vld [vmem:[#allocation37 + $0x18] sm:$0xff]  }
0x16f2   : > { %3592 = vmatprep.mubr.msk.bf16.mxu1 %vm4777_vm1, %v4776_v8 }
0x16f6   : > { %v2605_v63 = vpop.f32.mrb[44].mxu0 }
0x16f7   : > { %v2611_v2 = vmul.f32 0.35355338, %v2605_v63  ;;  %v3588_v3 = vpop.f32.mrb[45].mxu0 }
0x16f8   : > { %v2608_v4 = vpop.f32.mrb[46].mxu0 }
0x16f9   : > { %v3589_v5 = vpop.f32.mrb[47].mxu0  ;;  %v2612_v6 = vadd.f32 %v2611_v2, %v5816_v27 }
0x16fb   : > { %v2613_v7 = vsel %vm2126_vm5, %v2612_v6, -inf }
0x16fc   : > { %2614 = vmax.xlane.f32.xlu1 %v2613_v7 }
0x1789   : > { %v2615_v9 = vpop.xlane.xlu1 %2614 }
0x178a   : > { %v2616_v10 = vsub.f32 %v2612_v6, %v2615_v9  ;;  %v3358_v6 = vld [vmem:[#allocation38] ss:$0 sm:$0xff] }
0x178c   : > { %v2617_v11 = vmul.f32 1.442695, %v2616_v10 }
0x178e   : > { %3944 = vpow2.f32 %v2617_v11 }
0x1798   : > { %v3945_v13 = vpop.eup %3944 }
0x1799   : > { %v2619_v14 = vsel %vm2126_vm5, %v3945_v13, 0.0 }
0x179a   : > { %2620 = vadd.xlane.f32.xlu0 %v2619_v14 }
0x17b0   : > { %2626 = vrot.lane.b32.xlu0 %v5794_v12, %s4785_s16 }
0x17c4   : > { %v2554_v27 = vpop.f32.mrb[48].mxu1 }
0x17c5   : > { %v2560_v17 = vadd.f32 %v2554_v27, %v5860_v31  ;;  %v3582_v18 = vpop.f32.mrb[49].mxu1 }
0x17c6   : > { %v2557_v19 = vpop.f32.mrb[50].mxu1 }
0x17c7   : > { %v3583_v21 = vpop.f32.mrb[51].mxu1 }
0x1827   : > { %v2621_v33 = vpop.xlane.xlu0 %2620 }
0x1828   : > { %3946 = vrcp.f32 %v2621_v33 }
0x182b   : > { %v2627_v22 = vpop.permute.xlu0 %2626 }
0x182c   : > { %3591 = vmatpush3.bf16.msra.mxu1 %v2627_v22 }
0x182d   : > { %3602 = vmatprep.subr.bf16.mxu1 %v4776_v8 }
0x1832   : > { %v3947_v25 = vpop.eup %3946 }
0x1833   : > { %v2623_v12 = vmul.f32 %v3947_v25, %v3945_v13 }
0x1835   : > { %v2624_v23 = vmul.f32 %v2623_v12, %v5834_v57  ;;  %v3351_v57 = vld [vmem:[#allocation29] ss:$0 sm:$0xff] }
0x1837   : > { %v2625_v24 = vpack.c.bf16 %v2624_v23, %v2624_v23 }
0x1839   : > { %3593 = vmatmul.mubr.msk.bf16.vlgmr.msra.gmra.mrb[52].mxu1 %vm2126_vm5, %v2625_v24 }
0x183a   : > { %3606 = vmatprep.mubr.msk.bf16.mxu1 %vm4777_vm1, %v4776_v8  ;;  %3603 = vmatpush3.bf16.msra.mxu1 %v3906_v46 }
0x183b   : > { %3604 = vmatprep.subr.bf16.mxu1 %v4776_v8 }
0x183e   : > { %3605 = vmatpush3.bf16.msra.mxu1 %v3907_v47 }
0x190c   : > { %v2666_v26 = vpop.f32.mrb[52].mxu1 }
0x190d   : > { %v2672_v28 = vpack.c.bf16 %v2666_v26, %v2666_v26  ;;  %v3594_v29 = vpop.f32.mrb[53].mxu1 }
0x190e   : > { %v2669_v30 = vpop.f32.mrb[54].mxu1 }
0x190f   : > { %v3595_v31 = vpop.f32.mrb[55].mxu1  ;;  %3599 = vmatmul.mubr.msk.bf16.vlgmr.msra.gmra.mrb[48].mxu0 %vm1226_vm2, %v2672_v28 }
0x1910   : > { %3618 = vmatprep.mubr.msk.bf16.mxu0 %vm4777_vm1, %v4776_v8  ;;  %3611 = vmatpush3.bf16.msra.mxu0 %v3908_v48 }
0x1911   : > { %3612 = vmatprep.subr.bf16.mxu0 %v4776_v8 }
0x19e2   : > { %v2715_v32 = vpop.f32.mrb[48].mxu0 }
0x19e3   : > { %v2721_v34 = vadd.f32 %v2715_v32, %v2560_v17  ;;  %v3600_v35 = vpop.f32.mrb[49].mxu0 }
0x19e4   : > { %v2718_v37 = vpop.f32.mrb[50].mxu0 }
0x19e5   : > { %v2722_v38 = vadd.f32 %v2721_v34, %v5776_v45  ;;  %v3601_v36 = vpop.f32.mrb[51].mxu0  ;;  %v3909_v45 = vld [vmem:[#allocation37 + $0x8] sm:$0xff]  }
0x19e6   : > { %3613 = vmatpush3.bf16.msra.mxu0 %v3909_v45 }
0x19e7   : > { %v2730_v39 = vadd.f32 %v3351_v57, %v2722_v38  ;;  %3614 = vmatprep.subr.bf16.mxu0 %v4776_v8 }
0x19e9   : > { %v2733_v40 = vsel %vm1129_vm0, %v2730_v39, 0.0 }
0x19ea   : > { %2734 = vadd.xlane.f32.xlu1 %v2733_v40  ;;  %3615 = vmatpush3.bf16.msra.mxu0 %v3910_v58 }
0x19eb   : > { %3616 = vmatprep.subr.bf16.mxu0 %v4776_v8 }
0x19ee   : > { %3617 = vmatpush3.bf16.msra.mxu0 %v3911_v59 }
0x1a77   : > { %v2735_v41 = vpop.xlane.xlu1 %2734 }
0x1a78   : > { %v2736_v1 = vmul.f32 0.03125, %v2735_v41 }
0x1a7a   : > { %v2737_v42 = vsub.f32 %v2730_v39, %v2736_v1 }
0x1a7c   : > { %v2738_v43 = vmul.f32 %v2737_v42, %v2737_v42 }
0x1a7e   : > { %v2739_v44 = vsel %vm1129_vm0, %v2738_v43, 0.0 }
0x1a7f   : > { %2740 = vadd.xlane.f32.xlu1 %v2739_v44 }
0x1b0c   : > { %v2741_v49 = vpop.xlane.xlu1 %2740 }
0x1b0d   : > { %v2742_v50 = vmul.f32 0.03125, %v2741_v49 }
0x1b0f   : > { %v2743_v51 = vadd.f32 1e-12, %v2742_v50 }
0x1b11   : > { %3948 = vrsqrt.f32 %v2743_v51 }
0x1b1b   : > { %v3949_v20 = vpop.eup %3948 }
0x1b1c   : > { %v2745_v0 = vmul.f32 %v3949_v20, %v2737_v42 }
0x1b1e   : > { %v2752_v54 = vmul.f32 %v3352_v52, %v2745_v0 }
0x1b20   : > { %v2759_v55 = vadd.f32 %v3353_v53, %v2752_v54 }
0x1b22   : > { %v2760_v56 = vpack.c.bf16 %v2759_v55, %v2759_v55 }
0x1b24   : > { %3607 = vmatmul.mubr.msk.bf16.vlgmr.msra.gmra.mrb[56].mxu1 %vm1129_vm0, %v2760_v56 }
0x1bf7   : > { %v2821_v61 = vpop.f32.mrb[56].mxu1 }
0x1bf8   : > { %v2822_v62 = vadd.f32 %v3354_v60, %v2821_v61  ;;  %v3608_v63 = vpop.f32.mrb[57].mxu1 }
0x1bf9   : > { %v2824_v2 = vpop.f32.mrb[58].mxu1 }
0x1bfa   : > { %v2827_v3 = vmax.f32 %v2822_v62, 0.0  ;;  %v3609_v4 = vpop.f32.mrb[59].mxu1 }
0x1bfc   : > { %v2828_v5 = vpack.c.bf16 %v2827_v3, %v2827_v3 }
0x1bfe   : > { %3619 = vmatmul.mubr.msk.bf16.vlgmr.msra.gmra.mrb[52].mxu0 %vm2868_vm8, %v2828_v5 }
0x1cd1   : > { %v2906_v7 = vpop.f32.mrb[52].mxu0 }
0x1cd2   : > { %v2907_v8 = vadd.f32 %v3358_v6, %v2906_v7  ;;  %v3620_v9 = vpop.f32.mrb[53].mxu0 }
0x1cd3   : > { %v2909_v10 = vpop.f32.mrb[54].mxu0 }
0x1cd4   : > { %v2912_v11 = vadd.f32 %v2907_v8, %v2730_v39  ;;  %v3621_v13 = vpop.f32.mrb[55].mxu0 }
0x1cd6   : > { %2913 = vst.msk [vmem:[%s1124_s14] sm:$0xff] %vm1129_vm0, %v2912_v11 }
0x1cd7   : > { %4643 = shalt.err (!%p4640_p8)
}
0x1cd8   : > { %s4644_s1 = scalar_lea.hbm %s5915_s30, 128  ;;  %s4648_s17 = scalar_lea.hbm %s6149_s22, 256 }
0x1cd9   : > { %p4645_p1 = scmp.ne.s32.totalorder %s5915_s30, %s4644_s1  ;;  %p4649_p4 = scmp.lt.u32.totalorder %s5915_s30, %s6149_s22 }
0x1cda   : > { %p4650_p10 = scmp.lt.u32.totalorder %s4648_s17, %s4644_s1  ;;  %p4652_p2 = scmp.lt.u32.totalorder %s4644_s1, %s5915_s30 }
0x1cdb   : > { %p4646_p12 = pnand %p4645_p1, %p6150_p0 }
0x1cdc   : > { %p4651_p11 = por %p4650_p10, %p4649_p4 }
0x1cdd   : > { %p4647_p6 = pneg %p4646_p12 }
0x1cde   : > { %p4653_p5 = por %p4652_p2, %p4651_p11 }
0x1ce0   : > { %p4654_p9 = pnand %p4653_p5, %p4647_p6 }
0x1ce2   : > { %4657 = shalt.err (!%p4654_p9)
}
0x1ce3   : > { %3710 = dma.vmem_to_hbm [thread:$0]  (%p6150_p0), %s5917_s24, 128, %s5915_s30, %s2915_s23  }
0x1ce4 PF: > { %s6151_s27 = sld [smem:[#allocation56_spill]]  ;;  %s6152_s25 = sld [smem:[#allocation65_spill]] }
0x1ce5   : > { %p6154_p13 = scmp.ge.s32.totalorder %s4748_s28, 2 }
0x1cea   : > { %s2940_s16 = sand.u32 1, %s6151_s27   ;;  %p6153_p3 = scmp.ne.s32.totalorder %s6152_s25, 0 }
0x1ceb   : > { %s2941_s0 = scalar_lea.sflag [#allocation4], %s2940_s16 }
0x1cec   : > { %p3787_p7 = pnand %p6154_p13, %p6153_p3 }
0x1cee   : > { %4731 = dma.done.wait (!%p3787_p7), %s2941_s0, 128  }
0x1cef   : > { %4733 = vsyncadd (!%p3787_p7), %s2941_s0, 4294967168  ;;  %s6155_s28 = sld [smem:[#allocation61_spill]]  ;;  %s6156_s5 = sld [smem:[#allocation57_spill]] }
0x1cf0   : > { %s6157_s26 = sld [smem:[#allocation58_spill]]  ;;  %s6158_s27 = sld [smem:[#allocation62_spill]] }
0x1cf5   : > { %p53_p8 = scmp.ge.s32.totalorder %s6155_s28, 4  }
0x1cf7   :  { %55 = sbr.rel (!%p53_p8) target bundleno = 45 (0x2d), region = 284 }
0x1cfe   :  { %2946 = vsyncpa [#allocation3], 1 }
0x1cff   :  { %2948 = vsyncpa [#allocation3 + $0x1], 1 }
0x1d00   :  { %2949 = vsyncpa [#allocation6], 1 }
0x1d01   :  { %2951 = vsyncpa [#allocation6 + $0x1], 1 }
0x1d02   :  { %2952 = vsyncpa [#allocation9], 1 }
0x1d03   :  { %2954 = vsyncpa [#allocation9 + $0x1], 1 }
0x1d04   :  { %2955 = vsyncpa [#allocation12], 1 }
0x1d05   :  { %2956 = vsyncpa [#allocation15], 1 }
0x1d06   :  { %2957 = vsyncpa [#allocation18], 1 }
0x1d07   :  { %2958 = vsyncpa [#allocation21], 1 }
0x1d08   :  { %2959 = vsyncpa [#allocation24], 1 }
0x1d09   :  { %2960 = vsyncpa [#allocation27], 1 }
0x1d0a   :  { %2961 = vsyncpa [#allocation30], 1 }
0x1d0b   :  { %2962 = vsyncpa [#allocation33], 1 }
0x1d0c   :  { %2963 = vsyncpa [#allocation36], 1 }
0x1d0d   :  { %2964 = vsyncpa [#allocation39], 1 }
0x1d0e   :  { %2965 = vsyncpa [#allocation4], 1 }
0x1d0f   :  { %2967 = vsyncpa [#allocation4 + $0x1], 1 }

</bundles_post_ra>
